<compile_context>
chip_gen: v7x
topology: tpu7x:2x2x1
jax: 0.10.0
libtpu: 0.0.40
codegen_flags: <defaults>
</compile_context>

<pallas_src>
import functools

import jax
import jax.numpy as jnp
from jax.experimental import pallas as pl
from jax.experimental.pallas import tpu as pltpu

_VMEM_LIMIT_BYTES = 32 * 1024 * 1024   # >= worst-case ~14 MiB live; safe on v5e/v6e/v7x
_MAX_TILE_M_CONV = 1024                # conv/patch matmul M cap (item 5)
_MAX_TILE_M_FC = 512                   # fc batch-tile cap (keeps fused-fc live set small)


def _tile_m(m, max_tile, align=16):
    """Pick an M tile: aligned, capped, and split into >=2 tiles whenever M allows
    so the 'parallel' grid axis can shard across v7x's two TensorCores."""
    if m <= align:
        return m                                   # single full-extent block (legal)
    half = -(-(-(-m // 2)) // align) * align       # ceil(ceil(m/2)/align)*align
    full = -(-m // align) * align
    return max(align, min(max_tile, half, full))


# ---------------------------------------------------------------------------
# Pallas kernel 1: tiled  y = relu?(x @ w + b)   (used by every conv layer)
# ---------------------------------------------------------------------------
def _matmul_bias_act_kernel(apply_relu, x_ref, w_ref, b_ref, o_ref):
    acc = jnp.dot(x_ref[...], w_ref[...], preferred_element_type=jnp.float32)
    acc = acc + b_ref[...]                       # (1, N) f32, broadcast over rows
    if apply_relu:                               # static Python flag (baked at trace)
        acc = jnp.maximum(acc, 0.0)
    o_ref[...] = acc.astype(o_ref.dtype)


def pallas_linear(x, w, b, *, relu, out_dtype, max_tile_m=_MAX_TILE_M_CONV):
    """x: (M, K) bf16, w: (K, N) bf16, b: (1, N) f32 -> (M, N) out_dtype."""
    M, K = x.shape
    N = w.shape[1]
    tm = _tile_m(M, max_tile_m)
    return pl.pallas_call(
        functools.partial(_matmul_bias_act_kernel, relu),
        grid=(pl.cdiv(M, tm),),
        in_specs=[
            pl.BlockSpec((tm, K), lambda i: (i, 0)),   # K kept whole (small here)
            pl.BlockSpec((K, N), lambda i: (0, 0)),    # weight tile stays resident
            pl.BlockSpec((1, N), lambda i: (0, 0)),
        ],
        out_specs=pl.BlockSpec((tm, N), lambda i: (i, 0)),
        out_shape=jax.ShapeDtypeStruct((M, N), out_dtype),
        compiler_params=pltpu.CompilerParams(
            dimension_semantics=("parallel",),
            vmem_limit_bytes=_VMEM_LIMIT_BYTES,
        ),
    )(x, w, b)


# ---------------------------------------------------------------------------
# Pallas kernel 2: fused fc1 + fc2, hidden dim processed in 128-wide chunks so
# only a (tm, 128) hidden slab is live between the two dots (review item 8).
# ---------------------------------------------------------------------------
def _fused_fc_kernel(x_ref, w1_ref, b1_ref, w2_ref, b2_ref, o_ref):
    x = x_ref[...]                                   # (tm, K) bf16
    acc = jnp.zeros(o_ref.shape, jnp.float32)        # (tm, Npad) f32
    for c in range(w1_ref.shape[0]):                 # static unroll (512/128 = 4)
        h = jnp.dot(x, w1_ref[c], preferred_element_type=jnp.float32)
        h = jnp.maximum(h + b1_ref[c], 0.0)          # f32 bias + ReLU, (tm, 128)
        acc = acc + jnp.dot(h.astype(w2_ref.dtype), w2_ref[c],
                            preferred_element_type=jnp.float32)
    o_ref[...] = (acc + b2_ref[...]).astype(o_ref.dtype)   # fc2: no activation


def pallas_fused_fc(x, w1, b1, w2, b2):
    """relu(x @ fc1 + b1) @ fc2 + b2 in one pallas_call.

    x: (M, K) bf16; w1: (HC, K, 128) bf16; b1: (HC, 1, 128) f32;
    w2: (HC, 128, Npad) bf16; b2: (1, Npad) f32 -> (M, Npad) f32.
    """
    M, K = x.shape
    hc = w1.shape[0]
    npad = w2.shape[2]
    tm = _tile_m(M, _MAX_TILE_M_FC)
    return pl.pallas_call(
        _fused_fc_kernel,
        grid=(pl.cdiv(M, tm),),
        in_specs=[
            pl.BlockSpec((tm, K), lambda i: (i, 0)),
            pl.BlockSpec((hc, K, 128), lambda i: (0, 0, 0)),    # fc1 weight resident
            pl.BlockSpec((hc, 1, 128), lambda i: (0, 0, 0)),
            pl.BlockSpec((hc, 128, npad), lambda i: (0, 0, 0)), # fc2 weight resident
            pl.BlockSpec((1, npad), lambda i: (0, 0)),
        ],
        out_specs=pl.BlockSpec((tm, npad), lambda i: (i, 0)),
        out_shape=jax.ShapeDtypeStruct((M, npad), jnp.float32),
        compiler_params=pltpu.CompilerParams(
            dimension_semantics=("parallel",),
            vmem_limit_bytes=_VMEM_LIMIT_BYTES,
        ),
    )(x, w1, b1, w2, b2)


# ---------------------------------------------------------------------------
# Conv2d (VALID, NHWC activations) = patch extraction + Pallas matmul kernel
# ---------------------------------------------------------------------------
def _patches_nhwc(x, kh, kw, stride):
    # Patch feature order is channel-major (c, kh, kw) == PyTorch weight.reshape(O,-1);
    # asserted explicitly in the self-test below.
    return jax.lax.conv_general_dilated_patches(
        x, filter_shape=(kh, kw), window_strides=(stride, stride),
        padding="VALID", dimension_numbers=("NHWC", "HWIO", "NHWC"))


def conv2d_relu_nhwc(x, w_mat, b, *, kh, kw, stride, out_channels):
    """x: (N,H,W,C) bf16; w_mat: (C*kh*kw, O) bf16; b: (1,O) f32 -> (N,OH,OW,O) bf16."""
    n = x.shape[0]
    patches = _patches_nhwc(x, kh, kw, stride)
    _, oh, ow, k = patches.shape
    y = pallas_linear(patches.reshape(n * oh * ow, k), w_mat, b,
                      relu=True, out_dtype=jnp.bfloat16)
    return y.reshape(n, oh, ow, out_channels)       # stays NHWC, no transpose back


def conv1_relu_grouped_nhwc(x, w_grp, b_grp, *, kh, kw, stride):
    """conv1 with block-diagonal row grouping so the kernel's output is 128 lanes wide.

    w_grp: (g*C*kh*kw, g*32) block-diag bf16; b_grp: (1, g*32) f32.
    Output rows r of the grouped matmul hold conv outputs of patch rows g*r..g*r+g-1,
    so the HBM reshape back to (N, OH, OW, 32) is free (pure row-major relabeling).
    """
    n = x.shape[0]
    patches = _patches_nhwc(x, kh, kw, stride)
    _, oh, ow, k = patches.shape
    g = w_grp.shape[1] // 32                        # static (4 normally, 1 fallback)
    y = pallas_linear(patches.reshape((n * oh * ow) // g, k * g), w_grp, b_grp,
                      relu=True, out_dtype=jnp.bfloat16)
    return y.reshape(n, oh, ow, 32)


# ---------------------------------------------------------------------------
# Parameters: PyTorch-layout init + one-time layout/dtype preparation
# ---------------------------------------------------------------------------
def calc_conv_output_dims(input_dims):
    """(C, H, W) of the conv3 output, mirroring calc_convOutputDims."""
    _, h, w = input_dims
    def o(sz, k, s):
        return (sz - k) // s + 1
    h, w = o(h, 8, 4), o(w, 8, 4)
    h, w = o(h, 4, 2), o(w, 4, 2)
    h, w = o(h, 3, 1), o(w, 3, 1)
    return 64, h, w


def init_dqn_params(key, in_channels, n_actions, fc_in_dims):
    """Deterministic PyTorch-style uniform(+-1/sqrt(fan_in)) init, PyTorch layouts."""
    def uni(k, shape, fan_in):
        bound = 1.0 / float(fan_in) ** 0.5
        return jax.random.uniform(k, shape, jnp.float32, -bound, bound)

    ks = jax.random.split(key, 10)
    p = {}
    p["conv1_w"] = uni(ks[0], (32, in_channels, 8, 8), in_channels * 8 * 8)
    p["conv1_b"] = uni(ks[1], (32,), in_channels * 8 * 8)
    p["conv2_w"] = uni(ks[2], (64, 32, 4, 4), 32 * 4 * 4)
    p["conv2_b"] = uni(ks[3], (64,), 32 * 4 * 4)
    p["conv3_w"] = uni(ks[4], (64, 64, 3, 3), 64 * 3 * 3)
    p["conv3_b"] = uni(ks[5], (64,), 64 * 3 * 3)
    p["fc1_w"]   = uni(ks[6], (512, fc_in_dims), fc_in_dims)   # PyTorch (out, in)
    p["fc1_b"]   = uni(ks[7], (512,), fc_in_dims)
    p["fc2_w"]   = uni(ks[8], (n_actions, 512), 512)
    p["fc2_b"]   = uni(ks[9], (n_actions,), 512)
    return p


def prepare_params(params, input_dims, n_actions):
    """One-time prep: matrix-ize conv weights (conv1 block-diag-grouped for a
    lane-dense 128-wide output), permute fc1 columns to consume the NHWC flatten,
    chunk fc1/fc2 along the 512 hidden dim, lane-pad fc2, cast MXU operands bf16."""
    c3, h3, w3 = calc_conv_output_dims(input_dims)
    c_in, h_in, w_in = input_dims
    oh1 = (h_in - 8) // 4 + 1
    ow1 = (w_in - 8) // 4 + 1

    prep = {}

    # conv1: (256, 32) -> block-diag (g*256, g*32) with g=4 so g*32 = 128 lanes.
    k1 = c_in * 8 * 8
    w1m = jnp.transpose(params["conv1_w"].reshape(32, -1)).astype(jnp.bfloat16)  # (k1,32)
    b1v = params["conv1_b"].astype(jnp.float32)
    g = 4 if (oh1 * ow1) % 4 == 0 else 1            # fall back if rows don't group
    if g > 1:
        wg = jnp.zeros((g * k1, g * 32), jnp.bfloat16)
        for s in range(g):
            wg = wg.at[s * k1:(s + 1) * k1, s * 32:(s + 1) * 32].set(w1m)
        prep["conv1_w"] = wg
        prep["conv1_b"] = jnp.tile(b1v, (g,)).reshape(1, g * 32)
    else:
        prep["conv1_w"] = w1m
        prep["conv1_b"] = b1v.reshape(1, 32)

    for name in ("conv2", "conv3"):
        w = params[name + "_w"]                                  # (O, C, kh, kw)
        o = w.shape[0]
        prep[name + "_w"] = jnp.transpose(w.reshape(o, -1)).astype(jnp.bfloat16)
        prep[name + "_b"] = params[name + "_b"].reshape(1, o).astype(jnp.float32)

    # fc1: permute columns from PyTorch's (c, h, w) flatten to NHWC (h, w, c), then
    # chunk the 512 hidden units into 4 blocks of 128 for the chunked fused kernel.
    hc = 512 // 128
    w1 = params["fc1_w"].reshape(512, c3, h3, w3)
    w1 = jnp.transpose(w1, (2, 3, 1, 0)).reshape(h3 * w3 * c3, 512).astype(jnp.bfloat16)
    prep["fc1_w"] = jnp.transpose(w1.reshape(h3 * w3 * c3, hc, 128), (1, 0, 2))
    prep["fc1_b"] = params["fc1_b"].astype(jnp.float32).reshape(hc, 1, 128)

    # fc2: (512, A) pre-transposed, zero-padded to a lane-dense 128 multiple,
    # and chunked along the hidden dim consistently with fc1.
    n_pad = ((n_actions + 127) // 128) * 128
    w2 = jnp.transpose(params["fc2_w"]).astype(jnp.bfloat16)
    w2 = jnp.pad(w2, ((0, 0), (0, n_pad - n_actions)))
    prep["fc2_w"] = w2.reshape(hc, 128, n_pad)
    prep["fc2_b"] = jnp.pad(
        params["fc2_b"].reshape(1, n_actions).astype(jnp.float32),
        ((0, 0), (0, n_pad - n_actions)))
    return prep


# ---------------------------------------------------------------------------
# Forward pass (matches DeepQNetwork.forward)
# ---------------------------------------------------------------------------
@functools.partial(jax.jit, static_argnames=("n_actions",))
def dqn_forward(prep, state, *, n_actions):
    """state: (N, C, H, W) f32 (PyTorch layout) -> (N, n_actions) f32."""
    # Boundary-only layout change; XLA fuses the transpose with the bf16 cast.
    x = jnp.transpose(state, (0, 2, 3, 1)).astype(jnp.bfloat16)
    x = conv1_relu_grouped_nhwc(x, prep["conv1_w"], prep["conv1_b"],
                                kh=8, kw=8, stride=4)
    x = conv2d_relu_nhwc(x, prep["conv2_w"], prep["conv2_b"],
                         kh=4, kw=4, stride=2, out_channels=64)
    x = conv2d_relu_nhwc(x, prep["conv3_w"], prep["conv3_b"],
                         kh=3, kw=3, stride=1, out_channels=64)
    conv_state = x.reshape(x.shape[0], -1)        # NHWC flatten; fc1_w pre-permuted
    actions = pallas_fused_fc(conv_state, prep["fc1_w"], prep["fc1_b"],
                              prep["fc2_w"], prep["fc2_b"])
    return actions[:, :n_actions]                 # drop the lane padding


def dqn_forward_reference(params, state):
    """Pure-JAX f32 NCHW reference matching the PyTorch module (for validation)."""
    dn = ("NCHW", "OIHW", "NCHW")
    def conv(x, w, b, s):
        y = jax.lax.conv_general_dilated(x, w, (s, s), "VALID", dimension_numbers=dn)
        return jax.nn.relu(y + b.reshape(1, -1, 1, 1))
    x = conv(state, params["conv1_w"], params["conv1_b"], 4)
    x = conv(x, params["conv2_w"], params["conv2_b"], 2)
    x = conv(x, params["conv3_w"], params["conv3_b"], 1)
    x = x.reshape(x.shape[0], -1)
    x = jax.nn.relu(x @ params["fc1_w"].T + params["fc1_b"])
    return x @ params["fc2_w"].T + params["fc2_b"]


if __name__ == "__main__":
    key = jax.random.PRNGKey(0)
    k_x, k_p = jax.random.split(key)

    # Standard Atari input: conv3 output is 7x7x64, so the NHWC flatten / fc1
    # column permutation is genuinely exercised (review correctness concern #1).
    batch = 2
    input_dims = (4, 84, 84)
    n_actions = 6
    c3, h3, w3 = calc_conv_output_dims(input_dims)
    fc_in_dims = c3 * h3 * w3            # == calc_convOutputDims(input_dims)
    assert (h3, w3) == (7, 7) and fc_in_dims == 3136

    # Assert channel-major (c, kh, kw) patch ordering == PyTorch weight.reshape(O,-1)
    # (review correctness concern #2).
    xt = jnp.arange(1 * 5 * 5 * 3, dtype=jnp.float32).reshape(1, 5, 5, 3)
    pt = jax.lax.conv_general_dilated_patches(
        xt, (2, 2), (1, 1), "VALID", dimension_numbers=("NHWC", "HWIO", "NHWC"))
    man = jnp.stack([xt[0, i:i + 4, j:j + 4, c]
                     for c in range(3) for i in range(2) for j in range(2)], axis=-1)
    assert pt.shape == (1, 4, 4, 12)
    assert bool(jnp.allclose(pt[0], man)), "patch feature order is not channel-major"

    x = jax.random.normal(k_x, (batch,) + input_dims, jnp.float32)
    params = init_dqn_params(k_p, input_dims[0], n_actions, fc_in_dims)
    prep = prepare_params(params, input_dims, n_actions)

    actions = dqn_forward(prep, x, n_actions=n_actions)
    actions = jax.block_until_ready(actions)

    assert actions.shape == (batch, n_actions)
    assert actions.dtype == jnp.float32
    assert bool(jnp.all(jnp.isfinite(actions)))

    # Validate against the f32 reference (relaxed tolerance: bf16 MXU operands).
    ref = dqn_forward_reference(params, x)
    err = float(jnp.max(jnp.abs(actions - ref)))
    scale = float(jnp.max(jnp.abs(ref)))
    assert err <= 5e-2 + 5e-2 * scale, (err, scale)

    print("KERNEL_OK")
</pallas_src>

<mosaic_0001>
module attributes {stable_mosaic.version = 11 : i64} {
  func.func @_matmul_bias_act_kernel(%arg0: i32, %arg1: memref<112x1024xbf16, #tpu.memory_space<vmem>>, %arg2: memref<1024x128xbf16, #tpu.memory_space<vmem>>, %arg3: memref<1x128xf32, #tpu.memory_space<vmem>>, %arg4: memref<112x128xbf16, #tpu.memory_space<vmem>>) attributes {dimension_semantics = [#tpu.dimension_semantics<parallel>], iteration_bounds = array<i64: 2>, scalar_prefetch = 0 : i64, scratch_operands = 0 : i64, tpu.core_type = #tpu.core_type<tc>, window_params = [{transform_indices = @transform_0, window_bounds = array<i64: 112, 1024>}, {pipeline_mode = #tpu.pipeline_mode<synchronous>, transform_indices = @transform_1, window_bounds = array<i64: 1024, 128>}, {pipeline_mode = #tpu.pipeline_mode<synchronous>, transform_indices = @transform_2, window_bounds = array<i64: 1, 128>}, {transform_indices = @transform_3, window_bounds = array<i64: 112, 128>}]} {
    %c0 = arith.constant 0 : index
    %c0_0 = arith.constant 0 : index
    %0 = vector.load %arg1[%c0, %c0_0] : memref<112x1024xbf16, #tpu.memory_space<vmem>>, vector<112x1024xbf16>
    %c0_1 = arith.constant 0 : index
    %c0_2 = arith.constant 0 : index
    %1 = vector.load %arg2[%c0_1, %c0_2] : memref<1024x128xbf16, #tpu.memory_space<vmem>>, vector<1024x128xbf16>
    %cst = arith.constant dense<0.000000e+00> : vector<112x128xf32>
    %2 = tpu.matmul %0, %1, %cst {dimension_numbers = #tpu.dot_dimension_numbers<[1], [0], [0], [1], [0, 0, 1, 1], [], []>} : vector<112x1024xbf16>, vector<1024x128xbf16>, vector<112x128xf32> -> vector<112x128xf32>
    %c0_3 = arith.constant 0 : index
    %c0_4 = arith.constant 0 : index
    %3 = vector.load %arg3[%c0_3, %c0_4] : memref<1x128xf32, #tpu.memory_space<vmem>>, vector<1x128xf32>
    %4 = vector.broadcast %3 : vector<1x128xf32> to vector<112x128xf32>
    %5 = arith.addf %2, %4 : vector<112x128xf32>
    %cst_5 = arith.constant 0.000000e+00 : f32
    %6 = vector.broadcast %cst_5 : f32 to vector<112x128xf32>
    %7 = arith.maximumf %5, %6 : vector<112x128xf32>
    %8 = arith.truncf %7 : vector<112x128xf32> to vector<112x128xbf16>
    %c0_6 = arith.constant 0 : index
    %c0_7 = arith.constant 0 : index
    %9 = vector.load %arg4[%c0_6, %c0_7] : memref<112x128xbf16, #tpu.memory_space<vmem>>, vector<112x128xbf16>
    tpu.vector_store %arg4[%c0_6, %c0_7], %8 {strides = array<i32>} : memref<112x128xbf16, #tpu.memory_space<vmem>>, vector<112x128xbf16>,
    return
  }
  func.func @transform_0(%arg0: i32) -> (i32, i32) {
    %c0_i32 = arith.constant 0 : i32
    %c0_i32_0 = arith.constant 0 : i32
    return %arg0, %c0_i32 : i32, i32
  }
  func.func @transform_1(%arg0: i32) -> (i32, i32) {
    %c0_i32 = arith.constant 0 : i32
    %c0_i32_0 = arith.constant 0 : i32
    %c0_i32_1 = arith.constant 0 : i32
    return %c0_i32, %c0_i32_0 : i32, i32
  }
  func.func @transform_2(%arg0: i32) -> (i32, i32) {
    %c0_i32 = arith.constant 0 : i32
    %c0_i32_0 = arith.constant 0 : i32
    %c0_i32_1 = arith.constant 0 : i32
    return %c0_i32, %c0_i32_0 : i32, i32
  }
  func.func @transform_3(%arg0: i32) -> (i32, i32) {
    %c0_i32 = arith.constant 0 : i32
    %c0_i32_0 = arith.constant 0 : i32
    return %arg0, %c0_i32 : i32, i32
  }
}

module attributes {stable_mosaic.version = 11 : i64} {
  func.func @_matmul_bias_act_kernel(%arg0: i32, %arg1: memref<96x512xbf16, #tpu.memory_space<vmem>>, %arg2: memref<512x64xbf16, #tpu.memory_space<vmem>>, %arg3: memref<1x64xf32, #tpu.memory_space<vmem>>, %arg4: memref<96x64xbf16, #tpu.memory_space<vmem>>) attributes {dimension_semantics = [#tpu.dimension_semantics<parallel>], iteration_bounds = array<i64: 2>, scalar_prefetch = 0 : i64, scratch_operands = 0 : i64, tpu.core_type = #tpu.core_type<tc>, window_params = [{transform_indices = @transform_0, window_bounds = array<i64: 96, 512>}, {pipeline_mode = #tpu.pipeline_mode<synchronous>, transform_indices = @transform_1, window_bounds = array<i64: 512, 64>}, {pipeline_mode = #tpu.pipeline_mode<synchronous>, transform_indices = @transform_2, window_bounds = array<i64: 1, 64>}, {transform_indices = @transform_3, window_bounds = array<i64: 96, 64>}]} {
    %c0 = arith.constant 0 : index
    %c0_0 = arith.constant 0 : index
    %0 = vector.load %arg1[%c0, %c0_0] : memref<96x512xbf16, #tpu.memory_space<vmem>>, vector<96x512xbf16>
    %c0_1 = arith.constant 0 : index
    %c0_2 = arith.constant 0 : index
    %1 = vector.load %arg2[%c0_1, %c0_2] : memref<512x64xbf16, #tpu.memory_space<vmem>>, vector<512x64xbf16>
    %cst = arith.constant dense<0.000000e+00> : vector<96x64xf32>
    %2 = tpu.matmul %0, %1, %cst {dimension_numbers = #tpu.dot_dimension_numbers<[1], [0], [0], [1], [0, 0, 1, 1], [], []>} : vector<96x512xbf16>, vector<512x64xbf16>, vector<96x64xf32> -> vector<96x64xf32>
    %c0_3 = arith.constant 0 : index
    %c0_4 = arith.constant 0 : index
    %3 = vector.load %arg3[%c0_3, %c0_4] : memref<1x64xf32, #tpu.memory_space<vmem>>, vector<1x64xf32>
    %4 = vector.broadcast %3 : vector<1x64xf32> to vector<96x64xf32>
    %5 = arith.addf %2, %4 : vector<96x64xf32>
    %cst_5 = arith.constant 0.000000e+00 : f32
    %6 = vector.broadcast %cst_5 : f32 to vector<96x64xf32>
    %7 = arith.maximumf %5, %6 : vector<96x64xf32>
    %8 = arith.truncf %7 : vector<96x64xf32> to vector<96x64xbf16>
    %c0_6 = arith.constant 0 : index
    %c0_7 = arith.constant 0 : index
    %9 = vector.load %arg4[%c0_6, %c0_7] : memref<96x64xbf16, #tpu.memory_space<vmem>>, vector<96x64xbf16>
    tpu.vector_store %arg4[%c0_6, %c0_7], %8 {strides = array<i32>} : memref<96x64xbf16, #tpu.memory_space<vmem>>, vector<96x64xbf16>,
    return
  }
  func.func @transform_0(%arg0: i32) -> (i32, i32) {
    %c0_i32 = arith.constant 0 : i32
    %c0_i32_0 = arith.constant 0 : i32
    return %arg0, %c0_i32 : i32, i32
  }
  func.func @transform_1(%arg0: i32) -> (i32, i32) {
    %c0_i32 = arith.constant 0 : i32
    %c0_i32_0 = arith.constant 0 : i32
    %c0_i32_1 = arith.constant 0 : i32
    return %c0_i32, %c0_i32_0 : i32, i32
  }
  func.func @transform_2(%arg0: i32) -> (i32, i32) {
    %c0_i32 = arith.constant 0 : i32
    %c0_i32_0 = arith.constant 0 : i32
    %c0_i32_1 = arith.constant 0 : i32
    return %c0_i32, %c0_i32_0 : i32, i32
  }
  func.func @transform_3(%arg0: i32) -> (i32, i32) {
    %c0_i32 = arith.constant 0 : i32
    %c0_i32_0 = arith.constant 0 : i32
    return %arg0, %c0_i32 : i32, i32
  }
}

module attributes {stable_mosaic.version = 11 : i64} {
  func.func @_matmul_bias_act_kernel(%arg0: i32, %arg1: memref<64x576xbf16, #tpu.memory_space<vmem>>, %arg2: memref<576x64xbf16, #tpu.memory_space<vmem>>, %arg3: memref<1x64xf32, #tpu.memory_space<vmem>>, %arg4: memref<64x64xbf16, #tpu.memory_space<vmem>>) attributes {dimension_semantics = [#tpu.dimension_semantics<parallel>], iteration_bounds = array<i64: 2>, scalar_prefetch = 0 : i64, scratch_operands = 0 : i64, tpu.core_type = #tpu.core_type<tc>, window_params = [{transform_indices = @transform_0, window_bounds = array<i64: 64, 576>}, {pipeline_mode = #tpu.pipeline_mode<synchronous>, transform_indices = @transform_1, window_bounds = array<i64: 576, 64>}, {pipeline_mode = #tpu.pipeline_mode<synchronous>, transform_indices = @transform_2, window_bounds = array<i64: 1, 64>}, {transform_indices = @transform_3, window_bounds = array<i64: 64, 64>}]} {
    %c0 = arith.constant 0 : index
    %c0_0 = arith.constant 0 : index
    %0 = vector.load %arg1[%c0, %c0_0] : memref<64x576xbf16, #tpu.memory_space<vmem>>, vector<64x576xbf16>
    %c0_1 = arith.constant 0 : index
    %c0_2 = arith.constant 0 : index
    %1 = vector.load %arg2[%c0_1, %c0_2] : memref<576x64xbf16, #tpu.memory_space<vmem>>, vector<576x64xbf16>
    %cst = arith.constant dense<0.000000e+00> : vector<64x64xf32>
    %2 = tpu.matmul %0, %1, %cst {dimension_numbers = #tpu.dot_dimension_numbers<[1], [0], [0], [1], [0, 0, 1, 1], [], []>} : vector<64x576xbf16>, vector<576x64xbf16>, vector<64x64xf32> -> vector<64x64xf32>
    %c0_3 = arith.constant 0 : index
    %c0_4 = arith.constant 0 : index
    %3 = vector.load %arg3[%c0_3, %c0_4] : memref<1x64xf32, #tpu.memory_space<vmem>>, vector<1x64xf32>
    %4 = vector.broadcast %3 : vector<1x64xf32> to vector<64x64xf32>
    %5 = arith.addf %2, %4 : vector<64x64xf32>
    %cst_5 = arith.constant 0.000000e+00 : f32
    %6 = vector.broadcast %cst_5 : f32 to vector<64x64xf32>
    %7 = arith.maximumf %5, %6 : vector<64x64xf32>
    %8 = arith.truncf %7 : vector<64x64xf32> to vector<64x64xbf16>
    %c0_6 = arith.constant 0 : index
    %c0_7 = arith.constant 0 : index
    %9 = vector.load %arg4[%c0_6, %c0_7] : memref<64x64xbf16, #tpu.memory_space<vmem>>, vector<64x64xbf16>
    tpu.vector_store %arg4[%c0_6, %c0_7], %8 {strides = array<i32>} : memref<64x64xbf16, #tpu.memory_space<vmem>>, vector<64x64xbf16>,
    return
  }
  func.func @transform_0(%arg0: i32) -> (i32, i32) {
    %c0_i32 = arith.constant 0 : i32
    %c0_i32_0 = arith.constant 0 : i32
    return %arg0, %c0_i32 : i32, i32
  }
  func.func @transform_1(%arg0: i32) -> (i32, i32) {
    %c0_i32 = arith.constant 0 : i32
    %c0_i32_0 = arith.constant 0 : i32
    %c0_i32_1 = arith.constant 0 : i32
    return %c0_i32, %c0_i32_0 : i32, i32
  }
  func.func @transform_2(%arg0: i32) -> (i32, i32) {
    %c0_i32 = arith.constant 0 : i32
    %c0_i32_0 = arith.constant 0 : i32
    %c0_i32_1 = arith.constant 0 : i32
    return %c0_i32, %c0_i32_0 : i32, i32
  }
  func.func @transform_3(%arg0: i32) -> (i32, i32) {
    %c0_i32 = arith.constant 0 : i32
    %c0_i32_0 = arith.constant 0 : i32
    return %arg0, %c0_i32 : i32, i32
  }
}

module attributes {stable_mosaic.version = 11 : i64} {
  func.func @_fused_fc_kernel(%arg0: i32, %arg1: memref<2x3136xbf16, #tpu.memory_space<vmem>>, %arg2: memref<4x3136x128xbf16, #tpu.memory_space<vmem>>, %arg3: memref<4x1x128xf32, #tpu.memory_space<vmem>>, %arg4: memref<4x128x128xbf16, #tpu.memory_space<vmem>>, %arg5: memref<1x128xf32, #tpu.memory_space<vmem>>, %arg6: memref<2x128xf32, #tpu.memory_space<vmem>>) attributes {dimension_semantics = [#tpu.dimension_semantics<parallel>], iteration_bounds = array<i64: 1>, scalar_prefetch = 0 : i64, scratch_operands = 0 : i64, tpu.core_type = #tpu.core_type<tc>, window_params = [{transform_indices = @transform_0, window_bounds = array<i64: 2, 3136>}, {pipeline_mode = #tpu.pipeline_mode<synchronous>, transform_indices = @transform_1, window_bounds = array<i64: 4, 3136, 128>}, {pipeline_mode = #tpu.pipeline_mode<synchronous>, transform_indices = @transform_2, window_bounds = array<i64: 4, 1, 128>}, {pipeline_mode = #tpu.pipeline_mode<synchronous>, transform_indices = @transform_3, window_bounds = array<i64: 4, 128, 128>}, {pipeline_mode = #tpu.pipeline_mode<synchronous>, transform_indices = @transform_4, window_bounds = array<i64: 1, 128>}, {transform_indices = @transform_5, window_bounds = array<i64: 2, 128>}]} {
    %c0 = arith.constant 0 : index
    %c0_0 = arith.constant 0 : index
    %0 = vector.load %arg1[%c0, %c0_0] : memref<2x3136xbf16, #tpu.memory_space<vmem>>, vector<2x3136xbf16>
    %cst = arith.constant 0.000000e+00 : f32
    %1 = vector.broadcast %cst : f32 to vector<2x128xf32>
    %c0_1 = arith.constant 0 : index
    %c0_2 = arith.constant 0 : index
    %c0_3 = arith.constant 0 : index
    %2 = vector.load %arg2[%c0_1, %c0_2, %c0_3] : memref<4x3136x128xbf16, #tpu.memory_space<vmem>>, vector<1x3136x128xbf16>
    %3 = vector.shape_cast %2 : vector<1x3136x128xbf16> to vector<3136x128xbf16>
    %cst_4 = arith.constant dense<0.000000e+00> : vector<2x128xf32>
    %4 = tpu.matmul %0, %3, %cst_4 {dimension_numbers = #tpu.dot_dimension_numbers<[1], [0], [0], [1], [0, 0, 1, 1], [], []>} : vector<2x3136xbf16>, vector<3136x128xbf16>, vector<2x128xf32> -> vector<2x128xf32>
    %c0_5 = arith.constant 0 : index
    %c0_6 = arith.constant 0 : index
    %c0_7 = arith.constant 0 : index
    %5 = vector.load %arg3[%c0_5, %c0_6, %c0_7] : memref<4x1x128xf32, #tpu.memory_space<vmem>>, vector<1x1x128xf32>
    %6 = vector.shape_cast %5 : vector<1x1x128xf32> to vector<1x128xf32>
    %7 = vector.broadcast %6 : vector<1x128xf32> to vector<2x128xf32>
    %8 = arith.addf %4, %7 : vector<2x128xf32>
    %cst_8 = arith.constant 0.000000e+00 : f32
    %9 = vector.broadcast %cst_8 : f32 to vector<2x128xf32>
    %10 = arith.maximumf %8, %9 : vector<2x128xf32>
    %11 = arith.truncf %10 : vector<2x128xf32> to vector<2x128xbf16>
    %c0_9 = arith.constant 0 : index
    %c0_10 = arith.constant 0 : index
    %c0_11 = arith.constant 0 : index
    %12 = vector.load %arg4[%c0_9, %c0_10, %c0_11] : memref<4x128x128xbf16, #tpu.memory_space<vmem>>, vector<1x128x128xbf16>
    %13 = vector.shape_cast %12 : vector<1x128x128xbf16> to vector<128x128xbf16>
    %cst_12 = arith.constant dense<0.000000e+00> : vector<2x128xf32>
    %14 = tpu.matmul %11, %13, %cst_12 {dimension_numbers = #tpu.dot_dimension_numbers<[1], [0], [0], [1], [0, 0, 1, 1], [], []>} : vector<2x128xbf16>, vector<128x128xbf16>, vector<2x128xf32> -> vector<2x128xf32>
    %15 = arith.addf %1, %14 : vector<2x128xf32>
    %c1 = arith.constant 1 : index
    %c0_13 = arith.constant 0 : index
    %c0_14 = arith.constant 0 : index
    %16 = vector.load %arg2[%c1, %c0_13, %c0_14] : memref<4x3136x128xbf16, #tpu.memory_space<vmem>>, vector<1x3136x128xbf16>
    %17 = vector.shape_cast %16 : vector<1x3136x128xbf16> to vector<3136x128xbf16>
    %cst_15 = arith.constant dense<0.000000e+00> : vector<2x128xf32>
    %18 = tpu.matmul %0, %17, %cst_15 {dimension_numbers = #tpu.dot_dimension_numbers<[1], [0], [0], [1], [0, 0, 1, 1], [], []>} : vector<2x3136xbf16>, vector<3136x128xbf16>, vector<2x128xf32> -> vector<2x128xf32>
    %c1_16 = arith.constant 1 : index
    %c0_17 = arith.constant 0 : index
    %c0_18 = arith.constant 0 : index
    %19 = vector.load %arg3[%c1_16, %c0_17, %c0_18] : memref<4x1x128xf32, #tpu.memory_space<vmem>>, vector<1x1x128xf32>
    %20 = vector.shape_cast %19 : vector<1x1x128xf32> to vector<1x128xf32>
    %21 = vector.broadcast %20 : vector<1x128xf32> to vector<2x128xf32>
    %22 = arith.addf %18, %21 : vector<2x128xf32>
    %cst_19 = arith.constant 0.000000e+00 : f32
    %23 = vector.broadcast %cst_19 : f32 to vector<2x128xf32>
    %24 = arith.maximumf %22, %23 : vector<2x128xf32>
    %25 = arith.truncf %24 : vector<2x128xf32> to vector<2x128xbf16>
    %c1_20 = arith.constant 1 : index
    %c0_21 = arith.constant 0 : index
    %c0_22 = arith.constant 0 : index
    %26 = vector.load %arg4[%c1_20, %c0_21, %c0_22] : memref<4x128x128xbf16, #tpu.memory_space<vmem>>, vector<1x128x128xbf16>
    %27 = vector.shape_cast %26 : vector<1x128x128xbf16> to vector<128x128xbf16>
    %cst_23 = arith.constant dense<0.000000e+00> : vector<2x128xf32>
    %28 = tpu.matmul %25, %27, %cst_23 {dimension_numbers = #tpu.dot_dimension_numbers<[1], [0], [0], [1], [0, 0, 1, 1], [], []>} : vector<2x128xbf16>, vector<128x128xbf16>, vector<2x128xf32> -> vector<2x128xf32>
    %29 = arith.addf %15, %28 : vector<2x128xf32>
    %c2 = arith.constant 2 : index
    %c0_24 = arith.constant 0 : index
    %c0_25 = arith.constant 0 : index
    %30 = vector.load %arg2[%c2, %c0_24, %c0_25] : memref<4x3136x128xbf16, #tpu.memory_space<vmem>>, vector<1x3136x128xbf16>
    %31 = vector.shape_cast %30 : vector<1x3136x128xbf16> to vector<3136x128xbf16>
    %cst_26 = arith.constant dense<0.000000e+00> : vector<2x128xf32>
    %32 = tpu.matmul %0, %31, %cst_26 {dimension_numbers = #tpu.dot_dimension_numbers<[1], [0], [0], [1], [0, 0, 1, 1], [], []>} : vector<2x3136xbf16>, vector<3136x128xbf16>, vector<2x128xf32> -> vector<2x128xf32>
    %c2_27 = arith.constant 2 : index
    %c0_28 = arith.constant 0 : index
    %c0_29 = arith.constant 0 : index
    %33 = vector.load %arg3[%c2_27, %c0_28, %c0_29] : memref<4x1x128xf32, #tpu.memory_space<vmem>>, vector<1x1x128xf32>
    %34 = vector.shape_cast %33 : vector<1x1x128xf32> to vector<1x128xf32>
    %35 = vector.broadcast %34 : vector<1x128xf32> to vector<2x128xf32>
    %36 = arith.addf %32, %35 : vector<2x128xf32>
    %cst_30 = arith.constant 0.000000e+00 : f32
    %37 = vector.broadcast %cst_30 : f32 to vector<2x128xf32>
    %38 = arith.maximumf %36, %37 : vector<2x128xf32>
    %39 = arith.truncf %38 : vector<2x128xf32> to vector<2x128xbf16>
    %c2_31 = arith.constant 2 : index
    %c0_32 = arith.constant 0 : index
    %c0_33 = arith.constant 0 : index
    %40 = vector.load %arg4[%c2_31, %c0_32, %c0_33] : memref<4x128x128xbf16, #tpu.memory_space<vmem>>, vector<1x128x128xbf16>
    %41 = vector.shape_cast %40 : vector<1x128x128xbf16> to vector<128x128xbf16>
    %cst_34 = arith.constant dense<0.000000e+00> : vector<2x128xf32>
    %42 = tpu.matmul %39, %41, %cst_34 {dimension_numbers = #tpu.dot_dimension_numbers<[1], [0], [0], [1], [0, 0, 1, 1], [], []>} : vector<2x128xbf16>, vector<128x128xbf16>, vector<2x128xf32> -> vector<2x128xf32>
    %43 = arith.addf %29, %42 : vector<2x128xf32>
    %c3 = arith.constant 3 : index
    %c0_35 = arith.constant 0 : index
    %c0_36 = arith.constant 0 : index
    %44 = vector.load %arg2[%c3, %c0_35, %c0_36] : memref<4x3136x128xbf16, #tpu.memory_space<vmem>>, vector<1x3136x128xbf16>
    %45 = vector.shape_cast %44 : vector<1x3136x128xbf16> to vector<3136x128xbf16>
    %cst_37 = arith.constant dense<0.000000e+00> : vector<2x128xf32>
    %46 = tpu.matmul %0, %45, %cst_37 {dimension_numbers = #tpu.dot_dimension_numbers<[1], [0], [0], [1], [0, 0, 1, 1], [], []>} : vector<2x3136xbf16>, vector<3136x128xbf16>, vector<2x128xf32> -> vector<2x128xf32>
    %c3_38 = arith.constant 3 : index
    %c0_39 = arith.constant 0 : index
    %c0_40 = arith.constant 0 : index
    %47 = vector.load %arg3[%c3_38, %c0_39, %c0_40] : memref<4x1x128xf32, #tpu.memory_space<vmem>>, vector<1x1x128xf32>
    %48 = vector.shape_cast %47 : vector<1x1x128xf32> to vector<1x128xf32>
    %49 = vector.broadcast %48 : vector<1x128xf32> to vector<2x128xf32>
    %50 = arith.addf %46, %49 : vector<2x128xf32>
    %cst_41 = arith.constant 0.000000e+00 : f32
    %51 = vector.broadcast %cst_41 : f32 to vector<2x128xf32>
    %52 = arith.maximumf %50, %51 : vector<2x128xf32>
    %53 = arith.truncf %52 : vector<2x128xf32> to vector<2x128xbf16>
    %c3_42 = arith.constant 3 : index
    %c0_43 = arith.constant 0 : index
    %c0_44 = arith.constant 0 : index
    %54 = vector.load %arg4[%c3_42, %c0_43, %c0_44] : memref<4x128x128xbf16, #tpu.memory_space<vmem>>, vector<1x128x128xbf16>
    %55 = vector.shape_cast %54 : vector<1x128x128xbf16> to vector<128x128xbf16>
    %cst_45 = arith.constant dense<0.000000e+00> : vector<2x128xf32>
    %56 = tpu.matmul %53, %55, %cst_45 {dimension_numbers = #tpu.dot_dimension_numbers<[1], [0], [0], [1], [0, 0, 1, 1], [], []>} : vector<2x128xbf16>, vector<128x128xbf16>, vector<2x128xf32> -> vector<2x128xf32>
    %57 = arith.addf %43, %56 : vector<2x128xf32>
    %c0_46 = arith.constant 0 : index
    %c0_47 = arith.constant 0 : index
    %58 = vector.load %arg5[%c0_46, %c0_47] : memref<1x128xf32, #tpu.memory_space<vmem>>, vector<1x128xf32>
    %59 = vector.broadcast %58 : vector<1x128xf32> to vector<2x128xf32>
    %60 = arith.addf %57, %59 : vector<2x128xf32>
    %c0_48 = arith.constant 0 : index
    %c0_49 = arith.constant 0 : index
    %61 = vector.load %arg6[%c0_48, %c0_49] : memref<2x128xf32, #tpu.memory_space<vmem>>, vector<2x128xf32>
    tpu.vector_store %arg6[%c0_48, %c0_49], %60 {strides = array<i32>} : memref<2x128xf32, #tpu.memory_space<vmem>>, vector<2x128xf32>,
    return
  }
  func.func @transform_0(%arg0: i32) -> (i32, i32) {
    %c0_i32 = arith.constant 0 : i32
    %c0_i32_0 = arith.constant 0 : i32
    return %arg0, %c0_i32 : i32, i32
  }
  func.func @transform_1(%arg0: i32) -> (i32, i32, i32) {
    %c0_i32 = arith.constant 0 : i32
    %c0_i32_0 = arith.constant 0 : i32
    %c0_i32_1 = arith.constant 0 : i32
    %c0_i32_2 = arith.constant 0 : i32
    return %c0_i32, %c0_i32_0, %c0_i32_1 : i32, i32, i32
  }
  func.func @transform_2(%arg0: i32) -> (i32, i32, i32) {
    %c0_i32 = arith.constant 0 : i32
    %c0_i32_0 = arith.constant 0 : i32
    %c0_i32_1 = arith.constant 0 : i32
    %c0_i32_2 = arith.constant 0 : i32
    return %c0_i32, %c0_i32_0, %c0_i32_1 : i32, i32, i32
  }
  func.func @transform_3(%arg0: i32) -> (i32, i32, i32) {
    %c0_i32 = arith.constant 0 : i32
    %c0_i32_0 = arith.constant 0 : i32
    %c0_i32_1 = arith.constant 0 : i32
    %c0_i32_2 = arith.constant 0 : i32
    return %c0_i32, %c0_i32_0, %c0_i32_1 : i32, i32, i32
  }
  func.func @transform_4(%arg0: i32) -> (i32, i32) {
    %c0_i32 = arith.constant 0 : i32
    %c0_i32_0 = arith.constant 0 : i32
    %c0_i32_1 = arith.constant 0 : i32
    return %c0_i32, %c0_i32_0 : i32, i32
  }
  func.func @transform_5(%arg0: i32) -> (i32, i32) {
    %c0_i32 = arith.constant 0 : i32
    %c0_i32_0 = arith.constant 0 : i32
    return %arg0, %c0_i32 : i32, i32
  }
}

</mosaic_0001>

<bundles_post_ra>
// kernel: dqn_forward.4
= control target key start
LH: loop header
LB: loop body
LE: loop exit
PB: predicated region body
PF: predicated region fallthrough
CT: control target
= control target key end

     0   :  { %s2472_s12 = smov 0   ;;  %s2474_s13 = smov 0   ;;  %s2908_s0 = inlined_call_operand.vmem [shape: bf16[200,1024], index: 0, kind: input, shape index: {}]   ;;  %s2909_s1 = inlined_call_operand.vmem [shape: bf16[1024,128], index: 1, kind: input, shape index: {}]   ;;  %s2910_s2 = inlined_call_operand.vmem [shape: f32[1,128], index: 2, kind: input, shape index: {}]   ;;  %s2911_s3 = inlined_call_operand.vmem [shape: bf16[200,128], index: 3, kind: output, shape index: {}]  }
   0x1   :  { %s2476_s14 = smov 0  }
   0x2 LB: > { %s2485_s15 = sadd.s32 4294967295, %s2418_s14   ;;  %s2487_s16 = sadd.s32 1, %s2418_s14   ;;  %s2418_s14 = sphi %s2476_s14, %s2918_s14   ;;  %s2414_s13 = sphi %s2474_s13, %s2917_s13   ;;  %s2410_s12 = sphi %s2472_s12, %s2916_s12  }
   0x3   : > { %s85_s17 = ssub.s32 %s2418_s14, %s2487_s16  ;;  %s88_s18 = sadd.s32 1, %s2414_s13 }
   0x4   : > { %p86_p0 = scmp.eq.s32.totalorder %s85_s17, 0  ;;  %p98_p1 = scmp.ne.s32.totalorder %s2414_s13, %s2410_s12 }
   0x5   : > { %p99_p2 = scmp.eq.s32.totalorder %s2485_s15, 1  ;;  %p1767_p3 = scmp.ge.s32.totalorder %s2418_s14, 1 }
   0x6   : > { %s2495_s19 = scalar_select %p86_p0, %s2414_s13, %s88_s18  }
   0x7   : > { %p2497_p4 = por %p99_p2, %p98_p1  ;;  %p149_p5 = scmp.lt.s32.totalorder %s2418_s14, 3 }
   0x9   : > { %p150_p6 = pnand %p1767_p3, %p149_p5 }
   0xa   : > { %v2296_v0 = vld [vmem:[%s2909_s1 + $0x40] sm:$0xff] (!%p150_p6)   ;;  %v2300_v4 = vld [vmem:[%s2909_s1 + $0x48] sm:$0xff] (!%p150_p6)   ;;  %v2304_v8 = vld [vmem:[%s2909_s1 + $0x50] sm:$0xff] (!%p150_p6)   ;;  %s2547_s30 = smul.u32 (!%p150_p6), 14, %s2485_s15 }
   0xb   : > { %153 = sbr.rel (%p150_p6) target bundleno = 445 (0x1bd), region = 32  ;;  %v2297_v1 = vld [vmem:[%s2909_s1 + $0xc0] sm:$0xff] (!%p150_p6)   ;;  %1974 = vmatprep.subr.bf16.mxu0 (!%p150_p6), %v2296_v0  ;;  %v2301_v5 = vld [vmem:[%s2909_s1 + $0xc8] sm:$0xff] (!%p150_p6)   ;;  %v2305_v9 = vld [vmem:[%s2909_s1 + $0xd0] sm:$0xff] (!%p150_p6)  }
   0xc   : > { %v2298_v2 = vld [vmem:[%s2909_s1] sm:$0xff] (!%p150_p6)   ;;  %2032 = vmatprep.subr.bf16.mxu1 (!%p150_p6), %v2297_v1  ;;  %v2302_v6 = vld [vmem:[%s2909_s1 + $0x8] sm:$0xff] (!%p150_p6)   ;;  %v2306_v10 = vld [vmem:[%s2909_s1 + $0x10] sm:$0xff] (!%p150_p6)   ;;  %p184_p7 = scmp.lt.s32.totalorder (!%p150_p6), %s2547_s30, 24 }
   0xd   : > { %v2299_v3 = vld [vmem:[%s2909_s1 + $0x80] sm:$0xff] (!%p150_p6)   ;;  %1975 = vmatpush3.bf16.msra.mxu0 (!%p150_p6), %v2298_v2  ;;  %v2303_v7 = vld [vmem:[%s2909_s1 + $0x88] sm:$0xff] (!%p150_p6)   ;;  %v2307_v11 = vld [vmem:[%s2909_s1 + $0x90] sm:$0xff] (!%p150_p6)  }
   0xe   : > { %2033 = vmatpush3.bf16.msra.mxu1 (!%p150_p6), %v2299_v3  ;;  %1976 = vmatprep.subr.bf16.mxu0 (!%p150_p6), %v2300_v4  ;;  %v2308_v12 = vld [vmem:[%s2909_s1 + $0x58] sm:$0xff] (!%p150_p6)   ;;  %v2312_v16 = vld [vmem:[%s2909_s1 + $0x60] sm:$0xff] (!%p150_p6)   ;;  %v2316_v20 = vld [vmem:[%s2909_s1 + $0x68] sm:$0xff] (!%p150_p6)  }
   0xf   : > { %2034 = vmatprep.subr.bf16.mxu1 (!%p150_p6), %v2301_v5  ;;  %v2309_v13 = vld [vmem:[%s2909_s1 + $0xd8] sm:$0xff] (!%p150_p6)   ;;  %v2313_v17 = vld [vmem:[%s2909_s1 + $0xe0] sm:$0xff] (!%p150_p6)   ;;  %v2317_v21 = vld [vmem:[%s2909_s1 + $0xe8] sm:$0xff] (!%p150_p6)  }
  0x10   : > { %v2310_v14 = vld [vmem:[%s2909_s1 + $0x18] sm:$0xff] (!%p150_p6)   ;;  %v2314_v18 = vld [vmem:[%s2909_s1 + $0x20] sm:$0xff] (!%p150_p6)   ;;  %v2318_v22 = vld [vmem:[%s2909_s1 + $0x28] sm:$0xff] (!%p150_p6)  }
  0x11   : > { %1977 = vmatpush3.bf16.msra.mxu0 (!%p150_p6), %v2302_v6  ;;  %v2311_v15 = vld [vmem:[%s2909_s1 + $0x98] sm:$0xff] (!%p150_p6)   ;;  %v2315_v19 = vld [vmem:[%s2909_s1 + $0xa0] sm:$0xff] (!%p150_p6)   ;;  %v2319_v23 = vld [vmem:[%s2909_s1 + $0xa8] sm:$0xff] (!%p150_p6)  }
  0x12   : > { %2035 = vmatpush3.bf16.msra.mxu1 %v2303_v7  ;;  %1978 = vmatprep.subr.bf16.mxu0 %v2304_v8  ;;  %s185_s26 = scalar_select %p184_p7, %s2547_s30, 24  ;;  %v2320_v24 = vld [vmem:[%s2909_s1 + $0x70] sm:$0xff]   ;;  %v2324_v28 = vld [vmem:[%s2909_s1 + $0x78] sm:$0xff]   ;;  %v2328_v40 = vld [vmem:[%s2909_s1 + $0x140] sm:$0xff]  }
  0x13   : > { %2036 = vmatprep.subr.bf16.mxu1 %v2305_v9  ;;  %v2321_v25 = vld [vmem:[%s2909_s1 + $0xf0] sm:$0xff]   ;;  %v2325_v29 = vld [vmem:[%s2909_s1 + $0xf8] sm:$0xff]   ;;  %v2329_v41 = vld [vmem:[%s2909_s1 + $0x100] sm:$0xff]   ;;  %s1504_s17 = ssub.s32 (%p2497_p4), 25, %s2547_s30  ;;  %s1932_s18 = smul.u32 (%p2497_p4), 56, %s2485_s15 }
  0x14   : > { %v2322_v26 = vld [vmem:[%s2909_s1 + $0x30] sm:$0xff]   ;;  %s1917_s9 = sshll.u32 %s185_s26, 5  ;;  %v2326_v30 = vld [vmem:[%s2909_s1 + $0x38] sm:$0xff]   ;;  %v2330_v42 = vld [vmem:[%s2909_s1 + $0x1c0] sm:$0xff]   ;;  %p1505_p8 = scmp.lt.s32.totalorder (%p2497_p4), %s1504_s17, 14 }
  0x15   : > { %1979 = vmatpush3.bf16.msra.mxu0 %v2306_v10  ;;  %v2323_v27 = vld [vmem:[%s2909_s1 + $0xb0] sm:$0xff]   ;;  %s2599_s24 = scalar_lea.vmem %s2908_s0, %s1917_s9  ;;  %v2327_v31 = vld [vmem:[%s2909_s1 + $0xb8] sm:$0xff]   ;;  %v2331_v43 = vld [vmem:[%s2909_s1 + $0x180] sm:$0xff]   ;;  %s2837_s23 = scalar_lea.vmem (%p2497_p4), %s2911_s3, %s1932_s18  }
  0x16   : > { %2037 = vmatpush3.bf16.msra.mxu1 %v2307_v11  ;;  %1980 = vmatprep.subr.bf16.mxu0 %v2308_v12  ;;  %v201_v32 = vld [vmem:[%s2599_s24] sm:$0xff]  ;;  %v202_v34 = vld [vmem:[%s2599_s24 + $0x8] sm:$0xff]  ;;  %v2336_v56 = vld [vmem:[%s2909_s1 + $0x150] sm:$0xff]  }
  0x17   : > { %2038 = vmatprep.subr.bf16.mxu1 %v2309_v13  ;;  %v205_v33 = vld [vmem:[%s2599_s24 + $0x20] sm:$0xff]  ;;  %v206_v37 = vld [vmem:[%s2599_s24 + $0x28] sm:$0xff]  ;;  %v2337_v63 = vld [vmem:[%s2909_s1 + $0x110] sm:$0xff]  }
  0x18   : > { %v1771_v35 = vcombine.low %v201_v32, %v205_v33  ;;  %v1772_v36 = vcombine.high %v201_v32, %v205_v33  ;;  %v1773_v38 = vcombine.low %v202_v34, %v206_v37  ;;  %v1774_v39 = vcombine.high %v202_v34, %v206_v37  ;;  %v209_v44 = vld [vmem:[%s2599_s24 + $0x40] sm:$0xff]  ;;  %v210_v47 = vld [vmem:[%s2599_s24 + $0x48] sm:$0xff]  ;;  %v2338_v0 = vld [vmem:[%s2909_s1 + $0x1d0] sm:$0xff]  }
  0x19   : > { %1981 = vmatpush3.bf16.msra.mxu0 %v2310_v14  ;;  %v213_v45 = vld [vmem:[%s2599_s24 + $0x60] sm:$0xff]  ;;  %v214_v48 = vld [vmem:[%s2599_s24 + $0x68] sm:$0xff]  ;;  %v2339_v1 = vld [vmem:[%s2909_s1 + $0x190] sm:$0xff]  }
  0x1a   : > { %2039 = vmatpush3.bf16.msra.mxu1 %v2311_v15  ;;  %1982 = vmatprep.subr.bf16.mxu0 %v2312_v16  ;;  %v1780_v46 = vcombine.high %v209_v44, %v213_v45  ;;  %v1782_v49 = vcombine.high %v210_v47, %v214_v48  ;;  %v2332_v50 = vld [vmem:[%s2909_s1 + $0x148] sm:$0xff]   ;;  %v1779_v51 = vcombine.low %v209_v44, %v213_v45  ;;  %v217_v57 = vld [vmem:[%s2599_s24 + $0x80] sm:$0xff]  ;;  %v2340_v3 = vld [vmem:[%s2909_s1 + $0x158] sm:$0xff]  }
  0x1b   : > { %2040 = vmatprep.subr.bf16.mxu1 %v2313_v17  ;;  %1088 = vmatprep.mubr.bf16.mxu0 %v1772_v36  ;;  %v2333_v52 = vld [vmem:[%s2909_s1 + $0x108] sm:$0xff]   ;;  %v1781_v53 = vcombine.low %v210_v47, %v214_v48  ;;  %v221_v58 = vld [vmem:[%s2599_s24 + $0xa0] sm:$0xff]  ;;  %v2341_v5 = vld [vmem:[%s2909_s1 + $0x118] sm:$0xff]  }
  0x1c   : > { %1177 = vmatprep.mubr.bf16.mxu1 %v1774_v39  ;;  %v2334_v54 = vld [vmem:[%s2909_s1 + $0x1c8] sm:$0xff]   ;;  %v1788_v61 = vcombine.high %v217_v57, %v221_v58  ;;  %v1787_v2 = vcombine.low %v217_v57, %v221_v58  ;;  %v225_v6 = vld [vmem:[%s2599_s24 + $0xc0] sm:$0xff]  ;;  %v2342_v12 = vld [vmem:[%s2909_s1 + $0x1d8] sm:$0xff]  }
  0x1d   : > { %1983 = vmatpush3.bf16.msra.mxu0 %v2314_v18  ;;  %v2335_v55 = vld [vmem:[%s2909_s1 + $0x188] sm:$0xff]   ;;  %v229_v7 = vld [vmem:[%s2599_s24 + $0xe0] sm:$0xff]  ;;  %v2343_v13 = vld [vmem:[%s2909_s1 + $0x198] sm:$0xff]  }
  0x1e   : > { %2041 = vmatpush3.bf16.msra.mxu1 %v2315_v19  ;;  %1984 = vmatprep.subr.bf16.mxu0 %v2316_v20  ;;  %v218_v59 = vld [vmem:[%s2599_s24 + $0x88] sm:$0xff]  ;;  %v1796_v9 = vcombine.high %v225_v6, %v229_v7  ;;  %v2344_v14 = vld [vmem:[%s2909_s1 + $0x160] sm:$0xff]   ;;  %v1795_v16 = vcombine.low %v225_v6, %v229_v7  ;;  %v2357_v47 = vld [vmem:[%s2909_s1 + $0x138] sm:$0xff]  }
  0x1f   : > { %2042 = vmatprep.subr.bf16.mxu1 %v2317_v21  ;;  %v222_v60 = vld [vmem:[%s2599_s24 + $0xa8] sm:$0xff]  ;;  %v2345_v15 = vld [vmem:[%s2909_s1 + $0x120] sm:$0xff]   ;;  %v208_v57 = vld [vmem:[%s2599_s24 + $0x38] sm:$0xff] }
  0x20   : > { %v1790_v62 = vcombine.high %v218_v59, %v222_v60  ;;  %v1789_v4 = vcombine.low %v218_v59, %v222_v60  ;;  %v226_v8 = vld [vmem:[%s2599_s24 + $0xc8] sm:$0xff]  ;;  %v2346_v17 = vld [vmem:[%s2909_s1 + $0x1e0] sm:$0xff]   ;;  %v219_v6 = vld [vmem:[%s2599_s24 + $0x90] sm:$0xff] }
  0x21   : > { %1985 = vmatpush3.bf16.msra.mxu0 %v2318_v22  ;;  %v230_v10 = vld [vmem:[%s2599_s24 + $0xe8] sm:$0xff]  ;;  %v233_v18 = vld [vmem:[%s2599_s24 + $0x100] sm:$0xff]  ;;  %v223_v7 = vld [vmem:[%s2599_s24 + $0xb0] sm:$0xff] }
  0x22   : > { %2043 = vmatpush3.bf16.msra.mxu1 %v2319_v23  ;;  %1986 = vmatprep.subr.bf16.mxu0 %v2320_v24  ;;  %v1798_v11 = vcombine.high %v226_v8, %v230_v10  ;;  %v237_v19 = vld [vmem:[%s2599_s24 + $0x120] sm:$0xff]  ;;  %v1797_v20 = vcombine.low %v226_v8, %v230_v10  ;;  %v234_v22 = vld [vmem:[%s2599_s24 + $0x108] sm:$0xff]  ;;  %v220_v8 = vld [vmem:[%s2599_s24 + $0x98] sm:$0xff] }
  0x23   : > { %2044 = vmatprep.subr.bf16.mxu1 %v2321_v25  ;;  %v1804_v21 = vcombine.high %v233_v18, %v237_v19  ;;  %v238_v23 = vld [vmem:[%s2599_s24 + $0x128] sm:$0xff]  ;;  %v2347_v25 = vld [vmem:[%s2909_s1 + $0x1a0] sm:$0xff]   ;;  %v1803_v34 = vcombine.low %v233_v18, %v237_v19  ;;  %v1791_v18 = vcombine.low %v219_v6, %v223_v7 }
  0x24   : > { %v1806_v24 = vcombine.high %v234_v22, %v238_v23  ;;  %v242_v32 = vld [vmem:[%s2599_s24 + $0x148] sm:$0xff]  ;;  %v1805_v36 = vcombine.low %v234_v22, %v238_v23  ;;  %v235_v22 = vld [vmem:[%s2599_s24 + $0x110] sm:$0xff] }
  0x25   : > { %1987 = vmatpush3.bf16.msra.mxu0 %v2322_v26  ;;  %v2348_v26 = vld [vmem:[%s2909_s1 + $0x168] sm:$0xff]   ;;  %v239_v23 = vld [vmem:[%s2599_s24 + $0x130] sm:$0xff] }
  0x26   : > { %2045 = vmatpush3.bf16.msra.mxu1 %v2323_v27  ;;  %1988 = vmatprep.subr.bf16.mxu0 %v2324_v28  ;;  %v2349_v27 = vld [vmem:[%s2909_s1 + $0x128] sm:$0xff]  }
  0x27   : > { %2046 = vmatprep.subr.bf16.mxu1 %v2325_v29  ;;  %v2350_v28 = vld [vmem:[%s2909_s1 + $0x1e8] sm:$0xff]  }
  0x28   : > { %v2351_v29 = vld [vmem:[%s2909_s1 + $0x1a8] sm:$0xff]  }
  0x29   : > { %1989 = vmatpush3.bf16.msra.mxu0 %v2326_v30  ;;  %v241_v30 = vld [vmem:[%s2599_s24 + $0x140] sm:$0xff]  ;;  %v246_v33 = vld [vmem:[%s2599_s24 + $0x168] sm:$0xff] }
  0x2a   : > { %2047 = vmatpush3.bf16.msra.mxu1 %v2327_v31  ;;  %2090 = vmatprep.subr.bf16.mxu0 %v2328_v40  ;;  %v245_v31 = vld [vmem:[%s2599_s24 + $0x160] sm:$0xff]  ;;  %v1814_v39 = vcombine.high %v242_v32, %v246_v33  ;;  %v2354_v40 = vld [vmem:[%s2909_s1 + $0x1f0] sm:$0xff]   ;;  %v250_v44 = vld [vmem:[%s2599_s24 + $0x188] sm:$0xff] }
  0x2b   : > { %2148 = vmatprep.subr.bf16.mxu1 %v2330_v42  ;;  %v1812_v37 = vcombine.high %v241_v30, %v245_v31  ;;  %v249_v42 = vld [vmem:[%s2599_s24 + $0x180] sm:$0xff]  ;;  %v254_v45 = vld [vmem:[%s2599_s24 + $0x1a8] sm:$0xff]  ;;  %v1811_v48 = vcombine.low %v241_v30, %v245_v31  ;;  %v243_v30 = vld [vmem:[%s2599_s24 + $0x150] sm:$0xff] }
  0x2c   : > { %1089 = vmatmul.mubr.bf16.vlgmr.msra.gmra.mrb[0].mxu0 %v1771_v35  ;;  %v2352_v35 = vld [vmem:[%s2909_s1 + $0x170] sm:$0xff]   ;;  %v1821_v59 = vcombine.low %v250_v44, %v254_v45 }
  0x2d   : > { %1178 = vmatmul.mubr.bf16.vlgmr.msra.gmra.mrb[0].mxu1 %v1773_v38  ;;  %2091 = vmatpush3.bf16.msra.mxu0 %v2329_v41  ;;  %v2353_v38 = vld [vmem:[%s2909_s1 + $0x130] sm:$0xff]  }
  0x2e   : > { %2149 = vmatpush3.bf16.msra.mxu1 %v2331_v43  ;;  %1096 = vmatprep.mubr.bf16.mxu0 %v1780_v46  ;;  %v2355_v41 = vld [vmem:[%s2909_s1 + $0x1b0] sm:$0xff]   ;;  %v253_v43 = vld [vmem:[%s2599_s24 + $0x1a0] sm:$0xff]  ;;  %v2356_v46 = vld [vmem:[%s2909_s1 + $0x178] sm:$0xff]  }
  0x2f   : > { %1185 = vmatprep.mubr.bf16.mxu1 %v1782_v49  ;;  %2092 = vmatprep.subr.bf16.mxu0 %v2332_v50  ;;  %v2358_v49 = vld [vmem:[%s2909_s1 + $0x1f8] sm:$0xff]   ;;  %v1813_v50 = vcombine.low %v242_v32, %v246_v33  ;;  %v1819_v58 = vcombine.low %v249_v42, %v253_v43  ;;  %v247_v31 = vld [vmem:[%s2599_s24 + $0x170] sm:$0xff] }
  0x30   : > { %2150 = vmatprep.subr.bf16.mxu1 %v2334_v54  ;;  %v203_v54 = vld [vmem:[%s2599_s24 + $0x10] sm:$0xff]  ;;  %v244_v32 = vld [vmem:[%s2599_s24 + $0x158] sm:$0xff] }
  0x31   : > { %2093 = vmatpush3.bf16.msra.mxu0 %v2333_v52  ;;  %v2359_v52 = vld [vmem:[%s2909_s1 + $0x1b8] sm:$0xff]  }
  0x32   : > { %2151 = vmatpush3.bf16.msra.mxu1 %v2335_v55  ;;  %2094 = vmatprep.subr.bf16.mxu0 %v2336_v56  ;;  %v207_v55 = vld [vmem:[%s2599_s24 + $0x30] sm:$0xff]  ;;  %v204_v56 = vld [vmem:[%s2599_s24 + $0x18] sm:$0xff] }
  0x33   : > { %2152 = vmatprep.subr.bf16.mxu1 %v2338_v0  ;;  %v1776_v60 = vcombine.high %v203_v54, %v207_v55  ;;  %v212_v0 = vld [vmem:[%s2599_s24 + $0x58] sm:$0xff] }
  0x34   : > { %1097 = vmatmul.mubr.bf16.gmra.mrb[4].mxu0 %v1779_v51  ;;  %v1820_v51 = vcombine.high %v249_v42, %v253_v43  ;;  %v248_v33 = vld [vmem:[%s2599_s24 + $0x178] sm:$0xff]  ;;  %v1815_v42 = vcombine.low %v243_v30, %v247_v31 }
  0x35   : > { %1186 = vmatmul.mubr.bf16.gmra.mrb[4].mxu1 %v1781_v53  ;;  %1104 = vmatprep.mubr.bf16.mxu0 %v1788_v61  ;;  %v1822_v53 = vcombine.high %v250_v44, %v254_v45  ;;  %v1778_v61 = vcombine.high %v204_v56, %v208_v57  ;;  %v1817_v43 = vcombine.low %v244_v32, %v248_v33 }
  0x36   : > { %1193 = vmatprep.mubr.bf16.mxu1 %v1790_v62  ;;  %2095 = vmatpush3.bf16.msra.mxu0 %v2337_v63  ;;  %v211_v62 = vld [vmem:[%s2599_s24 + $0x50] sm:$0xff] }
  0x37   : > { %2153 = vmatpush3.bf16.msra.mxu1 %v2339_v1  ;;  %2096 = vmatprep.subr.bf16.mxu0 %v2340_v3  ;;  %v215_v63 = vld [vmem:[%s2599_s24 + $0x70] sm:$0xff]  ;;  %v216_v1 = vld [vmem:[%s2599_s24 + $0x78] sm:$0xff]  ;;  %v1777_v3 = vcombine.low %v204_v56, %v208_v57 }
  0x38   : > { %2154 = vmatprep.subr.bf16.mxu1 %v2342_v12  ;;  %v1783_v10 = vcombine.low %v211_v62, %v215_v63  ;;  %v1792_v12 = vcombine.high %v219_v6, %v223_v7 }
  0x3a   : > { %2097 = vmatpush3.bf16.msra.mxu0 %v2341_v5  ;;  %v1786_v5 = vcombine.high %v212_v0, %v216_v1 }
  0x3b   : > { %2155 = vmatpush3.bf16.msra.mxu1 %v2343_v13  ;;  %2098 = vmatprep.subr.bf16.mxu0 %v2344_v14  ;;  %v227_v14 = vld [vmem:[%s2599_s24 + $0xd0] sm:$0xff] }
  0x3c   : > { %1105 = vmatmul.mubr.bf16.gmra.mrb[8].mxu0 %v1787_v2  ;;  %2156 = vmatprep.subr.bf16.mxu1 %v2346_v17  ;;  %v1775_v2 = vcombine.low %v203_v54, %v207_v55  ;;  %v232_v17 = vld [vmem:[%s2599_s24 + $0xf8] sm:$0xff] }
  0x3d   : > { %1194 = vmatmul.mubr.bf16.gmra.mrb[8].mxu1 %v1789_v4  ;;  %1112 = vmatprep.mubr.bf16.mxu0 %v1796_v9  ;;  %v1784_v4 = vcombine.high %v211_v62, %v215_v63  ;;  %v224_v9 = vld [vmem:[%s2599_s24 + $0xb8] sm:$0xff] }
  0x3e   : > { %1201 = vmatprep.mubr.bf16.mxu1 %v1798_v11  ;;  %2099 = vmatpush3.bf16.msra.mxu0 %v2345_v15  ;;  %v1785_v11 = vcombine.low %v212_v0, %v216_v1  ;;  %v1794_v13 = vcombine.high %v220_v8, %v224_v9  ;;  %v231_v15 = vld [vmem:[%s2599_s24 + $0xf0] sm:$0xff]  ;;  %v1793_v19 = vcombine.low %v220_v8, %v224_v9 }
  0x3f   : > { %2157 = vmatpush3.bf16.msra.mxu1 %v2347_v25  ;;  %2100 = vmatprep.subr.bf16.mxu0 %v2348_v26  ;;  %v240_v25 = vld [vmem:[%s2599_s24 + $0x138] sm:$0xff]  ;;  %v1799_v26 = vcombine.low %v227_v14, %v231_v15 }
  0x40   : > { %2158 = vmatprep.subr.bf16.mxu1 %v2350_v28  ;;  %v1808_v28 = vcombine.high %v235_v22, %v239_v23 }
  0x42   : > { %2101 = vmatpush3.bf16.msra.mxu0 %v2349_v27 }
  0x43   : > { %2159 = vmatpush3.bf16.msra.mxu1 %v2351_v29  ;;  %2102 = vmatprep.subr.bf16.mxu0 %v2352_v35 }
  0x44   : > { %1113 = vmatmul.mubr.bf16.gmra.mrb[12].mxu0 %v1795_v16  ;;  %2160 = vmatprep.subr.bf16.mxu1 %v2354_v40  ;;  %v228_v16 = vld [vmem:[%s2599_s24 + $0xd8] sm:$0xff] }
  0x45   : > { %1202 = vmatmul.mubr.bf16.gmra.mrb[12].mxu1 %v1797_v20  ;;  %1120 = vmatprep.mubr.bf16.mxu0 %v1804_v21  ;;  %v1800_v20 = vcombine.high %v227_v14, %v231_v15  ;;  %v1802_v21 = vcombine.high %v228_v16, %v232_v17  ;;  %v1801_v27 = vcombine.low %v228_v16, %v232_v17  ;;  %v252_v40 = vld [vmem:[%s2599_s24 + $0x198] sm:$0xff] }
  0x46   : > { %1209 = vmatprep.mubr.bf16.mxu1 %v1806_v24  ;;  %2103 = vmatpush3.bf16.msra.mxu0 %v2353_v38  ;;  %v236_v24 = vld [vmem:[%s2599_s24 + $0x118] sm:$0xff]  ;;  %v251_v38 = vld [vmem:[%s2599_s24 + $0x190] sm:$0xff] }
  0x47   : > { %2161 = vmatpush3.bf16.msra.mxu1 %v2355_v41  ;;  %2104 = vmatprep.subr.bf16.mxu0 %v2356_v46  ;;  %v1810_v29 = vcombine.high %v236_v24, %v240_v25  ;;  %v1809_v35 = vcombine.low %v236_v24, %v240_v25  ;;  %v256_v41 = vld [vmem:[%s2599_s24 + $0x1b8] sm:$0xff] }
  0x48   : > { %2162 = vmatprep.subr.bf16.mxu1 %v2358_v49  ;;  %v1826_v45 = vcombine.high %v252_v40, %v256_v41 }
  0x4a   : > { %2105 = vmatpush3.bf16.msra.mxu0 %v2357_v47  ;;  %v1825_v47 = vcombine.low %v252_v40, %v256_v41 }
  0x4b   : > { %2163 = vmatpush3.bf16.msra.mxu1 %v2359_v52 }
  0x4c   : > { %1121 = vmatmul.mubr.bf16.gmra.mrb[16].mxu0 %v1803_v34  ;;  %v1807_v34 = vcombine.low %v235_v22, %v239_v23 }
  0x4d   : > { %1210 = vmatmul.mubr.bf16.gmra.mrb[16].mxu1 %v1805_v36  ;;  %1128 = vmatprep.mubr.bf16.mxu0 %v1812_v37  ;;  %v1816_v36 = vcombine.high %v243_v30, %v247_v31  ;;  %v1818_v37 = vcombine.high %v244_v32, %v248_v33 }
  0x4e   : > { %1217 = vmatprep.mubr.bf16.mxu1 %v1814_v39  ;;  %v255_v39 = vld [vmem:[%s2599_s24 + $0x1b0] sm:$0xff]  ;;  %s175_s24 = sand.u32 1, %s2410_s12  }
  0x4f   : > { %v1824_v44 = vcombine.high %v251_v38, %v255_v39  ;;  %v1823_v46 = vcombine.low %v251_v38, %v255_v39  ;;  %s2206_s14 = smul.u32 56, %s175_s24 }
  0x51   : > { %s2810_s12 = scalar_lea.vmem [#allocation2], %s2206_s14  }
  0x54   : > { %1129 = vmatmul.mubr.bf16.gmra.mrb[20].mxu0 %v1811_v48 }
  0x55   : > { %1218 = vmatmul.mubr.bf16.gmra.mrb[20].mxu1 %v1813_v50  ;;  %1136 = vmatprep.mubr.bf16.mxu0 %v1820_v51  ;;  %v2762_v50 = vld [vmem:[%s2910_s2] ss:$0 sm:$0xff] }
  0x56   : > { %1225 = vmatprep.mubr.bf16.mxu1 %v1822_v53 }
  0x5c   : > { %1137 = vmatmul.mubr.bf16.gmra.mrb[24].mxu0 %v1819_v58 }
  0x5d   : > { %1226 = vmatmul.mubr.bf16.gmra.mrb[24].mxu1 %v1821_v59  ;;  %1266 = vmatprep.mubr.bf16.mxu0 %v1776_v60 }
  0x5e   : > { %1355 = vmatprep.mubr.bf16.mxu1 %v1778_v61 }
  0x64   : > { %1267 = vmatmul.mubr.bf16.vlgmr.msra.gmra.mrb[28].mxu0 %v1775_v2 }
  0x65   : > { %1356 = vmatmul.mubr.bf16.vlgmr.msra.gmra.mrb[28].mxu1 %v1777_v3  ;;  %1274 = vmatprep.mubr.bf16.mxu0 %v1784_v4 }
  0x66   : > { %1363 = vmatprep.mubr.bf16.mxu1 %v1786_v5 }
  0x6c   : > { %1275 = vmatmul.mubr.bf16.gmra.mrb[32].mxu0 %v1783_v10 }
  0x6d   : > { %1364 = vmatmul.mubr.bf16.gmra.mrb[32].mxu1 %v1785_v11  ;;  %1282 = vmatprep.mubr.bf16.mxu0 %v1792_v12 }
  0x6e   : > { %1371 = vmatprep.mubr.bf16.mxu1 %v1794_v13 }
  0x74   : > { %1283 = vmatmul.mubr.bf16.gmra.mrb[36].mxu0 %v1791_v18 }
  0x75   : > { %1372 = vmatmul.mubr.bf16.gmra.mrb[36].mxu1 %v1793_v19  ;;  %1290 = vmatprep.mubr.bf16.mxu0 %v1800_v20 }
  0x76   : > { %1379 = vmatprep.mubr.bf16.mxu1 %v1802_v21 }
  0x7c   : > { %1291 = vmatmul.mubr.bf16.gmra.mrb[40].mxu0 %v1799_v26 }
  0x7d   : > { %1380 = vmatmul.mubr.bf16.gmra.mrb[40].mxu1 %v1801_v27  ;;  %1298 = vmatprep.mubr.bf16.mxu0 %v1808_v28 }
  0x7e   : > { %1387 = vmatprep.mubr.bf16.mxu1 %v1810_v29 }
  0x84   : > { %1299 = vmatmul.mubr.bf16.gmra.mrb[44].mxu0 %v1807_v34 }
  0x85   : > { %1388 = vmatmul.mubr.bf16.gmra.mrb[44].mxu1 %v1809_v35  ;;  %1306 = vmatprep.mubr.bf16.mxu0 %v1816_v36 }
  0x86   : > { %1395 = vmatprep.mubr.bf16.mxu1 %v1818_v37 }
  0x8c   : > { %1307 = vmatmul.mubr.bf16.gmra.mrb[48].mxu0 %v1815_v42 }
  0x8d   : > { %1396 = vmatmul.mubr.bf16.gmra.mrb[48].mxu1 %v1817_v43  ;;  %1314 = vmatprep.mubr.bf16.mxu0 %v1824_v44 }
  0x8e   : > { %1403 = vmatprep.mubr.bf16.mxu1 %v1826_v45 }
  0x94   : > { %1315 = vmatmul.mubr.bf16.gmra.mrb[52].mxu0 %v1823_v46 }
  0x95   : > { %1404 = vmatmul.mubr.bf16.gmra.mrb[52].mxu1 %v1825_v47 }
  0xff   : > { %v1990_v48 = vpop.f32.mrb[0].mxu0 }
 0x100   : > { %v2048_v49 = vpop.f32.mrb[0].mxu1  ;;  %v1991_v51 = vpop.f32.mrb[1].mxu0 }
 0x101   : > { %v1992_v52 = vadd.f32 %v1991_v51, %v1990_v48  ;;  %v2049_v53 = vpop.f32.mrb[1].mxu1  ;;  %v1993_v54 = vpop.f32.mrb[2].mxu0 }
 0x102   : > { %v2050_v55 = vadd.f32 %v2049_v53, %v2048_v49  ;;  %v2051_v56 = vpop.f32.mrb[2].mxu1  ;;  %v1994_v57 = vpop.f32.mrb[3].mxu0 }
 0x103   : > { %v1091_v58 = vadd.f32 %v1992_v52, %v2762_v50  ;;  %v1995_v59 = vadd.f32 %v1994_v57, %v1993_v54  ;;  %v2052_v60 = vpop.f32.mrb[3].mxu1 }
 0x104   : > { %v2053_v61 = vadd.f32 %v2052_v60, %v2051_v56 }
 0x105   : > { %v2765_v62 = vadd.f32 %v2050_v55, %v1091_v58  ;;  %v1094_v63 = vadd.f32 %v1995_v59, %v2762_v50 }
 0x107   : > { %v2768_v0 = vadd.f32 %v2053_v61, %v1094_v63  ;;  %v1996_v1 = vpop.f32.mrb[4].mxu0 }
 0x108   : > { %v2054_v2 = vpop.f32.mrb[4].mxu1  ;;  %v1997_v3 = vpop.f32.mrb[5].mxu0 }
 0x109   : > { %v1998_v4 = vadd.f32 %v1997_v3, %v1996_v1  ;;  %v2055_v5 = vpop.f32.mrb[5].mxu1  ;;  %v1999_v6 = vpop.f32.mrb[6].mxu0 }
 0x10a   : > { %v2056_v7 = vadd.f32 %v2055_v5, %v2054_v2  ;;  %v2057_v8 = vpop.f32.mrb[6].mxu1  ;;  %v2000_v9 = vpop.f32.mrb[7].mxu0 }
 0x10b   : > { %v1099_v10 = vadd.f32 %v1998_v4, %v2762_v50  ;;  %v2001_v11 = vadd.f32 %v2000_v9, %v1999_v6  ;;  %v2058_v12 = vpop.f32.mrb[7].mxu1 }
 0x10c   : > { %v2059_v13 = vadd.f32 %v2058_v12, %v2057_v8 }
 0x10d   : > { %v2771_v14 = vadd.f32 %v2056_v7, %v1099_v10  ;;  %v1102_v15 = vadd.f32 %v2001_v11, %v2762_v50 }
 0x10f   : > { %v2774_v16 = vadd.f32 %v2059_v13, %v1102_v15  ;;  %v2002_v17 = vpop.f32.mrb[8].mxu0 }
 0x110   : > { %v2060_v18 = vpop.f32.mrb[8].mxu1  ;;  %v2003_v19 = vpop.f32.mrb[9].mxu0 }
 0x111   : > { %v2004_v20 = vadd.f32 %v2003_v19, %v2002_v17  ;;  %v2061_v21 = vpop.f32.mrb[9].mxu1  ;;  %v2005_v22 = vpop.f32.mrb[10].mxu0 }
 0x112   : > { %v2062_v23 = vadd.f32 %v2061_v21, %v2060_v18  ;;  %v2063_v24 = vpop.f32.mrb[10].mxu1  ;;  %v2006_v25 = vpop.f32.mrb[11].mxu0 }
 0x113   : > { %v1107_v26 = vadd.f32 %v2004_v20, %v2762_v50  ;;  %v2007_v27 = vadd.f32 %v2006_v25, %v2005_v22  ;;  %v2064_v28 = vpop.f32.mrb[11].mxu1 }
 0x114   : > { %v2065_v29 = vadd.f32 %v2064_v28, %v2063_v24 }
 0x115   : > { %v2777_v30 = vadd.f32 %v2062_v23, %v1107_v26  ;;  %v1110_v31 = vadd.f32 %v2007_v27, %v2762_v50 }
 0x117   : > { %v2780_v32 = vadd.f32 %v2065_v29, %v1110_v31  ;;  %v2008_v33 = vpop.f32.mrb[12].mxu0 }
 0x118   : > { %v2066_v34 = vpop.f32.mrb[12].mxu1  ;;  %v2009_v35 = vpop.f32.mrb[13].mxu0 }
 0x119   : > { %v2010_v36 = vadd.f32 %v2009_v35, %v2008_v33  ;;  %v2067_v37 = vpop.f32.mrb[13].mxu1  ;;  %v2011_v38 = vpop.f32.mrb[14].mxu0 }
 0x11a   : > { %v2068_v39 = vadd.f32 %v2067_v37, %v2066_v34  ;;  %v2069_v40 = vpop.f32.mrb[14].mxu1  ;;  %v2012_v41 = vpop.f32.mrb[15].mxu0 }
 0x11b   : > { %v1115_v42 = vadd.f32 %v2010_v36, %v2762_v50  ;;  %v2013_v43 = vadd.f32 %v2012_v41, %v2011_v38  ;;  %v2070_v44 = vpop.f32.mrb[15].mxu1 }
 0x11c   : > { %v2071_v45 = vadd.f32 %v2070_v44, %v2069_v40 }
 0x11d   : > { %v2783_v46 = vadd.f32 %v2068_v39, %v1115_v42  ;;  %v1118_v47 = vadd.f32 %v2013_v43, %v2762_v50 }
 0x11f   : > { %v2786_v48 = vadd.f32 %v2071_v45, %v1118_v47  ;;  %v2014_v49 = vpop.f32.mrb[16].mxu0 }
 0x120   : > { %v2072_v51 = vpop.f32.mrb[16].mxu1  ;;  %v2015_v52 = vpop.f32.mrb[17].mxu0 }
 0x121   : > { %v2016_v53 = vadd.f32 %v2015_v52, %v2014_v49  ;;  %v2073_v54 = vpop.f32.mrb[17].mxu1  ;;  %v2017_v55 = vpop.f32.mrb[18].mxu0 }
 0x122   : > { %v2074_v56 = vadd.f32 %v2073_v54, %v2072_v51  ;;  %v2075_v57 = vpop.f32.mrb[18].mxu1  ;;  %v2018_v58 = vpop.f32.mrb[19].mxu0 }
 0x123   : > { %v1123_v59 = vadd.f32 %v2016_v53, %v2762_v50  ;;  %v2019_v60 = vadd.f32 %v2018_v58, %v2017_v55  ;;  %v2076_v61 = vpop.f32.mrb[19].mxu1 }
 0x124   : > { %v2077_v63 = vadd.f32 %v2076_v61, %v2075_v57 }
 0x125   : > { %v2789_v1 = vadd.f32 %v2074_v56, %v1123_v59  ;;  %v1126_v2 = vadd.f32 %v2019_v60, %v2762_v50 }
 0x127   : > { %v2792_v3 = vadd.f32 %v2077_v63, %v1126_v2  ;;  %v2020_v4 = vpop.f32.mrb[20].mxu0 }
 0x128   : > { %v2078_v5 = vpop.f32.mrb[20].mxu1  ;;  %v2021_v6 = vpop.f32.mrb[21].mxu0 }
 0x129   : > { %v2022_v7 = vadd.f32 %v2021_v6, %v2020_v4  ;;  %v2079_v8 = vpop.f32.mrb[21].mxu1  ;;  %v2023_v9 = vpop.f32.mrb[22].mxu0 }
 0x12a   : > { %v2080_v10 = vadd.f32 %v2079_v8, %v2078_v5  ;;  %v2081_v11 = vpop.f32.mrb[22].mxu1  ;;  %v2024_v12 = vpop.f32.mrb[23].mxu0 }
 0x12b   : > { %v1131_v13 = vadd.f32 %v2022_v7, %v2762_v50  ;;  %v2025_v15 = vadd.f32 %v2024_v12, %v2023_v9  ;;  %v2082_v17 = vpop.f32.mrb[23].mxu1 }
 0x12c   : > { %v2083_v18 = vadd.f32 %v2082_v17, %v2081_v11 }
 0x12d   : > { %v2795_v19 = vadd.f32 %v2080_v10, %v1131_v13  ;;  %v1134_v20 = vadd.f32 %v2025_v15, %v2762_v50 }
 0x12f   : > { %v2798_v21 = vadd.f32 %v2083_v18, %v1134_v20  ;;  %v2026_v22 = vpop.f32.mrb[24].mxu0 }
 0x130   : > { %v2084_v23 = vpop.f32.mrb[24].mxu1  ;;  %v2027_v24 = vpop.f32.mrb[25].mxu0 }
 0x131   : > { %v2028_v25 = vadd.f32 %v2027_v24, %v2026_v22  ;;  %v2085_v26 = vpop.f32.mrb[25].mxu1  ;;  %v2029_v27 = vpop.f32.mrb[26].mxu0 }
 0x132   : > { %v2086_v28 = vadd.f32 %v2085_v26, %v2084_v23  ;;  %v2087_v29 = vpop.f32.mrb[26].mxu1  ;;  %v2030_v31 = vpop.f32.mrb[27].mxu0 }
 0x133   : > { %v1139_v33 = vadd.f32 %v2028_v25, %v2762_v50  ;;  %v2031_v34 = vadd.f32 %v2030_v31, %v2029_v27  ;;  %v2088_v35 = vpop.f32.mrb[27].mxu1 }
 0x134   : > { %v2089_v36 = vadd.f32 %v2088_v35, %v2087_v29 }
 0x135   : > { %v2801_v37 = vadd.f32 %v2086_v28, %v1139_v33  ;;  %v1142_v38 = vadd.f32 %v2031_v34, %v2762_v50 }
 0x137   : > { %v2804_v39 = vadd.f32 %v2089_v36, %v1142_v38  ;;  %v2106_v40 = vpop.f32.mrb[28].mxu0 }
 0x138   : > { %v2164_v41 = vpop.f32.mrb[28].mxu1  ;;  %v2107_v42 = vpop.f32.mrb[29].mxu0 }
 0x139   : > { %v2108_v43 = vadd.f32 %v2107_v42, %v2106_v40  ;;  %v2165_v44 = vpop.f32.mrb[29].mxu1  ;;  %v2109_v45 = vpop.f32.mrb[30].mxu0 }
 0x13a   : > { %v2166_v47 = vadd.f32 %v2165_v44, %v2164_v41  ;;  %v2167_v49 = vpop.f32.mrb[30].mxu1  ;;  %v2110_v51 = vpop.f32.mrb[31].mxu0 }
 0x13b   : > { %v1269_v52 = vadd.f32 %v2108_v43, %v2765_v62  ;;  %v2111_v53 = vadd.f32 %v2110_v51, %v2109_v45  ;;  %v2168_v54 = vpop.f32.mrb[31].mxu1 }
 0x13c   : > { %v2169_v55 = vadd.f32 %v2168_v54, %v2167_v49 }
 0x13d   : > { %v1358_v56 = vadd.f32 %v2166_v47, %v1269_v52  ;;  %v1272_v50 = vadd.f32 %v2111_v53, %v2768_v0 }
 0x13f   : > { %v1361_v57 = vadd.f32 %v2169_v55, %v1272_v50  ;;  %v2112_v58 = vpop.f32.mrb[32].mxu0  ;;  %v1412_v61 = vmax.f32 %v1358_v56, 0.0 }
 0x140   : > { %v2170_v59 = vpop.f32.mrb[32].mxu1  ;;  %v2113_v60 = vpop.f32.mrb[33].mxu0 }
 0x141   : > { %v1413_v63 = vmax.f32 %v1361_v57, 0.0  ;;  %v2114_v2 = vadd.f32 %v2113_v60, %v2112_v58  ;;  %v2171_v4 = vpop.f32.mrb[33].mxu1  ;;  %v2115_v5 = vpop.f32.mrb[34].mxu0 }
 0x142   : > { %v2172_v6 = vadd.f32 %v2171_v4, %v2170_v59  ;;  %v2173_v7 = vpop.f32.mrb[34].mxu1  ;;  %v2116_v62 = vpop.f32.mrb[35].mxu0 }
 0x143   : > { %v1936_v8 = vpack.c.bf16 %v1413_v63, %v1412_v61  ;;  %v1277_v9 = vadd.f32 %v2114_v2, %v2771_v14  ;;  %v2117_v10 = vadd.f32 %v2116_v62, %v2115_v5  ;;  %v2174_v11 = vpop.f32.mrb[35].mxu1 }
 0x144   : > { %v2175_v12 = vadd.f32 %v2174_v11, %v2173_v7 }
 0x145   : > { %1937 = vst [vmem:[%s2810_s12] sm:$0xff] %v1936_v8   ;;  %v1366_v0 = vadd.f32 %v2172_v6, %v1277_v9  ;;  %v1280_v13 = vadd.f32 %v2117_v10, %v2774_v16 }
 0x147   : > { %v1369_v15 = vadd.f32 %v2175_v12, %v1280_v13  ;;  %v2118_v17 = vpop.f32.mrb[36].mxu0  ;;  %v1414_v22 = vmax.f32 %v1366_v0, 0.0 }
 0x148   : > { %v2176_v18 = vpop.f32.mrb[36].mxu1  ;;  %v2119_v20 = vpop.f32.mrb[37].mxu0 }
 0x149   : > { %v1415_v23 = vmax.f32 %v1369_v15, 0.0  ;;  %v2120_v24 = vadd.f32 %v2119_v20, %v2118_v17  ;;  %v2177_v25 = vpop.f32.mrb[37].mxu1  ;;  %v2121_v14 = vpop.f32.mrb[38].mxu0 }
 0x14a   : > { %v2178_v26 = vadd.f32 %v2177_v25, %v2176_v18  ;;  %v2179_v27 = vpop.f32.mrb[38].mxu1  ;;  %v2122_v28 = vpop.f32.mrb[39].mxu0 }
 0x14b   : > { %v1941_v29 = vpack.c.bf16 %v1415_v23, %v1414_v22  ;;  %v1285_v31 = vadd.f32 %v2120_v24, %v2777_v30  ;;  %v2123_v33 = vadd.f32 %v2122_v28, %v2121_v14  ;;  %v2180_v34 = vpop.f32.mrb[39].mxu1 }
 0x14c   : > { %v2181_v35 = vadd.f32 %v2180_v34, %v2179_v27 }
 0x14d   : > { %1968 = vst [vmem:[%s2810_s12 + $0x8] sm:$0xff] %v1941_v29   ;;  %v1374_v16 = vadd.f32 %v2178_v26, %v1285_v31  ;;  %v1288_v36 = vadd.f32 %v2123_v33, %v2780_v32 }
 0x14f   : > { %v1377_v38 = vadd.f32 %v2181_v35, %v1288_v36  ;;  %v2124_v40 = vpop.f32.mrb[40].mxu0  ;;  %v1416_v43 = vmax.f32 %v1374_v16, 0.0 }
 0x150   : > { %v2182_v41 = vpop.f32.mrb[40].mxu1  ;;  %v2125_v42 = vpop.f32.mrb[41].mxu0 }
 0x151   : > { %v1417_v44 = vmax.f32 %v1377_v38, 0.0  ;;  %v2126_v45 = vadd.f32 %v2125_v42, %v2124_v40  ;;  %v2183_v47 = vpop.f32.mrb[41].mxu1  ;;  %v2127_v49 = vpop.f32.mrb[42].mxu0 }
 0x152   : > { %v2184_v51 = vadd.f32 %v2183_v47, %v2182_v41  ;;  %v2185_v52 = vpop.f32.mrb[42].mxu1  ;;  %v2128_v30 = vpop.f32.mrb[43].mxu0 }
 0x153   : > { %v1946_v53 = vpack.c.bf16 %v1417_v44, %v1416_v43  ;;  %v1293_v54 = vadd.f32 %v2126_v45, %v2783_v46  ;;  %v2129_v55 = vadd.f32 %v2128_v30, %v2127_v49  ;;  %v2186_v56 = vpop.f32.mrb[43].mxu1 }
 0x154   : > { %v2187_v50 = vadd.f32 %v2186_v56, %v2185_v52 }
 0x155   : > { %1969 = vst [vmem:[%s2810_s12 + $0x10] sm:$0xff] %v1946_v53   ;;  %v1382_v32 = vadd.f32 %v2184_v51, %v1293_v54  ;;  %v1296_v57 = vadd.f32 %v2129_v55, %v2786_v48 }
 0x157   : > { %v1385_v58 = vadd.f32 %v2187_v50, %v1296_v57  ;;  %v2130_v59 = vpop.f32.mrb[44].mxu0  ;;  %v1418_v63 = vmax.f32 %v1382_v32, 0.0 }
 0x158   : > { %v2188_v60 = vpop.f32.mrb[44].mxu1  ;;  %v2131_v61 = vpop.f32.mrb[45].mxu0 }
 0x159   : > { %v1419_v2 = vmax.f32 %v1385_v58, 0.0  ;;  %v2132_v4 = vadd.f32 %v2131_v61, %v2130_v59  ;;  %v2189_v5 = vpop.f32.mrb[45].mxu1  ;;  %v2133_v6 = vpop.f32.mrb[46].mxu0 }
 0x15a   : > { %v2190_v7 = vadd.f32 %v2189_v5, %v2188_v60  ;;  %v2191_v62 = vpop.f32.mrb[46].mxu1  ;;  %v2134_v46 = vpop.f32.mrb[47].mxu0 }
 0x15b   : > { %v1951_v8 = vpack.c.bf16 %v1419_v2, %v1418_v63  ;;  %v1301_v9 = vadd.f32 %v2132_v4, %v2789_v1  ;;  %v2135_v10 = vadd.f32 %v2134_v46, %v2133_v6  ;;  %v2192_v11 = vpop.f32.mrb[47].mxu1 }
 0x15c   : > { %v2193_v12 = vadd.f32 %v2192_v11, %v2191_v62 }
 0x15d   : > { %1970 = vst [vmem:[%s2810_s12 + $0x18] sm:$0xff] %v1951_v8   ;;  %v1390_v48 = vadd.f32 %v2190_v7, %v1301_v9  ;;  %v1304_v0 = vadd.f32 %v2135_v10, %v2792_v3 }
 0x15f   : > { %v1393_v13 = vadd.f32 %v2193_v12, %v1304_v0  ;;  %v2136_v15 = vpop.f32.mrb[48].mxu0  ;;  %v1420_v20 = vmax.f32 %v1390_v48, 0.0 }
 0x160   : > { %v2194_v17 = vpop.f32.mrb[48].mxu1  ;;  %v2137_v18 = vpop.f32.mrb[49].mxu0 }
 0x161   : > { %v1421_v22 = vmax.f32 %v1393_v13, 0.0  ;;  %v2138_v23 = vadd.f32 %v2137_v18, %v2136_v15  ;;  %v2195_v24 = vpop.f32.mrb[49].mxu1  ;;  %v2139_v25 = vpop.f32.mrb[50].mxu0 }
 0x162   : > { %v2196_v14 = vadd.f32 %v2195_v24, %v2194_v17  ;;  %v2197_v26 = vpop.f32.mrb[50].mxu1  ;;  %v2140_v1 = vpop.f32.mrb[51].mxu0 }
 0x163   : > { %v1956_v27 = vpack.c.bf16 %v1421_v22, %v1420_v20  ;;  %v1309_v28 = vadd.f32 %v2138_v23, %v2795_v19  ;;  %v2141_v29 = vadd.f32 %v2140_v1, %v2139_v25  ;;  %v2198_v31 = vpop.f32.mrb[51].mxu1 }
 0x164   : > { %v2199_v33 = vadd.f32 %v2198_v31, %v2197_v26 }
 0x165   : > { %1971 = vst [vmem:[%s2810_s12 + $0x20] sm:$0xff] %v1956_v27   ;;  %v1398_v3 = vadd.f32 %v2196_v14, %v1309_v28  ;;  %v1312_v34 = vadd.f32 %v2141_v29, %v2798_v21 }
 0x167   : > { %v1401_v35 = vadd.f32 %v2199_v33, %v1312_v34  ;;  %v2142_v16 = vpop.f32.mrb[52].mxu0  ;;  %v1422_v40 = vmax.f32 %v1398_v3, 0.0 }
 0x168   : > { %v2200_v36 = vpop.f32.mrb[52].mxu1  ;;  %v2143_v38 = vpop.f32.mrb[53].mxu0 }
 0x169   : > { %v1423_v41 = vmax.f32 %v1401_v35, 0.0  ;;  %v2144_v42 = vadd.f32 %v2143_v38, %v2142_v16  ;;  %v2201_v43 = vpop.f32.mrb[53].mxu1  ;;  %v2145_v44 = vpop.f32.mrb[54].mxu0 }
 0x16a   : > { %v2202_v45 = vadd.f32 %v2201_v43, %v2200_v36  ;;  %v2203_v19 = vpop.f32.mrb[54].mxu1  ;;  %v2146_v47 = vpop.f32.mrb[55].mxu0 }
 0x16b   : > { %v1961_v49 = vpack.c.bf16 %v1423_v41, %v1422_v40  ;;  %v1317_v51 = vadd.f32 %v2144_v42, %v2801_v37  ;;  %v2147_v52 = vadd.f32 %v2146_v47, %v2145_v44  ;;  %v2204_v30 = vpop.f32.mrb[55].mxu1 }
 0x16c   : > { %v2205_v21 = vadd.f32 %v2204_v30, %v2203_v19 }
 0x16d   : > { %1972 = vst [vmem:[%s2810_s12 + $0x28] sm:$0xff] %v1961_v49   ;;  %v1406_v53 = vadd.f32 %v2202_v45, %v1317_v51  ;;  %v1320_v54 = vadd.f32 %v2147_v52, %v2804_v39 }
 0x16f   : > { %v1409_v55 = vadd.f32 %v2205_v21, %v1320_v54  ;;  %v1424_v56 = vmax.f32 %v1406_v53, 0.0  ;;  %1502 = sbr.rel (!%p2497_p4) target bundleno = 445 (0x1bd), region = 36 }
 0x171   : > { %v1425_v50 = vmax.f32 %v1409_v55, 0.0 }
 0x173   : > { %v1966_v32 = vpack.c.bf16 %v1425_v50, %v1424_v56 }
 0x175   : > { %1973 = vst [vmem:[%s2810_s12 + $0x30] sm:$0xff] %v1966_v32  }
 0x176   : > { %s2920_s17 = smov (!%p1505_p8, %s1504_s17), 14 }
 0x177   : > { %s1905_s25 = sshll.u32 %s2920_s17, 6 }
 0x178   : > { %p1908_p9 = scmp.eq.s32.totalorder %s1905_s25, 0 }
 0x179   : > { %2360 = sdivrem.u32 (!%p1908_p9), %s2920_s17, 14 }
 0x17a   : > { %1513 = sbr.rel (%p1908_p9) target bundleno = 445 (0x1bd), region = 40 }
 0x182   : > { %s2843_s20 = spop.drf %2360 }
 0x183   : > { %p1909_p10 = scmp.le.s32.totalorder %s2843_s20, 0 }
 0x184   : > { %s2913_s15 = smov (!%p1909_p10), %s2837_s23  ;;  %s2914_s30 = smov (!%p1909_p10), %s2810_s12 }
 0x185   : > { %1720 = sbr.rel (%p1909_p10) target bundleno = 416 (0x1a0), region = 112  ;;  %s2852_s26 = smov (!%p1909_p10), 0  }
 0x186   : > { %s2854_s27 = smov (!%p1909_p10), 0  }
 0x18c LB: >> { %v1530_v37 = vld [vmem:[%s2426_s30] sm:$0xf]  ;;  %v1532_v39 = vld [vmem:[%s2426_s30 + $0x4] sm:$0xf]  ;;  %v1534_v57 = vld [vmem:[%s2426_s30 + $0x8] sm:$0xf]  ;;  %s2434_s27 = sphi %s2854_s27, %s1524_s27   ;;  %s2430_s26 = sphi %s2852_s26, %s2915_s26   ;;  %s2426_s30 = sphi %s2914_s30, %s1563_s30   ;;  %s2422_s15 = sphi %s2913_s15, %s1564_s15  }
 0x18d   : >> { %1531 = vst [vmem:[%s2422_s15] sm:$0xf] %v1530_v37  ;;  %1533 = vst [vmem:[%s2422_s15 + $0x4] sm:$0xf] %v1532_v39  ;;  %v1536_v58 = vld [vmem:[%s2426_s30 + $0xc] sm:$0xf]  ;;  %s1558_s28 = sadd.s32 1, %s2430_s26 }
 0x18e   : >> { %1535 = vst [vmem:[%s2422_s15 + $0x8] sm:$0xf] %v1534_v57  ;;  %v1538_v59 = vld [vmem:[%s2426_s30 + $0x10] sm:$0xf]  ;;  %v1540_v60 = vld [vmem:[%s2426_s30 + $0x14] sm:$0xf]  ;;  %p1559_p11 = scmp.ge.s32.totalorder %s1558_s28, %s2843_s20 }
 0x18f   : >> { %1537 = vst [vmem:[%s2422_s15 + $0xc] sm:$0xf] %v1536_v58  ;;  %1539 = vst [vmem:[%s2422_s15 + $0x10] sm:$0xf] %v1538_v59  ;;  %v1542_v61 = vld [vmem:[%s2426_s30 + $0x18] sm:$0xf] }
 0x190   : >> { %1541 = vst [vmem:[%s2422_s15 + $0x14] sm:$0xf] %v1540_v60  ;;  %v1544_v63 = vld [vmem:[%s2426_s30 + $0x1c] sm:$0xf]  ;;  %v1546_v2 = vld [vmem:[%s2426_s30 + $0x20] sm:$0xf] }
 0x191   : >> { %1543 = vst [vmem:[%s2422_s15 + $0x18] sm:$0xf] %v1542_v61  ;;  %1545 = vst [vmem:[%s2422_s15 + $0x1c] sm:$0xf] %v1544_v63  ;;  %v1548_v4 = vld [vmem:[%s2426_s30 + $0x24] sm:$0xf] }
 0x192   : >> { %1547 = vst [vmem:[%s2422_s15 + $0x20] sm:$0xf] %v1546_v2  ;;  %v1550_v5 = vld [vmem:[%s2426_s30 + $0x28] sm:$0xf]  ;;  %v1552_v6 = vld [vmem:[%s2426_s30 + $0x2c] sm:$0xf] }
 0x193   : >> { %1549 = vst [vmem:[%s2422_s15 + $0x24] sm:$0xf] %v1548_v4  ;;  %1551 = vst [vmem:[%s2422_s15 + $0x28] sm:$0xf] %v1550_v5  ;;  %v1554_v7 = vld [vmem:[%s2426_s30 + $0x30] sm:$0xf] }
 0x194   : >> { %1553 = vst [vmem:[%s2422_s15 + $0x2c] sm:$0xf] %v1552_v6  ;;  %v1556_v62 = vld [vmem:[%s2426_s30 + $0x34] sm:$0xf]  ;;  %1555 = vst [vmem:[%s2422_s15 + $0x30] sm:$0xf] %v1554_v7 }
 0x195   : >> { %1557 = vst [vmem:[%s2422_s15 + $0x34] sm:$0xf] %v1556_v62  ;;  %s2922_s28 = smov (%p1559_p11, %s1558_s28), 0  ;;  %s1524_s27 = sadd.s32 1, %s2434_s27  }
 0x196   : >> { %s1561_s29 = smul.u32 56, %s2922_s28  ;;  %p1523_p12 = scmp.ge.s32.totalorder %s1524_s27, %s2843_s20 }
 0x197   : >> { %s2915_s26 = smov %s2922_s28 }
 0x198   : >> { %s1563_s30 = scalar_lea.vmem %s2810_s12, %s1561_s29 [#allocation2]   ;;  %s1564_s15 = scalar_lea.vmem %s2837_s23, %s1561_s29  }
 0x199   : > { %1526 = sbr.rel (!%p1523_p12) target bundleno = 396 (0x18c), region = 118 }
 0x1a0 PF: > { %2362 = sdivrem.u32 %s2920_s17, 14 }
 0x1a1   : > { %s1910_s4 = smul.u32 56, %s2843_s20 }
 0x1a3   : > { %s1569_s5 = scalar_lea.vmem %s2810_s12, %s1910_s4 [#allocation2]   ;;  %s1571_s6 = scalar_lea.vmem %s2837_s23, %s1910_s4  }
 0x1a9   : > { %s2363_s7 = spop.drf %2362 }
 0x1aa   : > { %p1912_p13 = scmp.le.s32.totalorder %s2363_s7, 0 }
 0x1ab   : > { %s2436_s8 = smov (!%p1912_p13), %s1571_s6   ;;  %s2440_s9 = smov (!%p1912_p13), %s1569_s5  }
 0x1ac   : > { %1734 = sbr.rel (%p1912_p13) target bundleno = 445 (0x1bd), region = 123  ;;  %s2444_s10 = smov (!%p1912_p13), 0  }
 0x1ad   : > { %s2448_s11 = smov (!%p1912_p13), 0  }
 0x1b3 LB: >> { %v1581_v46 = vld [vmem:[%s2442_s9] sm:$0xf]  ;;  %s1583_s24 = sadd.s32 1, %s2446_s10  ;;  %s1575_s11 = sadd.s32 1, %s2450_s11   ;;  %s2450_s11 = sphi %s2448_s11, %s1575_s11   ;;  %s2446_s10 = sphi %s2444_s10, %s2445_s10   ;;  %s2442_s9 = sphi %s2440_s9, %s1588_s9   ;;  %s2438_s8 = sphi %s2436_s8, %s1589_s8  }
 0x1b4   : >> { %1582 = vst [vmem:[%s2438_s8] sm:$0xf] %v1581_v46  ;;  %p1584_p0 = scmp.ge.s32.totalorder %s1583_s24, %s2363_s7  ;;  %p1574_p1 = scmp.ge.s32.totalorder %s1575_s11, %s2363_s7 }
 0x1b6   : >> { %s2924_s24 = smov (%p1584_p0, %s1583_s24), 0  ;;  %1577 = sbr.rel (!%p1574_p1) target bundleno = 435 (0x1b3), region = 129 }
 0x1b7   : >> { %s1913_s14 = sshll.u32 %s2924_s24, 2  ;;  %s2445_s10 = smov %s2924_s24  }
 0x1b8   : >> { %s1588_s9 = scalar_lea.vmem %s1569_s5, %s1913_s14 [#allocation2]   ;;  %s1589_s8 = scalar_lea.vmem %s1571_s6, %s1913_s14  }
 0x1bd PF: > { %p10_p2 = scmp.ge.s32.totalorder %s2487_s16, 4   ;;  %s2916_s12 = smov %s2414_s13 }
 0x1be   : > { %s2917_s13 = smov %s2495_s19  ;;  %s2918_s14 = smov %s2487_s16 }
 0x1bf   :  { %12 = sbr.rel (!%p10_p2) target bundleno = 2 (0x2), region = 140 }

// kernel: dqn_forward.5
= control target key start
LH: loop header
LB: loop body
LE: loop exit
PB: predicated region body
PF: predicated region fallthrough
CT: control target
= control target key end

     0   :  { %s1578_s12 = smov 0   ;;  %s1580_s13 = smov 0   ;;  %s1840_s0 = inlined_call_operand.vmem [shape: bf16[162,512], index: 0, kind: input, shape index: {}]   ;;  %s1841_s1 = inlined_call_operand.vmem [shape: bf16[512,64], index: 1, kind: input, shape index: {}]   ;;  %s1842_s2 = inlined_call_operand.vmem [shape: f32[1,64], index: 2, kind: input, shape index: {}]   ;;  %s1843_s3 = inlined_call_operand.vmem [shape: bf16[162,64], index: 3, kind: output, shape index: {}]  }
   0x1   :  { %s1582_s14 = smov 0  }
   0x2 LB: > { %s1591_s15 = sadd.s32 4294967295, %s1524_s14   ;;  %s1593_s16 = sadd.s32 1, %s1524_s14   ;;  %s1524_s14 = sphi %s1582_s14, %s1850_s14   ;;  %s1520_s13 = sphi %s1580_s13, %s1849_s13   ;;  %s1516_s12 = sphi %s1578_s12, %s1848_s12  }
   0x3   : > { %s85_s17 = ssub.s32 %s1524_s14, %s1593_s16  ;;  %s88_s18 = sadd.s32 1, %s1520_s13 }
   0x4   : > { %p86_p0 = scmp.eq.s32.totalorder %s85_s17, 0  ;;  %p98_p1 = scmp.ne.s32.totalorder %s1520_s13, %s1516_s12 }
   0x5   : > { %p99_p2 = scmp.eq.s32.totalorder %s1591_s15, 1  ;;  %p1106_p3 = scmp.ge.s32.totalorder %s1524_s14, 1 }
   0x6   : > { %s1601_s19 = scalar_select %p86_p0, %s1520_s13, %s88_s18  }
   0x7   : > { %p1603_p4 = por %p99_p2, %p98_p1  ;;  %p149_p5 = scmp.lt.s32.totalorder %s1524_s14, 3 }
   0x9   : > { %p150_p6 = pnand %p1106_p3, %p149_p5 }
   0xa   : > { %v1398_v0 = vld [vmem:[%s1841_s1 + $0x40] sm:$0xff] (!%p150_p6)   ;;  %v1402_v4 = vld [vmem:[%s1841_s1 + $0x48] sm:$0xff] (!%p150_p6)   ;;  %v1406_v8 = vld [vmem:[%s1841_s1 + $0x50] sm:$0xff] (!%p150_p6)   ;;  %s1653_s30 = smul.u32 (!%p150_p6), 12, %s1591_s15  ;;  %s175_s5 = sand.u32 (!%p150_p6), 1, %s1516_s12   ;;  %vm830_vm0 = vcmask (!%p150_p6), 519168  }
   0xb   : > { %153 = sbr.rel (%p150_p6) target bundleno = 379 (0x17b), region = 32  ;;  %v1399_v1 = vld [vmem:[%s1841_s1 + $0xc0] sm:$0xff] (!%p150_p6)   ;;  %1204 = vmatprep.subr.bf16.mxu0 (!%p150_p6), %v1398_v0  ;;  %v1403_v5 = vld [vmem:[%s1841_s1 + $0xc8] sm:$0xff] (!%p150_p6)   ;;  %v1407_v9 = vld [vmem:[%s1841_s1 + $0xd0] sm:$0xff] (!%p150_p6)  }
   0xc   : > { %v1400_v2 = vld [vmem:[%s1841_s1] sm:$0xff] (!%p150_p6)   ;;  %1256 = vmatprep.subr.bf16.mxu1 (!%p150_p6), %v1399_v1  ;;  %v1404_v6 = vld [vmem:[%s1841_s1 + $0x8] sm:$0xff] (!%p150_p6)   ;;  %v1408_v10 = vld [vmem:[%s1841_s1 + $0x10] sm:$0xff] (!%p150_p6)   ;;  %p184_p7 = scmp.lt.s32.totalorder (!%p150_p6), %s1653_s30, 20  ;;  %s1308_s6 = smul.u32 (!%p150_p6), 48, %s175_s5 }
   0xd   : > { %v1401_v3 = vld [vmem:[%s1841_s1 + $0x80] sm:$0xff] (!%p150_p6)   ;;  %1205 = vmatpush3.bf16.msra.mxu0 (!%p150_p6), %v1400_v2  ;;  %v1405_v7 = vld [vmem:[%s1841_s1 + $0x88] sm:$0xff] (!%p150_p6)   ;;  %v1409_v11 = vld [vmem:[%s1841_s1 + $0x90] sm:$0xff] (!%p150_p6)  }
   0xe   : > { %1257 = vmatpush3.bf16.msra.mxu1 (!%p150_p6), %v1401_v3  ;;  %1206 = vmatprep.subr.bf16.mxu0 (!%p150_p6), %v1402_v4  ;;  %v1410_v12 = vld [vmem:[%s1841_s1 + $0x58] sm:$0xff] (!%p150_p6)   ;;  %v1414_v16 = vld [vmem:[%s1841_s1 + $0x60] sm:$0xff] (!%p150_p6)   ;;  %v1418_v20 = vld [vmem:[%s1841_s1 + $0x68] sm:$0xff] (!%p150_p6)   ;;  %s1745_s12 = scalar_lea.vmem (!%p150_p6), [#allocation2], %s1308_s6  }
   0xf   : > { %1258 = vmatprep.subr.bf16.mxu1 (!%p150_p6), %v1403_v5  ;;  %v1411_v13 = vld [vmem:[%s1841_s1 + $0xd8] sm:$0xff] (!%p150_p6)   ;;  %v1415_v17 = vld [vmem:[%s1841_s1 + $0xe0] sm:$0xff] (!%p150_p6)   ;;  %v1419_v21 = vld [vmem:[%s1841_s1 + $0xe8] sm:$0xff] (!%p150_p6)  }
  0x10   : > { %v1412_v14 = vld [vmem:[%s1841_s1 + $0x18] sm:$0xff] (!%p150_p6)   ;;  %v1416_v18 = vld [vmem:[%s1841_s1 + $0x20] sm:$0xff] (!%p150_p6)   ;;  %v1420_v22 = vld [vmem:[%s1841_s1 + $0x28] sm:$0xff] (!%p150_p6)  }
  0x11   : > { %1207 = vmatpush3.bf16.msra.mxu0 (!%p150_p6), %v1404_v6  ;;  %v1413_v15 = vld [vmem:[%s1841_s1 + $0x98] sm:$0xff] (!%p150_p6)   ;;  %v1417_v19 = vld [vmem:[%s1841_s1 + $0xa0] sm:$0xff] (!%p150_p6)   ;;  %v1421_v23 = vld [vmem:[%s1841_s1 + $0xa8] sm:$0xff] (!%p150_p6)  }
  0x12   : > { %1259 = vmatpush3.bf16.msra.mxu1 %v1405_v7  ;;  %1208 = vmatprep.subr.bf16.mxu0 %v1406_v8  ;;  %s185_s26 = scalar_select %p184_p7, %s1653_s30, 20  ;;  %v1422_v24 = vld [vmem:[%s1841_s1 + $0x70] sm:$0xff]   ;;  %v1426_v28 = vld [vmem:[%s1841_s1 + $0x78] sm:$0xff]   ;;  %v1740_v58 = vld [vmem:[%s1842_s2] ss:$0 sm:$0xff] }
  0x13   : > { %1260 = vmatprep.subr.bf16.mxu1 %v1407_v9  ;;  %v1423_v25 = vld [vmem:[%s1841_s1 + $0xf0] sm:$0xff]   ;;  %v1427_v29 = vld [vmem:[%s1841_s1 + $0xf8] sm:$0xff]   ;;  %s851_s7 = ssub.s32 (%p1603_p4), 21, %s1653_s30  ;;  %s1203_s8 = smul.u32 (%p1603_p4), 48, %s1591_s15 }
  0x14   : > { %v1424_v26 = vld [vmem:[%s1841_s1 + $0x30] sm:$0xff]   ;;  %s1190_s9 = sshll.u32 %s185_s26, 4  ;;  %v1428_v30 = vld [vmem:[%s1841_s1 + $0x38] sm:$0xff]   ;;  %p852_p8 = scmp.lt.s32.totalorder (%p1603_p4), %s851_s7, 12 }
  0x15   : > { %1209 = vmatpush3.bf16.msra.mxu0 %v1408_v10  ;;  %v1425_v27 = vld [vmem:[%s1841_s1 + $0xb0] sm:$0xff]   ;;  %s1705_s24 = scalar_lea.vmem %s1840_s0, %s1190_s9  ;;  %v1429_v31 = vld [vmem:[%s1841_s1 + $0xb8] sm:$0xff]   ;;  %s1788_s11 = scalar_lea.vmem (%p1603_p4), %s1843_s3, %s1203_s8  }
  0x16   : > { %1261 = vmatpush3.bf16.msra.mxu1 %v1409_v11  ;;  %1210 = vmatprep.subr.bf16.mxu0 %v1410_v12  ;;  %v1430_v32 = vld [vmem:[%s1705_s24] ss:$16 sps:$4 sm:$0xff]   ;;  %v1432_v33 = vld [vmem:[%s1705_s24 + $0x4] ss:$16 sps:$4 sm:$0xff]   ;;  %v1433_v34 = vld [vmem:[%s1705_s24 + $0x8] ss:$16 sps:$4 sm:$0xff]  }
  0x17   : > { %1262 = vmatprep.subr.bf16.mxu1 %v1411_v13  ;;  %v1435_v35 = vld [vmem:[%s1705_s24 + $0xc] ss:$16 sps:$4 sm:$0xff]   ;;  %640 = vmatprep.mubr.bf16.mxu0 %v1432_v33  ;;  %v1436_v36 = vld [vmem:[%s1705_s24 + $0x24] ss:$16 sps:$4 sm:$0xff]   ;;  %v1440_v38 = vld [vmem:[%s1705_s24 + $0x20] ss:$16 sps:$4 sm:$0xff]  }
  0x18   : > { %721 = vmatprep.mubr.bf16.mxu1 %v1435_v35  ;;  %v1438_v37 = vld [vmem:[%s1705_s24 + $0x2c] ss:$16 sps:$4 sm:$0xff]   ;;  %v1441_v39 = vld [vmem:[%s1705_s24 + $0x28] ss:$16 sps:$4 sm:$0xff]   ;;  %v1442_v40 = vld [vmem:[%s1705_s24 + $0x44] ss:$16 sps:$4 sm:$0xff]  }
  0x19   : > { %1211 = vmatpush3.bf16.msra.mxu0 %v1412_v14  ;;  %v1444_v41 = vld [vmem:[%s1705_s24 + $0x4c] ss:$16 sps:$4 sm:$0xff]   ;;  %v1446_v42 = vld [vmem:[%s1705_s24 + $0x40] ss:$16 sps:$4 sm:$0xff]   ;;  %v1447_v43 = vld [vmem:[%s1705_s24 + $0x48] ss:$16 sps:$4 sm:$0xff]  }
  0x1a   : > { %1263 = vmatpush3.bf16.msra.mxu1 %v1413_v15  ;;  %1212 = vmatprep.subr.bf16.mxu0 %v1414_v16  ;;  %v1448_v44 = vld [vmem:[%s1705_s24 + $0x64] ss:$16 sps:$4 sm:$0xff]   ;;  %v1450_v45 = vld [vmem:[%s1705_s24 + $0x6c] ss:$16 sps:$4 sm:$0xff]   ;;  %v1452_v46 = vld [vmem:[%s1705_s24 + $0x60] ss:$16 sps:$4 sm:$0xff]  }
  0x1b   : > { %1264 = vmatprep.subr.bf16.mxu1 %v1415_v17  ;;  %v1453_v47 = vld [vmem:[%s1705_s24 + $0x68] ss:$16 sps:$4 sm:$0xff]   ;;  %v1454_v48 = vld [vmem:[%s1705_s24 + $0x84] ss:$16 sps:$4 sm:$0xff]   ;;  %v1456_v49 = vld [vmem:[%s1705_s24 + $0x8c] ss:$16 sps:$4 sm:$0xff]  }
  0x1c   : > { %v1458_v50 = vld [vmem:[%s1705_s24 + $0x80] ss:$16 sps:$4 sm:$0xff]   ;;  %v1459_v51 = vld [vmem:[%s1705_s24 + $0x88] ss:$16 sps:$4 sm:$0xff]   ;;  %v1460_v52 = vld [vmem:[%s1705_s24 + $0xa4] ss:$16 sps:$4 sm:$0xff]  }
  0x1d   : > { %1213 = vmatpush3.bf16.msra.mxu0 %v1416_v18  ;;  %v1462_v53 = vld [vmem:[%s1705_s24 + $0xac] ss:$16 sps:$4 sm:$0xff]   ;;  %v1464_v54 = vld [vmem:[%s1705_s24 + $0xa0] ss:$16 sps:$4 sm:$0xff]   ;;  %v1465_v55 = vld [vmem:[%s1705_s24 + $0xa8] ss:$16 sps:$4 sm:$0xff]  }
  0x1e   : > { %1265 = vmatpush3.bf16.msra.mxu1 %v1417_v19  ;;  %1214 = vmatprep.subr.bf16.mxu0 %v1418_v20 }
  0x1f   : > { %1266 = vmatprep.subr.bf16.mxu1 %v1419_v21 }
  0x21   : > { %1215 = vmatpush3.bf16.msra.mxu0 %v1420_v22 }
  0x22   : > { %1267 = vmatpush3.bf16.msra.mxu1 %v1421_v23  ;;  %1216 = vmatprep.subr.bf16.mxu0 %v1422_v24 }
  0x23   : > { %1268 = vmatprep.subr.bf16.mxu1 %v1423_v25 }
  0x25   : > { %1217 = vmatpush3.bf16.msra.mxu0 %v1424_v26 }
  0x26   : > { %1269 = vmatpush3.bf16.msra.mxu1 %v1425_v27  ;;  %1218 = vmatprep.subr.bf16.mxu0 %v1426_v28 }
  0x27   : > { %1270 = vmatprep.subr.bf16.mxu1 %v1427_v29 }
  0x29   : > { %1219 = vmatpush3.bf16.msra.mxu0 %v1428_v30 }
  0x2a   : > { %1271 = vmatpush3.bf16.msra.mxu1 %v1429_v31 }
  0x2c   : > { %641 = vmatmul.mubr.bf16.vlgmr.msra.gmra.mrb[0].mxu0 %v1430_v32 }
  0x2d   : > { %722 = vmatmul.mubr.bf16.vlgmr.msra.gmra.mrb[0].mxu1 %v1433_v34  ;;  %648 = vmatprep.mubr.bf16.mxu0 %v1436_v36 }
  0x2e   : > { %729 = vmatprep.mubr.bf16.mxu1 %v1438_v37 }
  0x34   : > { %649 = vmatmul.mubr.bf16.gmra.mrb[4].mxu0 %v1440_v38 }
  0x35   : > { %730 = vmatmul.mubr.bf16.gmra.mrb[4].mxu1 %v1441_v39  ;;  %656 = vmatprep.mubr.bf16.mxu0 %v1442_v40 }
  0x36   : > { %737 = vmatprep.mubr.bf16.mxu1 %v1444_v41 }
  0x3c   : > { %657 = vmatmul.mubr.bf16.gmra.mrb[8].mxu0 %v1446_v42 }
  0x3d   : > { %738 = vmatmul.mubr.bf16.gmra.mrb[8].mxu1 %v1447_v43  ;;  %664 = vmatprep.mubr.bf16.mxu0 %v1448_v44 }
  0x3e   : > { %745 = vmatprep.mubr.bf16.mxu1 %v1450_v45 }
  0x44   : > { %665 = vmatmul.mubr.bf16.gmra.mrb[12].mxu0 %v1452_v46 }
  0x45   : > { %746 = vmatmul.mubr.bf16.gmra.mrb[12].mxu1 %v1453_v47  ;;  %672 = vmatprep.mubr.bf16.mxu0 %v1454_v48 }
  0x46   : > { %753 = vmatprep.mubr.bf16.mxu1 %v1456_v49 }
  0x4c   : > { %673 = vmatmul.mubr.bf16.gmra.mrb[16].mxu0 %v1458_v50 }
  0x4d   : > { %754 = vmatmul.mubr.bf16.gmra.mrb[16].mxu1 %v1459_v51  ;;  %680 = vmatprep.mubr.bf16.mxu0 %v1460_v52 }
  0x4e   : > { %761 = vmatprep.mubr.bf16.mxu1 %v1462_v53 }
  0x54   : > { %681 = vmatmul.mubr.bf16.gmra.mrb[20].mxu0 %v1464_v54 }
  0x55   : > { %762 = vmatmul.mubr.bf16.gmra.mrb[20].mxu1 %v1465_v55 }
  0xff   : > { %v1220_v56 = vpop.f32.mrb[0].mxu0 }
 0x100   : > { %v1272_v57 = vpop.f32.mrb[0].mxu1  ;;  %v1221_v59 = vpop.f32.mrb[1].mxu0 }
 0x101   : > { %v1222_v60 = vadd.f32 %v1221_v59, %v1220_v56  ;;  %v1273_v61 = vpop.f32.mrb[1].mxu1  ;;  %v1223_v62 = vpop.f32.mrb[2].mxu0 }
 0x102   : > { %v1274_v63 = vadd.f32 %v1273_v61, %v1272_v57  ;;  %v1275_v0 = vpop.f32.mrb[2].mxu1  ;;  %v1224_v1 = vpop.f32.mrb[3].mxu0 }
 0x103   : > { %v643_v2 = vadd.f32 %v1222_v60, %v1740_v58  ;;  %v1225_v3 = vadd.f32 %v1224_v1, %v1223_v62  ;;  %v1276_v4 = vpop.f32.mrb[3].mxu1 }
 0x104   : > { %v1277_v5 = vadd.f32 %v1276_v4, %v1275_v0 }
 0x105   : > { %v724_v6 = vadd.f32 %v1274_v63, %v643_v2  ;;  %v646_v7 = vadd.f32 %v1225_v3, %v1740_v58 }
 0x107   : > { %v770_v8 = vmax.f32 %v724_v6, 0.0  ;;  %v727_v9 = vadd.f32 %v1277_v5, %v646_v7  ;;  %v1226_v10 = vpop.f32.mrb[4].mxu0 }
 0x108   : > { %v1278_v11 = vpop.f32.mrb[4].mxu1  ;;  %v1227_v12 = vpop.f32.mrb[5].mxu0 }
 0x109   : > { %v1191_v13 = vpack.c.bf16 %v770_v8, %v770_v8  ;;  %v771_v14 = vmax.f32 %v727_v9, 0.0  ;;  %v1228_v15 = vadd.f32 %v1227_v12, %v1226_v10  ;;  %v1279_v16 = vpop.f32.mrb[5].mxu1  ;;  %v1229_v17 = vpop.f32.mrb[6].mxu0 }
 0x10a   : > { %v1280_v18 = vadd.f32 %v1279_v16, %v1278_v11  ;;  %v1281_v19 = vpop.f32.mrb[6].mxu1  ;;  %v1230_v20 = vpop.f32.mrb[7].mxu0 }
 0x10b   : > { %831 = vst.msk [vmem:[%s1745_s12] sm:$0xf] %vm830_vm0, %v1191_v13  ;;  %v1192_v21 = vpack.c.bf16 %v771_v14, %v771_v14  ;;  %v651_v22 = vadd.f32 %v1228_v15, %v1740_v58  ;;  %v1231_v23 = vadd.f32 %v1230_v20, %v1229_v17  ;;  %v1282_v24 = vpop.f32.mrb[7].mxu1 }
 0x10c   : > { %v1283_v25 = vadd.f32 %v1282_v24, %v1281_v19 }
 0x10d   : > { %832 = vst.msk [vmem:[%s1745_s12 + $0x4] sm:$0xf] %vm830_vm0, %v1192_v21  ;;  %v732_v26 = vadd.f32 %v1280_v18, %v651_v22  ;;  %v654_v27 = vadd.f32 %v1231_v23, %v1740_v58 }
 0x10f   : > { %v772_v28 = vmax.f32 %v732_v26, 0.0  ;;  %v735_v29 = vadd.f32 %v1283_v25, %v654_v27  ;;  %v1232_v30 = vpop.f32.mrb[8].mxu0 }
 0x110   : > { %v1284_v31 = vpop.f32.mrb[8].mxu1  ;;  %v1233_v32 = vpop.f32.mrb[9].mxu0 }
 0x111   : > { %v1193_v33 = vpack.c.bf16 %v772_v28, %v772_v28  ;;  %v773_v34 = vmax.f32 %v735_v29, 0.0  ;;  %v1234_v35 = vadd.f32 %v1233_v32, %v1232_v30  ;;  %v1285_v36 = vpop.f32.mrb[9].mxu1  ;;  %v1235_v37 = vpop.f32.mrb[10].mxu0 }
 0x112   : > { %v1286_v38 = vadd.f32 %v1285_v36, %v1284_v31  ;;  %v1287_v39 = vpop.f32.mrb[10].mxu1  ;;  %v1236_v40 = vpop.f32.mrb[11].mxu0 }
 0x113   : > { %833 = vst.msk [vmem:[%s1745_s12 + $0x8] sm:$0xf] %vm830_vm0, %v1193_v33  ;;  %v1194_v41 = vpack.c.bf16 %v773_v34, %v773_v34  ;;  %v659_v42 = vadd.f32 %v1234_v35, %v1740_v58  ;;  %v1237_v43 = vadd.f32 %v1236_v40, %v1235_v37  ;;  %v1288_v44 = vpop.f32.mrb[11].mxu1 }
 0x114   : > { %v1289_v45 = vadd.f32 %v1288_v44, %v1287_v39 }
 0x115   : > { %834 = vst.msk [vmem:[%s1745_s12 + $0xc] sm:$0xf] %vm830_vm0, %v1194_v41  ;;  %v740_v46 = vadd.f32 %v1286_v38, %v659_v42  ;;  %v662_v47 = vadd.f32 %v1237_v43, %v1740_v58 }
 0x117   : > { %v774_v48 = vmax.f32 %v740_v46, 0.0  ;;  %v743_v49 = vadd.f32 %v1289_v45, %v662_v47  ;;  %v1238_v50 = vpop.f32.mrb[12].mxu0 }
 0x118   : > { %v1290_v51 = vpop.f32.mrb[12].mxu1  ;;  %v1239_v52 = vpop.f32.mrb[13].mxu0 }
 0x119   : > { %v1195_v53 = vpack.c.bf16 %v774_v48, %v774_v48  ;;  %v775_v54 = vmax.f32 %v743_v49, 0.0  ;;  %v1240_v55 = vadd.f32 %v1239_v52, %v1238_v50  ;;  %v1291_v56 = vpop.f32.mrb[13].mxu1  ;;  %v1241_v57 = vpop.f32.mrb[14].mxu0 }
 0x11a   : > { %v1292_v59 = vadd.f32 %v1291_v56, %v1290_v51  ;;  %v1293_v60 = vpop.f32.mrb[14].mxu1  ;;  %v1242_v61 = vpop.f32.mrb[15].mxu0 }
 0x11b   : > { %835 = vst.msk [vmem:[%s1745_s12 + $0x10] sm:$0xf] %vm830_vm0, %v1195_v53  ;;  %v1196_v62 = vpack.c.bf16 %v775_v54, %v775_v54  ;;  %v667_v63 = vadd.f32 %v1240_v55, %v1740_v58  ;;  %v1243_v0 = vadd.f32 %v1242_v61, %v1241_v57  ;;  %v1294_v1 = vpop.f32.mrb[15].mxu1 }
 0x11c   : > { %v1295_v2 = vadd.f32 %v1294_v1, %v1293_v60 }
 0x11d   : > { %836 = vst.msk [vmem:[%s1745_s12 + $0x14] sm:$0xf] %vm830_vm0, %v1196_v62  ;;  %v748_v3 = vadd.f32 %v1292_v59, %v667_v63  ;;  %v670_v4 = vadd.f32 %v1243_v0, %v1740_v58 }
 0x11f   : > { %v776_v5 = vmax.f32 %v748_v3, 0.0  ;;  %v751_v6 = vadd.f32 %v1295_v2, %v670_v4  ;;  %v1244_v7 = vpop.f32.mrb[16].mxu0 }
 0x120   : > { %v1296_v8 = vpop.f32.mrb[16].mxu1  ;;  %v1245_v9 = vpop.f32.mrb[17].mxu0 }
 0x121   : > { %v1197_v10 = vpack.c.bf16 %v776_v5, %v776_v5  ;;  %v777_v11 = vmax.f32 %v751_v6, 0.0  ;;  %v1246_v12 = vadd.f32 %v1245_v9, %v1244_v7  ;;  %v1297_v13 = vpop.f32.mrb[17].mxu1  ;;  %v1247_v14 = vpop.f32.mrb[18].mxu0 }
 0x122   : > { %v1298_v15 = vadd.f32 %v1297_v13, %v1296_v8  ;;  %v1299_v16 = vpop.f32.mrb[18].mxu1  ;;  %v1248_v17 = vpop.f32.mrb[19].mxu0 }
 0x123   : > { %837 = vst.msk [vmem:[%s1745_s12 + $0x18] sm:$0xf] %vm830_vm0, %v1197_v10  ;;  %v1198_v18 = vpack.c.bf16 %v777_v11, %v777_v11  ;;  %v675_v19 = vadd.f32 %v1246_v12, %v1740_v58  ;;  %v1249_v20 = vadd.f32 %v1248_v17, %v1247_v14  ;;  %v1300_v21 = vpop.f32.mrb[19].mxu1 }
 0x124   : > { %v1301_v22 = vadd.f32 %v1300_v21, %v1299_v16 }
 0x125   : > { %838 = vst.msk [vmem:[%s1745_s12 + $0x1c] sm:$0xf] %vm830_vm0, %v1198_v18  ;;  %v756_v23 = vadd.f32 %v1298_v15, %v675_v19  ;;  %v678_v24 = vadd.f32 %v1249_v20, %v1740_v58 }
 0x127   : > { %v778_v25 = vmax.f32 %v756_v23, 0.0  ;;  %v759_v26 = vadd.f32 %v1301_v22, %v678_v24  ;;  %v1250_v27 = vpop.f32.mrb[20].mxu0 }
 0x128   : > { %v1302_v28 = vpop.f32.mrb[20].mxu1  ;;  %v1251_v29 = vpop.f32.mrb[21].mxu0 }
 0x129   : > { %v1199_v30 = vpack.c.bf16 %v778_v25, %v778_v25  ;;  %v779_v31 = vmax.f32 %v759_v26, 0.0  ;;  %v1252_v32 = vadd.f32 %v1251_v29, %v1250_v27  ;;  %v1303_v33 = vpop.f32.mrb[21].mxu1  ;;  %v1253_v34 = vpop.f32.mrb[22].mxu0 }
 0x12a   : > { %v1304_v35 = vadd.f32 %v1303_v33, %v1302_v28  ;;  %v1305_v36 = vpop.f32.mrb[22].mxu1  ;;  %v1254_v37 = vpop.f32.mrb[23].mxu0 }
 0x12b   : > { %839 = vst.msk [vmem:[%s1745_s12 + $0x20] sm:$0xf] %vm830_vm0, %v1199_v30  ;;  %v1200_v38 = vpack.c.bf16 %v779_v31, %v779_v31  ;;  %v683_v39 = vadd.f32 %v1252_v32, %v1740_v58  ;;  %v1255_v40 = vadd.f32 %v1254_v37, %v1253_v34  ;;  %v1306_v41 = vpop.f32.mrb[23].mxu1 }
 0x12c   : > { %v1307_v42 = vadd.f32 %v1306_v41, %v1305_v36 }
 0x12d   : > { %840 = vst.msk [vmem:[%s1745_s12 + $0x24] sm:$0xf] %vm830_vm0, %v1200_v38  ;;  %v764_v43 = vadd.f32 %v1304_v35, %v683_v39  ;;  %v686_v44 = vadd.f32 %v1255_v40, %v1740_v58 }
 0x12f   : > { %v780_v45 = vmax.f32 %v764_v43, 0.0  ;;  %v767_v46 = vadd.f32 %v1307_v42, %v686_v44  ;;  %849 = sbr.rel (!%p1603_p4) target bundleno = 379 (0x17b), region = 36 }
 0x131   : > { %v1201_v47 = vpack.c.bf16 %v780_v45, %v780_v45  ;;  %v781_v48 = vmax.f32 %v767_v46, 0.0 }
 0x133   : > { %841 = vst.msk [vmem:[%s1745_s12 + $0x28] sm:$0xf] %vm830_vm0, %v1201_v47  ;;  %v1202_v49 = vpack.c.bf16 %v781_v48, %v781_v48 }
 0x135   : > { %842 = vst.msk [vmem:[%s1745_s12 + $0x2c] sm:$0xf] %vm830_vm0, %v1202_v49 }
 0x136   : > { %s1852_s7 = smov (!%p852_p8, %s851_s7), 12 }
 0x137   : > { %s1178_s14 = sshll.u32 %s1852_s7, 6 }
 0x138   : > { %p1181_p9 = scmp.eq.s32.totalorder %s1178_s14, 0 }
 0x139   : > { %1466 = sdivrem.u32 (!%p1181_p9), %s1852_s7, 12 }
 0x13a   : > { %860 = sbr.rel (%p1181_p9) target bundleno = 379 (0x17b), region = 40 }
 0x142   : > { %s1794_s20 = spop.drf %1466 }
 0x143   : > { %p1182_p10 = scmp.le.s32.totalorder %s1794_s20, 0 }
 0x144   : > { %s1845_s15 = smov (!%p1182_p10), %s1788_s11  ;;  %s1846_s30 = smov (!%p1182_p10), %s1745_s12 }
 0x145   : > { %1059 = sbr.rel (%p1182_p10) target bundleno = 350 (0x15e), region = 112  ;;  %s1803_s17 = smov (!%p1182_p10), 0  }
 0x146   : > { %s1805_s18 = smov (!%p1182_p10), 0  }
 0x14c LB: >> { %v877_v58 = vld [vmem:[%s1532_s30] sm:$0xf]  ;;  %v879_v50 = vld [vmem:[%s1532_s30 + $0x4] sm:$0xf]  ;;  %v881_v51 = vld [vmem:[%s1532_s30 + $0x8] sm:$0xf]  ;;  %s1540_s18 = sphi %s1805_s18, %s871_s18   ;;  %s1536_s17 = sphi %s1803_s17, %s1847_s17   ;;  %s1532_s30 = sphi %s1846_s30, %s906_s30   ;;  %s1528_s15 = sphi %s1845_s15, %s907_s15  }
 0x14d   : >> { %878 = vst [vmem:[%s1528_s15] sm:$0xf] %v877_v58  ;;  %880 = vst [vmem:[%s1528_s15 + $0x4] sm:$0xf] %v879_v50  ;;  %v883_v52 = vld [vmem:[%s1532_s30 + $0xc] sm:$0xf]  ;;  %s901_s21 = sadd.s32 1, %s1536_s17 }
 0x14e   : >> { %882 = vst [vmem:[%s1528_s15 + $0x8] sm:$0xf] %v881_v51  ;;  %v885_v53 = vld [vmem:[%s1532_s30 + $0x10] sm:$0xf]  ;;  %v887_v54 = vld [vmem:[%s1532_s30 + $0x14] sm:$0xf]  ;;  %p902_p11 = scmp.ge.s32.totalorder %s901_s21, %s1794_s20 }
 0x14f   : >> { %884 = vst [vmem:[%s1528_s15 + $0xc] sm:$0xf] %v883_v52  ;;  %886 = vst [vmem:[%s1528_s15 + $0x10] sm:$0xf] %v885_v53  ;;  %v889_v55 = vld [vmem:[%s1532_s30 + $0x18] sm:$0xf] }
 0x150   : >> { %888 = vst [vmem:[%s1528_s15 + $0x14] sm:$0xf] %v887_v54  ;;  %v891_v56 = vld [vmem:[%s1532_s30 + $0x1c] sm:$0xf]  ;;  %v893_v57 = vld [vmem:[%s1532_s30 + $0x20] sm:$0xf] }
 0x151   : >> { %890 = vst [vmem:[%s1528_s15 + $0x18] sm:$0xf] %v889_v55  ;;  %892 = vst [vmem:[%s1528_s15 + $0x1c] sm:$0xf] %v891_v56  ;;  %v895_v59 = vld [vmem:[%s1532_s30 + $0x24] sm:$0xf] }
 0x152   : >> { %894 = vst [vmem:[%s1528_s15 + $0x20] sm:$0xf] %v893_v57  ;;  %v897_v60 = vld [vmem:[%s1532_s30 + $0x28] sm:$0xf]  ;;  %v899_v61 = vld [vmem:[%s1532_s30 + $0x2c] sm:$0xf] }
 0x153   : >> { %896 = vst [vmem:[%s1528_s15 + $0x24] sm:$0xf] %v895_v59  ;;  %898 = vst [vmem:[%s1528_s15 + $0x28] sm:$0xf] %v897_v60  ;;  %s1854_s21 = smov (%p902_p11, %s901_s21), 0  ;;  %s871_s18 = sadd.s32 1, %s1540_s18  }
 0x154   : >> { %900 = vst [vmem:[%s1528_s15 + $0x2c] sm:$0xf] %v899_v61  ;;  %s904_s22 = smul.u32 48, %s1854_s21  ;;  %p870_p12 = scmp.ge.s32.totalorder %s871_s18, %s1794_s20 }
 0x155   : >> { %s1847_s17 = smov %s1854_s21 }
 0x156   : >> { %s906_s30 = scalar_lea.vmem %s1745_s12, %s904_s22 [#allocation2]   ;;  %s907_s15 = scalar_lea.vmem %s1788_s11, %s904_s22  }
 0x157   : > { %873 = sbr.rel (!%p870_p12) target bundleno = 332 (0x14c), region = 118 }
 0x15e PF: > { %1468 = sdivrem.u32 %s1852_s7, 12 }
 0x15f   : > { %s1183_s23 = smul.u32 48, %s1794_s20 }
 0x161   : > { %s912_s24 = scalar_lea.vmem %s1745_s12, %s1183_s23 [#allocation2]   ;;  %s914_s25 = scalar_lea.vmem %s1788_s11, %s1183_s23  }
 0x167   : > { %s1469_s26 = spop.drf %1468 }
 0x168   : > { %p1185_p13 = scmp.le.s32.totalorder %s1469_s26, 0 }
 0x169   : > { %s1542_s27 = smov (!%p1185_p13), %s914_s25   ;;  %s1546_s28 = smov (!%p1185_p13), %s912_s24  }
 0x16a   : > { %1073 = sbr.rel (%p1185_p13) target bundleno = 379 (0x17b), region = 123  ;;  %s1550_s29 = smov (!%p1185_p13), 0  }
 0x16b   : > { %s1554_s4 = smov (!%p1185_p13), 0  }
 0x171 LB: >> { %v924_v62 = vld [vmem:[%s1548_s28] sm:$0xf]  ;;  %s926_s5 = sadd.s32 1, %s1552_s29  ;;  %s918_s4 = sadd.s32 1, %s1556_s4   ;;  %s1556_s4 = sphi %s1554_s4, %s918_s4   ;;  %s1552_s29 = sphi %s1550_s29, %s1551_s29   ;;  %s1548_s28 = sphi %s1546_s28, %s931_s28   ;;  %s1544_s27 = sphi %s1542_s27, %s932_s27  }
 0x172   : >> { %925 = vst [vmem:[%s1544_s27] sm:$0xf] %v924_v62  ;;  %p927_p0 = scmp.ge.s32.totalorder %s926_s5, %s1469_s26  ;;  %p917_p1 = scmp.ge.s32.totalorder %s918_s4, %s1469_s26 }
 0x174   : >> { %s1856_s5 = smov (%p927_p0, %s926_s5), 0  ;;  %920 = sbr.rel (!%p917_p1) target bundleno = 369 (0x171), region = 129 }
 0x175   : >> { %s1186_s6 = sshll.u32 %s1856_s5, 2  ;;  %s1551_s29 = smov %s1856_s5  }
 0x176   : >> { %s931_s28 = scalar_lea.vmem %s912_s24, %s1186_s6 [#allocation2]   ;;  %s932_s27 = scalar_lea.vmem %s914_s25, %s1186_s6  }
 0x17b PF: > { %p10_p2 = scmp.ge.s32.totalorder %s1593_s16, 4   ;;  %s1848_s12 = smov %s1520_s13 }
 0x17c   : > { %s1849_s13 = smov %s1601_s19  ;;  %s1850_s14 = smov %s1593_s16 }
 0x17d   :  { %12 = sbr.rel (!%p10_p2) target bundleno = 2 (0x2), region = 140 }

// kernel: dqn_forward.6
= control target key start
LH: loop header
LB: loop body
LE: loop exit
PB: predicated region body
PF: predicated region fallthrough
CT: control target
= control target key end

     0   :  { %s1596_s12 = smov 0   ;;  %s1598_s13 = smov 0   ;;  %s1849_s0 = inlined_call_operand.vmem [shape: bf16[98,576], index: 0, kind: input, shape index: {}]   ;;  %s1850_s1 = inlined_call_operand.vmem [shape: bf16[576,64], index: 1, kind: input, shape index: {}]   ;;  %s1851_s2 = inlined_call_operand.vmem [shape: f32[1,64], index: 2, kind: input, shape index: {}]   ;;  %s1852_s3 = inlined_call_operand.vmem [shape: bf16[98,64], index: 3, kind: output, shape index: {}]  }
   0x1   :  { %s1600_s14 = smov 0  }
   0x2 LB: > { %s1609_s15 = sadd.s32 4294967295, %s1542_s14   ;;  %s1611_s16 = sadd.s32 1, %s1542_s14   ;;  %s1542_s14 = sphi %s1600_s14, %s1859_s14   ;;  %s1538_s13 = sphi %s1598_s13, %s1858_s13   ;;  %s1534_s12 = sphi %s1596_s12, %s1857_s12  }
   0x3   : > { %s85_s17 = ssub.s32 %s1542_s14, %s1611_s16  ;;  %s88_s18 = sadd.s32 1, %s1538_s13 }
   0x4   : > { %p86_p0 = scmp.eq.s32.totalorder %s85_s17, 0  ;;  %p98_p1 = scmp.ne.s32.totalorder %s1538_s13, %s1534_s12 }
   0x5   : > { %p99_p2 = scmp.eq.s32.totalorder %s1609_s15, 1  ;;  %p1122_p3 = scmp.ge.s32.totalorder %s1542_s14, 1 }
   0x6   : > { %s1619_s19 = scalar_select %p86_p0, %s1538_s13, %s88_s18  }
   0x7   : > { %p1621_p4 = por %p99_p2, %p98_p1  ;;  %p149_p5 = scmp.lt.s32.totalorder %s1542_s14, 3 }
   0x9   : > { %p150_p6 = pnand %p1122_p3, %p149_p5 }
   0xa   : > { %v1424_v0 = vld [vmem:[%s1850_s1 + $0x40] sm:$0xff] (!%p150_p6)   ;;  %v1428_v4 = vld [vmem:[%s1850_s1 + $0x48] sm:$0xff] (!%p150_p6)   ;;  %v1432_v8 = vld [vmem:[%s1850_s1 + $0x50] sm:$0xff] (!%p150_p6)   ;;  %s1671_s30 = sshll.u32 (!%p150_p6), %s1609_s15, 3  ;;  %vm620_vm0 = vcmask (!%p150_p6), 523264   ;;  %s175_s17 = sand.u32 (!%p150_p6), 1, %s1534_s12  }
   0xb   : > { %153 = sbr.rel (%p150_p6) target bundleno = 353 (0x161), region = 32  ;;  %v1425_v1 = vld [vmem:[%s1850_s1 + $0xc0] sm:$0xff] (!%p150_p6)   ;;  %1223 = vmatprep.subr.bf16.mxu0 (!%p150_p6), %v1424_v0  ;;  %v1429_v5 = vld [vmem:[%s1850_s1 + $0xc8] sm:$0xff] (!%p150_p6)   ;;  %v1433_v9 = vld [vmem:[%s1850_s1 + $0xd0] sm:$0xff] (!%p150_p6)   ;;  %p184_p7 = scmp.lt.s32.totalorder (!%p150_p6), %s1671_s30, 12  ;;  %vm868_vm1 = vcmask (!%p150_p6), 519168  }
   0xc   : > { %v1426_v2 = vld [vmem:[%s1850_s1] sm:$0xff] (!%p150_p6)   ;;  %1263 = vmatprep.subr.bf16.mxu1 (!%p150_p6), %v1425_v1  ;;  %v1430_v6 = vld [vmem:[%s1850_s1 + $0x8] sm:$0xff] (!%p150_p6)   ;;  %v1434_v10 = vld [vmem:[%s1850_s1 + $0x10] sm:$0xff] (!%p150_p6)   ;;  %s1123_s18 = sshll.u32 (!%p150_p6), %s175_s17, 5 }
   0xd   : > { %v1427_v3 = vld [vmem:[%s1850_s1 + $0x80] sm:$0xff] (!%p150_p6)   ;;  %1224 = vmatpush3.bf16.msra.mxu0 (!%p150_p6), %v1426_v2  ;;  %v1431_v7 = vld [vmem:[%s1850_s1 + $0x88] sm:$0xff] (!%p150_p6)   ;;  %v1435_v11 = vld [vmem:[%s1850_s1 + $0x90] sm:$0xff] (!%p150_p6)   ;;  %s1770_s12 = scalar_lea.vmem (!%p150_p6), [#allocation2], %s1123_s18  }
   0xe   : > { %1264 = vmatpush3.bf16.msra.mxu1 (!%p150_p6), %v1427_v3  ;;  %1225 = vmatprep.subr.bf16.mxu0 (!%p150_p6), %v1428_v4  ;;  %v1436_v12 = vld [vmem:[%s1850_s1 + $0x58] sm:$0xff] (!%p150_p6)   ;;  %v1440_v16 = vld [vmem:[%s1850_s1 + $0x60] sm:$0xff] (!%p150_p6)   ;;  %v1444_v20 = vld [vmem:[%s1850_s1 + $0x68] sm:$0xff] (!%p150_p6)  }
   0xf   : > { %1265 = vmatprep.subr.bf16.mxu1 (!%p150_p6), %v1429_v5  ;;  %v1437_v13 = vld [vmem:[%s1850_s1 + $0xd8] sm:$0xff] (!%p150_p6)   ;;  %v1441_v17 = vld [vmem:[%s1850_s1 + $0xe0] sm:$0xff] (!%p150_p6)   ;;  %v1445_v21 = vld [vmem:[%s1850_s1 + $0xe8] sm:$0xff] (!%p150_p6)  }
  0x10   : > { %v1438_v14 = vld [vmem:[%s1850_s1 + $0x18] sm:$0xff] (!%p150_p6)   ;;  %v1442_v18 = vld [vmem:[%s1850_s1 + $0x20] sm:$0xff] (!%p150_p6)   ;;  %v1446_v22 = vld [vmem:[%s1850_s1 + $0x28] sm:$0xff] (!%p150_p6)  }
  0x11   : > { %1226 = vmatpush3.bf16.msra.mxu0 (!%p150_p6), %v1430_v6  ;;  %v1439_v15 = vld [vmem:[%s1850_s1 + $0x98] sm:$0xff] (!%p150_p6)   ;;  %v1443_v19 = vld [vmem:[%s1850_s1 + $0xa0] sm:$0xff] (!%p150_p6)   ;;  %v1447_v23 = vld [vmem:[%s1850_s1 + $0xa8] sm:$0xff] (!%p150_p6)  }
  0x12   : > { %1266 = vmatpush3.bf16.msra.mxu1 %v1431_v7  ;;  %1227 = vmatprep.subr.bf16.mxu0 %v1432_v8  ;;  %s185_s24 = scalar_select %p184_p7, %s1671_s30, 12  ;;  %v1448_v24 = vld [vmem:[%s1850_s1 + $0x70] sm:$0xff]   ;;  %v1452_v28 = vld [vmem:[%s1850_s1 + $0x78] sm:$0xff]   ;;  %v1462_v36 = vld [vmem:[%s1850_s1 + $0x100] sm:$0xff]  }
  0x13   : > { %1267 = vmatprep.subr.bf16.mxu1 %v1433_v9  ;;  %v1449_v25 = vld [vmem:[%s1850_s1 + $0xf0] sm:$0xff]   ;;  %v1453_v29 = vld [vmem:[%s1850_s1 + $0xf8] sm:$0xff]   ;;  %v1469_v39 = vld [vmem:[%s1850_s1 + $0x108] sm:$0xff]   ;;  %s885_s21 = ssub.s32 (%p1621_p4), 13, %s1671_s30  ;;  %s1220_s22 = sshll.u32 (%p1621_p4), %s1609_s15, 5 }
  0x14   : > { %s1335_s7 = smul.u32 20, %s185_s24  ;;  %v1450_v26 = vld [vmem:[%s1850_s1 + $0x30] sm:$0xff]   ;;  %v1454_v30 = vld [vmem:[%s1850_s1 + $0x38] sm:$0xff]   ;;  %v1126_v58 = vld [vmem:[%s1851_s2] ss:$0 sm:$0xff]  ;;  %p886_p8 = scmp.lt.s32.totalorder (%p1621_p4), %s885_s21, 8 }
  0x15   : > { %1228 = vmatpush3.bf16.msra.mxu0 %v1434_v10  ;;  %v1451_v27 = vld [vmem:[%s1850_s1 + $0xb0] sm:$0xff]   ;;  %v1455_v31 = vld [vmem:[%s1850_s1 + $0xb8] sm:$0xff]   ;;  %s1795_s25 = scalar_lea.vmem (%p1621_p4), %s1852_s3, %s1220_s22  }
  0x16   : > { %1268 = vmatpush3.bf16.msra.mxu1 %v1435_v11  ;;  %1229 = vmatprep.subr.bf16.mxu0 %v1436_v12  ;;  %s1723_s24 = scalar_lea.vmem %s1849_s0, %s1335_s7  ;;  %v1476_v44 = vld [vmem:[%s1850_s1 + $0x110] sm:$0xff]   ;;  %v1483_v45 = vld [vmem:[%s1850_s1 + $0x118] sm:$0xff]  }
  0x17   : > { %1269 = vmatprep.subr.bf16.mxu1 %v1437_v13  ;;  %v1456_v32 = vld [vmem:[%s1723_s24] ss:$20 sps:$4 sm:$0xff]   ;;  %v1458_v33 = vld [vmem:[%s1723_s24 + $0x4] ss:$20 sps:$4 sm:$0xff]   ;;  %v1459_v34 = vld [vmem:[%s1723_s24 + $0x8] ss:$20 sps:$4 sm:$0xff]  }
  0x18   : > { %v1461_v35 = vld [vmem:[%s1723_s24 + $0xc] ss:$20 sps:$4 sm:$0xff]   ;;  %665 = vmatprep.mubr.bf16.mxu0 %v1458_v33  ;;  %v1465_v38 = vld [vmem:[%s1723_s24 + $0x34] ss:$20 sps:$4 sm:$0xff]   ;;  %v1468_v41 = vld [vmem:[%s1723_s24 + $0x30] ss:$20 sps:$4 sm:$0xff]  }
  0x19   : > { %1230 = vmatpush3.bf16.msra.mxu0 %v1438_v14  ;;  %730 = vmatprep.mubr.bf16.mxu1 %v1461_v35  ;;  %v1463_v37 = vld [vmem:[%s1723_s24 + $0x2c] ss:$20 sps:$4 sm:$0xff]   ;;  %v1467_v40 = vld [vmem:[%s1723_s24 + $0x28] ss:$20 sps:$4 sm:$0xff]   ;;  %v1474_v46 = vld [vmem:[%s1723_s24 + $0x50] ss:$20 sps:$4 sm:$0xff]  }
  0x1a   : > { %1270 = vmatpush3.bf16.msra.mxu1 %v1439_v15  ;;  %1231 = vmatprep.subr.bf16.mxu0 %v1440_v16  ;;  %v1470_v42 = vld [vmem:[%s1723_s24 + $0x54] ss:$20 sps:$4 sm:$0xff]   ;;  %v1472_v43 = vld [vmem:[%s1723_s24 + $0x5c] ss:$20 sps:$4 sm:$0xff]   ;;  %v1475_v47 = vld [vmem:[%s1723_s24 + $0x58] ss:$20 sps:$4 sm:$0xff]  }
  0x1b   : > { %1271 = vmatprep.subr.bf16.mxu1 %v1441_v17  ;;  %v1477_v48 = vld [vmem:[%s1723_s24 + $0x7c] ss:$20 sps:$4 sm:$0xff]   ;;  %v1479_v49 = vld [vmem:[%s1723_s24 + $0x84] ss:$20 sps:$4 sm:$0xff]   ;;  %v1482_v51 = vld [vmem:[%s1723_s24 + $0x80] ss:$20 sps:$4 sm:$0xff]  }
  0x1c   : > { %v1481_v50 = vld [vmem:[%s1723_s24 + $0x78] ss:$20 sps:$4 sm:$0xff]   ;;  %v1484_v52 = vld [vmem:[%s1723_s24 + $0x10] ss:$20 sps:$4 sm:$0xff]   ;;  %v1485_v53 = vld [vmem:[%s1723_s24 + $0x60] ss:$20 sps:$4 sm:$0xff]  }
  0x1d   : > { %1232 = vmatpush3.bf16.msra.mxu0 %v1442_v18  ;;  %v1486_v54 = vld [vmem:[%s1723_s24 + $0x38] ss:$20 sps:$4 sm:$0xff]   ;;  %v1487_v55 = vld [vmem:[%s1723_s24 + $0x88] ss:$20 sps:$4 sm:$0xff]  }
  0x1e   : > { %1272 = vmatpush3.bf16.msra.mxu1 %v1443_v19  ;;  %1233 = vmatprep.subr.bf16.mxu0 %v1444_v20 }
  0x1f   : > { %1273 = vmatprep.subr.bf16.mxu1 %v1445_v21 }
  0x21   : > { %1234 = vmatpush3.bf16.msra.mxu0 %v1446_v22 }
  0x22   : > { %1274 = vmatpush3.bf16.msra.mxu1 %v1447_v23  ;;  %1235 = vmatprep.subr.bf16.mxu0 %v1448_v24 }
  0x23   : > { %1275 = vmatprep.subr.bf16.mxu1 %v1449_v25 }
  0x25   : > { %1236 = vmatpush3.bf16.msra.mxu0 %v1450_v26 }
  0x26   : > { %1276 = vmatpush3.bf16.msra.mxu1 %v1451_v27  ;;  %1237 = vmatprep.subr.bf16.mxu0 %v1452_v28 }
  0x27   : > { %1277 = vmatprep.subr.bf16.mxu1 %v1453_v29 }
  0x29   : > { %1238 = vmatpush3.bf16.msra.mxu0 %v1454_v30 }
  0x2a   : > { %1278 = vmatpush3.bf16.msra.mxu1 %v1455_v31  ;;  %1311 = vmatprep.subr.bf16.mxu0 %v1462_v36 }
  0x2b   : > { %1327 = vmatprep.subr.bf16.mxu1 %v1462_v36 }
  0x2c   : > { %666 = vmatmul.mubr.bf16.vlgmr.msra.gmra.mrb[0].mxu0 %v1456_v32 }
  0x2d   : > { %731 = vmatmul.mubr.bf16.vlgmr.msra.gmra.mrb[0].mxu1 %v1459_v34  ;;  %1312 = vmatpush3.bf16.msra.mxu0 %v1462_v36 }
  0x2e   : > { %1331 = vmatpush3.bf16.msra.mxu1 %v1462_v36  ;;  %673 = vmatprep.mubr.bf16.mxu0 %v1463_v37 }
  0x2f   : > { %738 = vmatprep.mubr.bf16.mxu1 %v1465_v38  ;;  %1313 = vmatprep.subr.bf16.mxu0 %v1469_v39 }
  0x30   : > { %1328 = vmatprep.subr.bf16.mxu1 %v1469_v39 }
  0x31   : > { %1314 = vmatpush3.bf16.msra.mxu0 %v1469_v39 }
  0x32   : > { %1332 = vmatpush3.bf16.msra.mxu1 %v1469_v39  ;;  %1315 = vmatprep.subr.bf16.mxu0 %v1476_v44 }
  0x33   : > { %1329 = vmatprep.subr.bf16.mxu1 %v1476_v44 }
  0x34   : > { %674 = vmatmul.mubr.bf16.gmra.mrb[4].mxu0 %v1467_v40 }
  0x35   : > { %739 = vmatmul.mubr.bf16.gmra.mrb[4].mxu1 %v1468_v41  ;;  %681 = vmatprep.mubr.bf16.mxu0 %v1470_v42 }
  0x36   : > { %746 = vmatprep.mubr.bf16.mxu1 %v1472_v43  ;;  %1316 = vmatpush3.bf16.msra.mxu0 %v1476_v44 }
  0x37   : > { %1333 = vmatpush3.bf16.msra.mxu1 %v1476_v44  ;;  %1317 = vmatprep.subr.bf16.mxu0 %v1483_v45 }
  0x38   : > { %1330 = vmatprep.subr.bf16.mxu1 %v1483_v45 }
  0x3a   : > { %1318 = vmatpush3.bf16.msra.mxu0 %v1483_v45 }
  0x3b   : > { %1334 = vmatpush3.bf16.msra.mxu1 %v1483_v45 }
  0x3c   : > { %682 = vmatmul.mubr.bf16.gmra.mrb[8].mxu0 %v1474_v46 }
  0x3d   : > { %747 = vmatmul.mubr.bf16.gmra.mrb[8].mxu1 %v1475_v47  ;;  %689 = vmatprep.mubr.bf16.mxu0 %v1477_v48 }
  0x3e   : > { %754 = vmatprep.mubr.bf16.mxu1 %v1479_v49 }
  0x44   : > { %690 = vmatmul.mubr.bf16.gmra.mrb[12].mxu0 %v1481_v50 }
  0x45   : > { %755 = vmatmul.mubr.bf16.gmra.mrb[12].mxu1 %v1482_v51  ;;  %1319 = vmatprep.mubr.msk.bf16.mxu0 %vm620_vm0, %v1484_v52 }
  0x46   : > { %1323 = vmatprep.mubr.msk.bf16.mxu1 %vm620_vm0, %v1485_v53 }
  0x4c   : > { %1320 = vmatmul.mubr.msk.bf16.vlgmr.msra.gmra.mrb[16].mxu0 %vm620_vm0, %v1486_v54 }
  0x4d   : > { %1324 = vmatmul.mubr.msk.bf16.vlgmr.msra.gmra.mrb[16].mxu1 %vm620_vm0, %v1487_v55 }
  0xff   : > { %v1239_v56 = vpop.f32.mrb[0].mxu0 }
 0x100   : > { %v1279_v57 = vpop.f32.mrb[0].mxu1  ;;  %v1240_v59 = vpop.f32.mrb[1].mxu0 }
 0x101   : > { %v1241_v60 = vadd.f32 %v1240_v59, %v1239_v56  ;;  %v1280_v61 = vpop.f32.mrb[1].mxu1  ;;  %v1242_v62 = vpop.f32.mrb[2].mxu0 }
 0x102   : > { %v1281_v63 = vadd.f32 %v1280_v61, %v1279_v57  ;;  %v1282_v0 = vpop.f32.mrb[2].mxu1  ;;  %v1243_v1 = vpop.f32.mrb[3].mxu0 }
 0x103   : > { %v668_v2 = vadd.f32 %v1241_v60, %v1126_v58  ;;  %v1244_v3 = vadd.f32 %v1243_v1, %v1242_v62  ;;  %v1283_v4 = vpop.f32.mrb[3].mxu1 }
 0x104   : > { %v1284_v5 = vadd.f32 %v1283_v4, %v1282_v0 }
 0x105   : > { %v671_v6 = vadd.f32 %v1244_v3, %v1126_v58  ;;  %v733_v7 = vadd.f32 %v1281_v63, %v668_v2 }
 0x107   : > { %v1245_v8 = vpop.f32.mrb[4].mxu0  ;;  %v1766_v9 = vadd.f32 %v1284_v5, %v671_v6 }
 0x108   : > { %v1285_v10 = vpop.f32.mrb[4].mxu1  ;;  %v1246_v11 = vpop.f32.mrb[5].mxu0 }
 0x109   : > { %v1247_v12 = vadd.f32 %v1246_v11, %v1245_v8  ;;  %v1286_v13 = vpop.f32.mrb[5].mxu1  ;;  %v1248_v14 = vpop.f32.mrb[6].mxu0 }
 0x10a   : > { %v1287_v15 = vadd.f32 %v1286_v13, %v1285_v10  ;;  %v1288_v16 = vpop.f32.mrb[6].mxu1  ;;  %v1249_v17 = vpop.f32.mrb[7].mxu0 }
 0x10b   : > { %v676_v18 = vadd.f32 %v1247_v12, %v1126_v58  ;;  %v1250_v19 = vadd.f32 %v1249_v17, %v1248_v14  ;;  %v1289_v20 = vpop.f32.mrb[7].mxu1 }
 0x10c   : > { %v1290_v21 = vadd.f32 %v1289_v20, %v1288_v16 }
 0x10d   : > { %v679_v22 = vadd.f32 %v1250_v19, %v1126_v58  ;;  %v741_v23 = vadd.f32 %v1287_v15, %v676_v18 }
 0x10f   : > { %v1251_v24 = vpop.f32.mrb[8].mxu0  ;;  %v744_v25 = vadd.f32 %v1290_v21, %v679_v22 }
 0x110   : > { %v1291_v26 = vpop.f32.mrb[8].mxu1  ;;  %v1252_v27 = vpop.f32.mrb[9].mxu0 }
 0x111   : > { %v1253_v28 = vadd.f32 %v1252_v27, %v1251_v24  ;;  %v1292_v29 = vpop.f32.mrb[9].mxu1  ;;  %v1254_v30 = vpop.f32.mrb[10].mxu0 }
 0x112   : > { %v1293_v31 = vadd.f32 %v1292_v29, %v1291_v26  ;;  %v1294_v32 = vpop.f32.mrb[10].mxu1  ;;  %v1255_v33 = vpop.f32.mrb[11].mxu0 }
 0x113   : > { %v684_v34 = vadd.f32 %v1253_v28, %v1126_v58  ;;  %v1256_v35 = vadd.f32 %v1255_v33, %v1254_v30  ;;  %v1295_v36 = vpop.f32.mrb[11].mxu1 }
 0x114   : > { %v1296_v37 = vadd.f32 %v1295_v36, %v1294_v32 }
 0x115   : > { %v687_v38 = vadd.f32 %v1256_v35, %v1126_v58  ;;  %v749_v39 = vadd.f32 %v1293_v31, %v684_v34 }
 0x117   : > { %v1257_v40 = vpop.f32.mrb[12].mxu0  ;;  %v752_v41 = vadd.f32 %v1296_v37, %v687_v38 }
 0x118   : > { %v1297_v42 = vpop.f32.mrb[12].mxu1  ;;  %v1258_v43 = vpop.f32.mrb[13].mxu0 }
 0x119   : > { %v1259_v44 = vadd.f32 %v1258_v43, %v1257_v40  ;;  %v1298_v45 = vpop.f32.mrb[13].mxu1  ;;  %v1260_v46 = vpop.f32.mrb[14].mxu0 }
 0x11a   : > { %v1299_v47 = vadd.f32 %v1298_v45, %v1297_v42  ;;  %v1300_v48 = vpop.f32.mrb[14].mxu1  ;;  %v1261_v49 = vpop.f32.mrb[15].mxu0 }
 0x11b   : > { %v692_v50 = vadd.f32 %v1259_v44, %v1126_v58  ;;  %v1262_v51 = vadd.f32 %v1261_v49, %v1260_v46  ;;  %v1301_v52 = vpop.f32.mrb[15].mxu1 }
 0x11c   : > { %v1302_v53 = vadd.f32 %v1301_v52, %v1300_v48 }
 0x11d   : > { %v695_v54 = vadd.f32 %v1262_v51, %v1126_v58  ;;  %v757_v55 = vadd.f32 %v1299_v47, %v692_v50 }
 0x11f   : > { %v1321_v56 = vpop.f32.mrb[16].mxu0  ;;  %v760_v57 = vadd.f32 %v1302_v53, %v695_v54 }
 0x120   : > { %v806_v59 = vadd.f32 %v1321_v56, %v741_v23  ;;  %v1325_v60 = vpop.f32.mrb[16].mxu1  ;;  %v797_v61 = vpop.f32.mrb[17].mxu0 }
 0x121   : > { %v822_v62 = vadd.f32 %v1325_v60, %v757_v55  ;;  %v798_v63 = vadd.f32 %v797_v61, %v733_v7  ;;  %v813_v0 = vpop.f32.mrb[17].mxu1  ;;  %v1322_v1 = vpop.f32.mrb[18].mxu0 }
 0x122   : > { %v830_v2 = vmax.f32 %v806_v59, 0.0  ;;  %v814_v3 = vadd.f32 %v813_v0, %v749_v39  ;;  %v809_v4 = vadd.f32 %v1322_v1, %v744_v25  ;;  %v1326_v5 = vpop.f32.mrb[18].mxu1  ;;  %v800_v6 = vpop.f32.mrb[19].mxu0 }
 0x123   : > { %v834_v8 = vmax.f32 %v822_v62, 0.0  ;;  %v828_v58 = vmax.f32 %v798_v63, 0.0  ;;  %v825_v10 = vadd.f32 %v1326_v5, %v760_v57  ;;  %v801_v11 = vadd.f32 %v800_v6, %v1766_v9  ;;  %v816_v12 = vpop.f32.mrb[19].mxu1 }
 0x124   : > { %v1214_v13 = vpack.c.bf16 %v830_v2, %v830_v2  ;;  %v832_v14 = vmax.f32 %v814_v3, 0.0  ;;  %v831_v15 = vmax.f32 %v809_v4, 0.0  ;;  %v817_v16 = vadd.f32 %v816_v12, %v752_v41  ;;  %883 = sbr.rel (!%p1621_p4) target bundleno = 353 (0x161), region = 36 }
 0x125   : > { %v1218_v17 = vpack.c.bf16 %v834_v8, %v834_v8  ;;  %v1212_v7 = vpack.c.bf16 %v828_v58, %v828_v58  ;;  %v835_v18 = vmax.f32 %v825_v10, 0.0  ;;  %v829_v19 = vmax.f32 %v801_v11, 0.0 }
 0x126   : > { %871 = vst.msk [vmem:[%s1770_s12 + $0x8] sm:$0xf] %vm868_vm1, %v1214_v13  ;;  %v1216_v9 = vpack.c.bf16 %v832_v14, %v832_v14  ;;  %v1215_v20 = vpack.c.bf16 %v831_v15, %v831_v15  ;;  %v833_v21 = vmax.f32 %v817_v16, 0.0 }
 0x127   : > { %875 = vst.msk [vmem:[%s1770_s12 + $0x18] sm:$0xf] %vm868_vm1, %v1218_v17  ;;  %869 = vst.msk [vmem:[%s1770_s12] sm:$0xf] %vm868_vm1, %v1212_v7  ;;  %v1219_v22 = vpack.c.bf16 %v835_v18, %v835_v18  ;;  %v1213_v23 = vpack.c.bf16 %v829_v19, %v829_v19 }
 0x128   : > { %873 = vst.msk [vmem:[%s1770_s12 + $0x10] sm:$0xf] %vm868_vm1, %v1216_v9  ;;  %872 = vst.msk [vmem:[%s1770_s12 + $0xc] sm:$0xf] %vm868_vm1, %v1215_v20  ;;  %v1217_v24 = vpack.c.bf16 %v833_v21, %v833_v21 }
 0x129   : > { %876 = vst.msk [vmem:[%s1770_s12 + $0x1c] sm:$0xf] %vm868_vm1, %v1219_v22  ;;  %870 = vst.msk [vmem:[%s1770_s12 + $0x4] sm:$0xf] %vm868_vm1, %v1213_v23 }
 0x12a   : > { %874 = vst.msk [vmem:[%s1770_s12 + $0x14] sm:$0xf] %vm868_vm1, %v1217_v24 }
 0x12b   : > { %s1861_s21 = smov (!%p886_p8, %s885_s21), 8 }
 0x12c   : > { %s1197_s26 = sshll.u32 %s1861_s21, 6 }
 0x12d   : > { %p1200_p9 = scmp.eq.s32.totalorder %s1197_s26, 0 }
 0x12e   : > { %s1801_s27 = sshrl.u32 (!%p1200_p9), %s1861_s21, 3 }
 0x12f   : > { %894 = sbr.rel (%p1200_p9) target bundleno = 353 (0x161), region = 40  ;;  %p1201_p10 = scmp.le.s32.totalorder (!%p1200_p9), %s1801_s27, 0 }
 0x136   : > { %1075 = sbr.rel (%p1201_p10) target bundleno = 332 (0x14c), region = 112  ;;  %s1854_s15 = smov (!%p1201_p10), %s1795_s25 }
 0x137   : > { %s1855_s20 = smov (!%p1201_p10), %s1770_s12  ;;  %s1810_s30 = smov (!%p1201_p10), 0  }
 0x138   : > { %s1812_s28 = smov (!%p1201_p10), 0  }
 0x13d LB: >> { %v910_v25 = vld [vmem:[%s1550_s20] sm:$0xf]  ;;  %v912_v26 = vld [vmem:[%s1550_s20 + $0x4] sm:$0xf]  ;;  %v914_v27 = vld [vmem:[%s1550_s20 + $0x8] sm:$0xf]  ;;  %s1558_s28 = sphi %s1812_s28, %s904_s28   ;;  %s1554_s30 = sphi %s1810_s30, %s1856_s30   ;;  %s1550_s20 = sphi %s1855_s20, %s931_s20   ;;  %s1546_s15 = sphi %s1854_s15, %s932_s15  }
 0x13e   : >> { %911 = vst [vmem:[%s1546_s15] sm:$0xf] %v910_v25  ;;  %913 = vst [vmem:[%s1546_s15 + $0x4] sm:$0xf] %v912_v26  ;;  %v916_v28 = vld [vmem:[%s1550_s20 + $0xc] sm:$0xf]  ;;  %s926_s29 = sadd.s32 1, %s1554_s30 }
 0x13f   : >> { %915 = vst [vmem:[%s1546_s15 + $0x8] sm:$0xf] %v914_v27  ;;  %v918_v29 = vld [vmem:[%s1550_s20 + $0x10] sm:$0xf]  ;;  %v920_v30 = vld [vmem:[%s1550_s20 + $0x14] sm:$0xf]  ;;  %p927_p11 = scmp.ge.s32.totalorder %s926_s29, %s1801_s27 }
 0x140   : >> { %917 = vst [vmem:[%s1546_s15 + $0xc] sm:$0xf] %v916_v28  ;;  %919 = vst [vmem:[%s1546_s15 + $0x10] sm:$0xf] %v918_v29  ;;  %v922_v31 = vld [vmem:[%s1550_s20 + $0x18] sm:$0xf] }
 0x141   : >> { %921 = vst [vmem:[%s1546_s15 + $0x14] sm:$0xf] %v920_v30  ;;  %v924_v32 = vld [vmem:[%s1550_s20 + $0x1c] sm:$0xf]  ;;  %923 = vst [vmem:[%s1546_s15 + $0x18] sm:$0xf] %v922_v31 }
 0x142   : >> { %925 = vst [vmem:[%s1546_s15 + $0x1c] sm:$0xf] %v924_v32  ;;  %s1863_s29 = smov (%p927_p11, %s926_s29), 0  ;;  %s904_s28 = sadd.s32 1, %s1558_s28  }
 0x143   : >> { %s1202_s4 = sshll.u32 %s1863_s29, 5  ;;  %p903_p12 = scmp.ge.s32.totalorder %s904_s28, %s1801_s27 }
 0x144   : >> { %s931_s20 = scalar_lea.vmem %s1770_s12, %s1202_s4 [#allocation2]   ;;  %s932_s15 = scalar_lea.vmem %s1795_s25, %s1202_s4  }
 0x145   : >> { %s1856_s30 = smov %s1863_s29  ;;  %906 = sbr.rel (!%p903_p12) target bundleno = 317 (0x13d), region = 118 }
 0x14c PF: > { %s1831_s5 = sand.u32 7, %s1861_s21   ;;  %s1221_s6 = sshll.u32 %s1801_s27, 5 }
 0x14d   : > { %s937_s7 = scalar_lea.vmem %s1770_s12, %s1221_s6 [#allocation2]   ;;  %s939_s8 = scalar_lea.vmem %s1795_s25, %s1221_s6  }
 0x14e   : > { %p1207_p13 = scmp.le.s32.totalorder %s1831_s5, 0 }
 0x14f   : > { %s1560_s9 = smov (!%p1207_p13), %s939_s8   ;;  %s1564_s10 = smov (!%p1207_p13), %s937_s7  }
 0x150   : > { %1089 = sbr.rel (%p1207_p13) target bundleno = 353 (0x161), region = 123  ;;  %s1568_s11 = smov (!%p1207_p13), 0  }
 0x151   : > { %s1572_s14 = smov (!%p1207_p13), 0  }
 0x157 LB: >> { %v949_v33 = vld [vmem:[%s1566_s10] sm:$0xf]  ;;  %s951_s17 = sadd.s32 1, %s1570_s11  ;;  %s943_s14 = sadd.s32 1, %s1574_s14   ;;  %s1574_s14 = sphi %s1572_s14, %s943_s14   ;;  %s1570_s11 = sphi %s1568_s11, %s1569_s11   ;;  %s1566_s10 = sphi %s1564_s10, %s956_s10   ;;  %s1562_s9 = sphi %s1560_s9, %s957_s9  }
 0x158   : >> { %950 = vst [vmem:[%s1562_s9] sm:$0xf] %v949_v33  ;;  %p952_p0 = scmp.ge.s32.totalorder %s951_s17, %s1831_s5  ;;  %p942_p1 = scmp.ge.s32.totalorder %s943_s14, %s1831_s5 }
 0x15a   : >> { %s1865_s17 = smov (%p952_p0, %s951_s17), 0  ;;  %945 = sbr.rel (!%p942_p1) target bundleno = 343 (0x157), region = 129 }
 0x15b   : >> { %s1208_s18 = sshll.u32 %s1865_s17, 2  ;;  %s1569_s11 = smov %s1865_s17  }
 0x15c   : >> { %s956_s10 = scalar_lea.vmem %s937_s7, %s1208_s18 [#allocation2]   ;;  %s957_s9 = scalar_lea.vmem %s939_s8, %s1208_s18  }
 0x161 PF: > { %p10_p2 = scmp.ge.s32.totalorder %s1611_s16, 4   ;;  %s1857_s12 = smov %s1538_s13 }
 0x162   : > { %s1858_s13 = smov %s1619_s19  ;;  %s1859_s14 = smov %s1611_s16 }
 0x163   :  { %12 = sbr.rel (!%p10_p2) target bundleno = 2 (0x2), region = 140 }

// kernel: dqn_forward.7
= control target key start
LH: loop header
LB: loop body
LE: loop exit
PB: predicated region body
PF: predicated region fallthrough
CT: control target
= control target key end

     0   :  { %v433_v28 = vlaneseq  ;;  %v13197_v36 = vmov 1966171168   ;;  %vm13199_vm0 = vmmov 0   ;;  %vm1790_vm1 = vcmask 523264   ;;  %s16050_s0 = inlined_call_operand.vmem [shape: bf16[2,3136], index: 0, kind: input, shape index: {}]   ;;  %s16051_s1 = inlined_call_operand.vmem [shape: bf16[4,3136,128], index: 1, kind: input, shape index: {}]   ;;  %s16052_s2 = inlined_call_operand.vmem [shape: f32[4,1,128], index: 2, kind: input, shape index: {}]   ;;  %s16053_s3 = inlined_call_operand.vmem [shape: bf16[4,128,128], index: 3, kind: input, shape index: {}]   ;;  %s16054_s4 = inlined_call_operand.vmem [shape: f32[1,128], index: 4, kind: input, shape index: {}]   ;;  %s16055_s5 = inlined_call_operand.hbm [shape: f32[2,128], index: 5, kind: output, shape index: {}]  }
   0x1   :  { %v12354_v0 = vld [vmem:[%s16051_s1 + $0x40] sm:$0xff]   ;;  %v12358_v4 = vld [vmem:[%s16051_s1 + $0x48] sm:$0xff]   ;;  %v12362_v8 = vld [vmem:[%s16051_s1 + $0x50] sm:$0xff]   ;;  %v431_v37 = vunpack.c.l.s4 %v13197_v36 }
   0x2   :  { %v12355_v1 = vld [vmem:[%s16051_s1 + $0xc0] sm:$0xff]   ;;  %11110 = vmatprep.subr.bf16.mxu0 %v12354_v0  ;;  %v12359_v5 = vld [vmem:[%s16051_s1 + $0xc8] sm:$0xff]   ;;  %v12363_v9 = vld [vmem:[%s16051_s1 + $0xd0] sm:$0xff]   ;;  %v434_v33 = vshrl.u32 %v433_v28, 7 }
   0x3   :  { %v12356_v2 = vld [vmem:[%s16051_s1] sm:$0xff]   ;;  %11132 = vmatprep.subr.bf16.mxu1 %v12355_v1  ;;  %v12360_v6 = vld [vmem:[%s16051_s1 + $0x8] sm:$0xff]   ;;  %v12364_v10 = vld [vmem:[%s16051_s1 + $0x10] sm:$0xff]   ;;  %v432_v39 = vunpack.c.0.s8 %v431_v37 }
   0x4   :  { %v12357_v3 = vld [vmem:[%s16051_s1 + $0x80] sm:$0xff]   ;;  %11111 = vmatpush3.bf16.msra.mxu0 %v12356_v2  ;;  %v12361_v7 = vld [vmem:[%s16051_s1 + $0x88] sm:$0xff]   ;;  %v12365_v11 = vld [vmem:[%s16051_s1 + $0x90] sm:$0xff]  }
   0x5   :  { %11133 = vmatpush3.bf16.msra.mxu1 %v12357_v3  ;;  %11112 = vmatprep.subr.bf16.mxu0 %v12358_v4  ;;  %v12366_v12 = vld [vmem:[%s16051_s1 + $0x58] sm:$0xff]   ;;  %v12370_v16 = vld [vmem:[%s16051_s1 + $0x60] sm:$0xff]   ;;  %v12374_v20 = vld [vmem:[%s16051_s1 + $0x68] sm:$0xff]   ;;  %v13336_v41 = vsub.s32 %v432_v39, %v434_v33 }
   0x6   :  { %11134 = vmatprep.subr.bf16.mxu1 %v12359_v5  ;;  %v12367_v13 = vld [vmem:[%s16051_s1 + $0xd8] sm:$0xff]   ;;  %v12371_v17 = vld [vmem:[%s16051_s1 + $0xe0] sm:$0xff]   ;;  %v12375_v21 = vld [vmem:[%s16051_s1 + $0xe8] sm:$0xff]  }
   0x7   :  { %v12368_v14 = vld [vmem:[%s16051_s1 + $0x18] sm:$0xff]   ;;  %v12372_v18 = vld [vmem:[%s16051_s1 + $0x20] sm:$0xff]   ;;  %v12376_v22 = vld [vmem:[%s16051_s1 + $0x28] sm:$0xff]  }
   0x8   :  { %11113 = vmatpush3.bf16.msra.mxu0 %v12360_v6  ;;  %v12369_v15 = vld [vmem:[%s16051_s1 + $0x98] sm:$0xff]   ;;  %v12373_v19 = vld [vmem:[%s16051_s1 + $0xa0] sm:$0xff]   ;;  %v12377_v23 = vld [vmem:[%s16051_s1 + $0xa8] sm:$0xff]  }
   0x9   :  { %11135 = vmatpush3.bf16.msra.mxu1 %v12361_v7  ;;  %11114 = vmatprep.subr.bf16.mxu0 %v12362_v8  ;;  %v12378_v24 = vld [vmem:[%s16051_s1 + $0x70] sm:$0xff]   ;;  %v12382_v29 = vld [vmem:[%s16051_s1 + $0x78] sm:$0xff]   ;;  %v22_v34 = vld [vmem:[%s16050_s0] sm:$0xff] }
   0xa   :  { %11136 = vmatprep.subr.bf16.mxu1 %v12363_v9  ;;  %v12379_v25 = vld [vmem:[%s16051_s1 + $0xf0] sm:$0xff]   ;;  %v12383_v30 = vld [vmem:[%s16051_s1 + $0xf8] sm:$0xff]   ;;  %v12386_v35 = vld [vmem:[%s16051_s1 + $0x140] sm:$0xff]   ;;  %v429_v40 = vcombine.high %v22_v34, %v22_v34  ;;  %v436_v42 = vrot.slane %v22_v34, %v13336_v41 }
   0xb   :  { %v12380_v26 = vld [vmem:[%s16051_s1 + $0x30] sm:$0xff]   ;;  %v12384_v31 = vld [vmem:[%s16051_s1 + $0x38] sm:$0xff]   ;;  %v12387_v38 = vld [vmem:[%s16051_s1 + $0x1c0] sm:$0xff]  }
   0xc   :  { %11115 = vmatpush3.bf16.msra.mxu0 %v12364_v10  ;;  %v12381_v27 = vld [vmem:[%s16051_s1 + $0xb0] sm:$0xff]   ;;  %v12385_v32 = vld [vmem:[%s16051_s1 + $0xb8] sm:$0xff]   ;;  %v13340_v43 = vrot.slane %v429_v40, %v13336_v41  ;;  %v444_v44 = vcombine.high %v436_v42, %v436_v42  ;;  %v13343_v45 = vrot.slane %v436_v42, %v13336_v41  ;;  %v12388_v48 = vld [vmem:[%s16051_s1 + $0x100] sm:$0xff]  }
   0xd   :  { %11137 = vmatpush3.bf16.msra.mxu1 %v12365_v11  ;;  %11116 = vmatprep.subr.bf16.mxu0 %v12366_v12  ;;  %v12390_v51 = vld [vmem:[%s16051_s1 + $0x148] sm:$0xff]   ;;  %v12389_v53 = vld [vmem:[%s16051_s1 + $0x180] sm:$0xff]   ;;  %v12394_v57 = vld [vmem:[%s16051_s1 + $0x150] sm:$0xff]  }
   0xe   :  { %11138 = vmatprep.subr.bf16.mxu1 %v12367_v13  ;;  %v445_v46 = vcombine.high %v13340_v43, %v13340_v43  ;;  %v13348_v47 = vrot.slane %v444_v44, %v13336_v41  ;;  %v13358_v50 = vcombine.high %v13343_v45, %v13343_v45  ;;  %v12391_v54 = vld [vmem:[%s16051_s1 + $0x1c8] sm:$0xff]   ;;  %v12395_v59 = vld [vmem:[%s16051_s1 + $0x1d0] sm:$0xff]   ;;  %v12398_v61 = vld [vmem:[%s16051_s1 + $0x158] sm:$0xff]  }
   0xf   :  { %v12392_v56 = vld [vmem:[%s16051_s1 + $0x108] sm:$0xff]   ;;  %v12396_v60 = vld [vmem:[%s16051_s1 + $0x110] sm:$0xff]   ;;  %v12399_v63 = vld [vmem:[%s16051_s1 + $0x1d8] sm:$0xff]  }
  0x10   :  { %11117 = vmatpush3.bf16.msra.mxu0 %v12368_v14  ;;  %v13354_v49 = vrot.slane %v445_v46, %v13336_v41  ;;  %1826 = vmatprep.mubr.bf16.mxu0 %v13348_v47  ;;  %v13366_v52 = vcombine.high %v13348_v47, %v13348_v47  ;;  %v12393_v58 = vld [vmem:[%s16051_s1 + $0x188] sm:$0xff]   ;;  %v12397_v62 = vld [vmem:[%s16051_s1 + $0x190] sm:$0xff]   ;;  %v12400_v0 = vld [vmem:[%s16051_s1 + $0x118] sm:$0xff]  }
  0x11   :  { %11139 = vmatpush3.bf16.msra.mxu1 %v12369_v15  ;;  %11118 = vmatprep.subr.bf16.mxu0 %v12370_v16  ;;  %v12402_v1 = vld [vmem:[%s16051_s1 + $0x160] sm:$0xff]   ;;  %v12401_v2 = vld [vmem:[%s16051_s1 + $0x198] sm:$0xff]   ;;  %v12406_v5 = vld [vmem:[%s16051_s1 + $0x168] sm:$0xff]  }
  0x12   :  { %11140 = vmatprep.subr.bf16.mxu1 %v12371_v17  ;;  %v13377_v55 = vcombine.high %v13354_v49, %v13354_v49  ;;  %1866 = vmatprep.mubr.bf16.mxu1 %v13366_v52  ;;  %v12403_v3 = vld [vmem:[%s16051_s1 + $0x1e0] sm:$0xff]   ;;  %v12407_v7 = vld [vmem:[%s16051_s1 + $0x1e8] sm:$0xff]   ;;  %v12410_v9 = vld [vmem:[%s16051_s1 + $0x170] sm:$0xff]   ;;  %v13460_v17 = vrot.slane %v13340_v43, %v13336_v41 }
  0x13   :  { %v12404_v4 = vld [vmem:[%s16051_s1 + $0x120] sm:$0xff]   ;;  %v12408_v8 = vld [vmem:[%s16051_s1 + $0x128] sm:$0xff]   ;;  %v12411_v11 = vld [vmem:[%s16051_s1 + $0x1f0] sm:$0xff]  }
  0x14   :  { %11119 = vmatpush3.bf16.msra.mxu0 %v12372_v18  ;;  %v12405_v6 = vld [vmem:[%s16051_s1 + $0x1a0] sm:$0xff]   ;;  %v12409_v10 = vld [vmem:[%s16051_s1 + $0x1a8] sm:$0xff]   ;;  %v12412_v12 = vld [vmem:[%s16051_s1 + $0x130] sm:$0xff]  }
  0x15   :  { %11141 = vmatpush3.bf16.msra.mxu1 %v12373_v19  ;;  %11120 = vmatprep.subr.bf16.mxu0 %v12374_v20  ;;  %v12414_v13 = vld [vmem:[%s16051_s1 + $0x178] sm:$0xff]   ;;  %v12413_v14 = vld [vmem:[%s16051_s1 + $0x1b0] sm:$0xff]   ;;  %v12419_v18 = vld [vmem:[%s16051_s1 + $0x240] sm:$0xff]  }
  0x16   :  { %11142 = vmatprep.subr.bf16.mxu1 %v12375_v21  ;;  %v12415_v15 = vld [vmem:[%s16051_s1 + $0x1f8] sm:$0xff]   ;;  %v12420_v20 = vld [vmem:[%s16051_s1 + $0x2c0] sm:$0xff]   ;;  %v12426_v28 = vld [vmem:[%s16051_s1 + $0x288] sm:$0xff]  }
  0x17   :  { %v12416_v16 = vld [vmem:[%s16051_s1 + $0x138] sm:$0xff]   ;;  %v12421_v21 = vld [vmem:[%s16051_s1 + $0x200] sm:$0xff]   ;;  %v12439_v39 = vld [vmem:[%s16051_s1 + $0x268] sm:$0xff]  }
  0x18   :  { %11121 = vmatpush3.bf16.msra.mxu0 %v12376_v22  ;;  %v12417_v19 = vld [vmem:[%s16051_s1 + $0x1b8] sm:$0xff]   ;;  %v13476_v22 = vcombine.high %v13460_v17, %v13460_v17  ;;  %v12436_v37 = vld [vmem:[%s16051_s1 + $0x2e0] sm:$0xff]   ;;  %v12440_v42 = vld [vmem:[%s16051_s1 + $0x2e8] sm:$0xff]  }
  0x19   :  { %11143 = vmatpush3.bf16.msra.mxu1 %v12377_v23  ;;  %11122 = vmatprep.subr.bf16.mxu0 %v12378_v24  ;;  %v12423_v23 = vld [vmem:[%s16051_s1 + $0x248] sm:$0xff]   ;;  %v12422_v24 = vld [vmem:[%s16051_s1 + $0x280] sm:$0xff]   ;;  %v12432_v33 = vld [vmem:[%s16051_s1 + $0x2d8] sm:$0xff]  }
  0x1a   :  { %11144 = vmatprep.subr.bf16.mxu1 %v12379_v25  ;;  %v12424_v25 = vld [vmem:[%s16051_s1 + $0x2c8] sm:$0xff]   ;;  %v12433_v34 = vld [vmem:[%s16051_s1 + $0x218] sm:$0xff]   ;;  %v12438_v40 = vld [vmem:[%s16051_s1 + $0x2a0] sm:$0xff]  }
  0x1b   :  { %v12434_v36 = vld [vmem:[%s16051_s1 + $0x298] sm:$0xff]   ;;  %v12441_v43 = vld [vmem:[%s16051_s1 + $0x228] sm:$0xff]   ;;  %v12443_v44 = vld [vmem:[%s16051_s1 + $0x270] sm:$0xff]  }
  0x1c   :  { %11123 = vmatpush3.bf16.msra.mxu0 %v12380_v26  ;;  %v12425_v26 = vld [vmem:[%s16051_s1 + $0x208] sm:$0xff]  }
  0x1d   :  { %11145 = vmatpush3.bf16.msra.mxu1 %v12381_v27  ;;  %11124 = vmatprep.subr.bf16.mxu0 %v12382_v29  ;;  %v12427_v27 = vld [vmem:[%s16051_s1 + $0x250] sm:$0xff]   ;;  %v23_v46 = vld [vmem:[%s16050_s0 + $0x8] sm:$0xff] }
  0x1e   :  { %11146 = vmatprep.subr.bf16.mxu1 %v12383_v30  ;;  %v12428_v29 = vld [vmem:[%s16051_s1 + $0x2d0] sm:$0xff]  }
  0x1f   :  { %v12429_v30 = vld [vmem:[%s16051_s1 + $0x210] sm:$0xff]  }
  0x20   :  { %11125 = vmatpush3.bf16.msra.mxu0 %v12384_v31  ;;  %v12431_v31 = vld [vmem:[%s16051_s1 + $0x258] sm:$0xff]  }
  0x21   :  { %11147 = vmatpush3.bf16.msra.mxu1 %v12385_v32  ;;  %11154 = vmatprep.subr.bf16.mxu0 %v12386_v35  ;;  %v12430_v32 = vld [vmem:[%s16051_s1 + $0x290] sm:$0xff]   ;;  %v12435_v35 = vld [vmem:[%s16051_s1 + $0x260] sm:$0xff]  }
  0x22   :  { %11176 = vmatprep.subr.bf16.mxu1 %v12387_v38  ;;  %v12437_v38 = vld [vmem:[%s16051_s1 + $0x220] sm:$0xff]  }
  0x23   :  { %1827 = vmatmul.mubr.bf16.vlgmr.msra.gmra.mrb[0].mxu0 %v13343_v45 }
  0x24   :  { %11155 = vmatpush3.bf16.msra.mxu0 %v12388_v48  ;;  %1867 = vmatmul.mubr.bf16.vlgmr.msra.gmra.mrb[0].mxu1 %v13358_v50  ;;  %v12442_v48 = vld [vmem:[%s16051_s1 + $0x2a8] sm:$0xff]  }
  0x25   :  { %11156 = vmatprep.subr.bf16.mxu0 %v12390_v51  ;;  %11177 = vmatpush3.bf16.msra.mxu1 %v12389_v53  ;;  %v485_v51 = vrot.slane %v23_v46, %v13336_v41  ;;  %v478_v53 = vcombine.high %v23_v46, %v23_v46  ;;  %v12486_v46 = vld [vmem:[%s16051_s1 + $0x400] sm:$0xff]  }
  0x26   :  { %1906 = vmatprep.mubr.bf16.mxu0 %v13354_v49  ;;  %11178 = vmatprep.subr.bf16.mxu1 %v12391_v54  ;;  %v12444_v54 = vld [vmem:[%s16051_s1 + $0x2f0] sm:$0xff]  }
  0x27   :  { %1946 = vmatprep.mubr.bf16.mxu1 %v13377_v55 }
  0x28   :  { %11157 = vmatpush3.bf16.msra.mxu0 %v12392_v56  ;;  %v12445_v56 = vld [vmem:[%s16051_s1 + $0x230] sm:$0xff]  }
  0x29   :  { %11158 = vmatprep.subr.bf16.mxu0 %v12394_v57  ;;  %11179 = vmatpush3.bf16.msra.mxu1 %v12393_v58  ;;  %v493_v57 = vcombine.high %v485_v51, %v485_v51  ;;  %v13557_v58 = vrot.slane %v478_v53, %v13336_v41  ;;  %v12487_v53 = vld [vmem:[%s16051_s1 + $0x480] sm:$0xff]  }
  0x2a   :  { %11180 = vmatprep.subr.bf16.mxu1 %v12395_v59  ;;  %v12447_v59 = vld [vmem:[%s16051_s1 + $0x278] sm:$0xff]  }
  0x2c   :  { %11159 = vmatpush3.bf16.msra.mxu0 %v12396_v60  ;;  %v12446_v60 = vld [vmem:[%s16051_s1 + $0x2b0] sm:$0xff]  }
  0x2d   :  { %11160 = vmatprep.subr.bf16.mxu0 %v12398_v61  ;;  %11181 = vmatpush3.bf16.msra.mxu1 %v12397_v62  ;;  %v13566_v61 = vrot.slane %v493_v57, %v13336_v41  ;;  %v494_v62 = vcombine.high %v13557_v58, %v13557_v58  ;;  %v12492_v57 = vld [vmem:[%s16051_s1 + $0x450] sm:$0xff]  }
  0x2e   :  { %11182 = vmatprep.subr.bf16.mxu1 %v12399_v63  ;;  %v12448_v63 = vld [vmem:[%s16051_s1 + $0x2f8] sm:$0xff]  }
  0x30   :  { %11161 = vmatpush3.bf16.msra.mxu0 %v12400_v0  ;;  %v12449_v0 = vld [vmem:[%s16051_s1 + $0x238] sm:$0xff]  }
  0x31   :  { %11162 = vmatprep.subr.bf16.mxu0 %v12402_v1  ;;  %11183 = vmatpush3.bf16.msra.mxu1 %v12401_v2  ;;  %v13579_v1 = vcombine.high %v13566_v61, %v13566_v61  ;;  %v13582_v2 = vrot.slane %v485_v51, %v13336_v41  ;;  %v12488_v51 = vld [vmem:[%s16051_s1 + $0x448] sm:$0xff]  }
  0x32   :  { %11184 = vmatprep.subr.bf16.mxu1 %v12403_v3  ;;  %v12451_v3 = vld [vmem:[%s16051_s1 + $0x340] sm:$0xff]  }
  0x34   :  { %11163 = vmatpush3.bf16.msra.mxu0 %v12404_v4  ;;  %v12450_v4 = vld [vmem:[%s16051_s1 + $0x2b8] sm:$0xff]  }
  0x35   :  { %11164 = vmatprep.subr.bf16.mxu0 %v12406_v5  ;;  %11185 = vmatpush3.bf16.msra.mxu1 %v12405_v6  ;;  %v13592_v5 = vrot.slane %v494_v62, %v13336_v41  ;;  %v12452_v6 = vld [vmem:[%s16051_s1 + $0x3c0] sm:$0xff]   ;;  %v12496_v62 = vld [vmem:[%s16051_s1 + $0x458] sm:$0xff]  }
  0x36   :  { %11186 = vmatprep.subr.bf16.mxu1 %v12407_v7  ;;  %v12453_v7 = vld [vmem:[%s16051_s1 + $0x300] sm:$0xff]  }
  0x38   :  { %11165 = vmatpush3.bf16.msra.mxu0 %v12408_v8  ;;  %v13602_v8 = vcombine.high %v13582_v2, %v13582_v2 }
  0x39   :  { %11166 = vmatprep.subr.bf16.mxu0 %v12410_v9  ;;  %11187 = vmatpush3.bf16.msra.mxu1 %v12409_v10  ;;  %v12455_v9 = vld [vmem:[%s16051_s1 + $0x348] sm:$0xff]   ;;  %v12454_v10 = vld [vmem:[%s16051_s1 + $0x380] sm:$0xff]  }
  0x3a   :  { %11188 = vmatprep.subr.bf16.mxu1 %v12411_v11  ;;  %v13612_v11 = vcombine.high %v13592_v5, %v13592_v5 }
  0x3c   :  { %11167 = vmatpush3.bf16.msra.mxu0 %v12412_v12  ;;  %v12456_v12 = vld [vmem:[%s16051_s1 + $0x3c8] sm:$0xff]  }
  0x3d   :  { %11168 = vmatprep.subr.bf16.mxu0 %v12414_v13  ;;  %11189 = vmatpush3.bf16.msra.mxu1 %v12413_v14  ;;  %v12457_v13 = vld [vmem:[%s16051_s1 + $0x308] sm:$0xff]   ;;  %v12459_v14 = vld [vmem:[%s16051_s1 + $0x350] sm:$0xff]  }
  0x3e   :  { %11190 = vmatprep.subr.bf16.mxu1 %v12415_v15  ;;  %v12458_v15 = vld [vmem:[%s16051_s1 + $0x388] sm:$0xff]  }
  0x40   :  { %11169 = vmatpush3.bf16.msra.mxu0 %v12416_v16  ;;  %v12460_v16 = vld [vmem:[%s16051_s1 + $0x3d0] sm:$0xff]  }
  0x41   :  { %11198 = vmatprep.subr.bf16.mxu0 %v12419_v18  ;;  %11191 = vmatpush3.bf16.msra.mxu1 %v12417_v19  ;;  %v12461_v18 = vld [vmem:[%s16051_s1 + $0x310] sm:$0xff]   ;;  %v12463_v19 = vld [vmem:[%s16051_s1 + $0x358] sm:$0xff]  }
  0x42   :  { %11220 = vmatprep.subr.bf16.mxu1 %v12420_v20  ;;  %v12462_v20 = vld [vmem:[%s16051_s1 + $0x390] sm:$0xff]  }
  0x43   :  { %1907 = vmatmul.mubr.bf16.vlgmr.msra.gmra.mrb[4].mxu0 %v13460_v17 }
  0x44   :  { %11199 = vmatpush3.bf16.msra.mxu0 %v12421_v21  ;;  %1947 = vmatmul.mubr.bf16.vlgmr.msra.gmra.mrb[4].mxu1 %v13476_v22  ;;  %v12464_v21 = vld [vmem:[%s16051_s1 + $0x3d8] sm:$0xff]  }
  0x45   :  { %11200 = vmatprep.subr.bf16.mxu0 %v12423_v23  ;;  %11221 = vmatpush3.bf16.msra.mxu1 %v12422_v24  ;;  %v12465_v23 = vld [vmem:[%s16051_s1 + $0x318] sm:$0xff]   ;;  %v12467_v24 = vld [vmem:[%s16051_s1 + $0x360] sm:$0xff]  }
  0x46   :  { %11222 = vmatprep.subr.bf16.mxu1 %v12424_v25  ;;  %1986 = vmatprep.mubr.bf16.mxu0 %v13566_v61  ;;  %v12466_v25 = vld [vmem:[%s16051_s1 + $0x398] sm:$0xff]  }
  0x47   :  { %2026 = vmatprep.mubr.bf16.mxu1 %v13579_v1 }
  0x48   :  { %11201 = vmatpush3.bf16.msra.mxu0 %v12425_v26  ;;  %v12468_v26 = vld [vmem:[%s16051_s1 + $0x3e0] sm:$0xff]  }
  0x49   :  { %11202 = vmatprep.subr.bf16.mxu0 %v12427_v27  ;;  %11223 = vmatpush3.bf16.msra.mxu1 %v12426_v28  ;;  %v12469_v27 = vld [vmem:[%s16051_s1 + $0x320] sm:$0xff]   ;;  %v12471_v28 = vld [vmem:[%s16051_s1 + $0x368] sm:$0xff]  }
  0x4a   :  { %11224 = vmatprep.subr.bf16.mxu1 %v12428_v29  ;;  %v12470_v29 = vld [vmem:[%s16051_s1 + $0x3a0] sm:$0xff]  }
  0x4c   :  { %11203 = vmatpush3.bf16.msra.mxu0 %v12429_v30  ;;  %v12472_v30 = vld [vmem:[%s16051_s1 + $0x3e8] sm:$0xff]  }
  0x4d   :  { %11204 = vmatprep.subr.bf16.mxu0 %v12431_v31  ;;  %11225 = vmatpush3.bf16.msra.mxu1 %v12430_v32  ;;  %v12473_v31 = vld [vmem:[%s16051_s1 + $0x328] sm:$0xff]   ;;  %v12475_v32 = vld [vmem:[%s16051_s1 + $0x370] sm:$0xff]  }
  0x4e   :  { %11226 = vmatprep.subr.bf16.mxu1 %v12432_v33  ;;  %v12474_v33 = vld [vmem:[%s16051_s1 + $0x3a8] sm:$0xff]  }
  0x50   :  { %11205 = vmatpush3.bf16.msra.mxu0 %v12433_v34  ;;  %v12476_v34 = vld [vmem:[%s16051_s1 + $0x3f0] sm:$0xff]  }
  0x51   :  { %11206 = vmatprep.subr.bf16.mxu0 %v12435_v35  ;;  %11227 = vmatpush3.bf16.msra.mxu1 %v12434_v36  ;;  %v12477_v35 = vld [vmem:[%s16051_s1 + $0x330] sm:$0xff]   ;;  %v12479_v36 = vld [vmem:[%s16051_s1 + $0x378] sm:$0xff]  }
  0x52   :  { %11228 = vmatprep.subr.bf16.mxu1 %v12436_v37  ;;  %v12478_v37 = vld [vmem:[%s16051_s1 + $0x3b0] sm:$0xff]  }
  0x54   :  { %11207 = vmatpush3.bf16.msra.mxu0 %v12437_v38  ;;  %v12480_v38 = vld [vmem:[%s16051_s1 + $0x3f8] sm:$0xff]  }
  0x55   :  { %11208 = vmatprep.subr.bf16.mxu0 %v12439_v39  ;;  %11229 = vmatpush3.bf16.msra.mxu1 %v12438_v40  ;;  %v12481_v39 = vld [vmem:[%s16051_s1 + $0x338] sm:$0xff]   ;;  %v13698_v40 = vrot.slane %v13557_v58, %v13336_v41  ;;  %v12491_v58 = vld [vmem:[%s16051_s1 + $0x488] sm:$0xff]  }
  0x56   :  { %11230 = vmatprep.subr.bf16.mxu1 %v12440_v42  ;;  %v12484_v42 = vld [vmem:[%s16051_s1 + $0x440] sm:$0xff]  }
  0x58   :  { %11209 = vmatpush3.bf16.msra.mxu0 %v12441_v43  ;;  %v12482_v43 = vld [vmem:[%s16051_s1 + $0x3b8] sm:$0xff]  }
  0x59   :  { %11210 = vmatprep.subr.bf16.mxu0 %v12443_v44  ;;  %11231 = vmatpush3.bf16.msra.mxu1 %v12442_v48  ;;  %v12485_v44 = vld [vmem:[%s16051_s1 + $0x4c0] sm:$0xff]   ;;  %v13714_v48 = vcombine.high %v13698_v40, %v13698_v40 }
  0x5a   :  { %11232 = vmatprep.subr.bf16.mxu1 %v12444_v54  ;;  %v12489_v54 = vld [vmem:[%s16051_s1 + $0x4c8] sm:$0xff]  }
  0x5c   :  { %11211 = vmatpush3.bf16.msra.mxu0 %v12445_v56  ;;  %v12490_v56 = vld [vmem:[%s16051_s1 + $0x408] sm:$0xff]  }
  0x5d   :  { %11212 = vmatprep.subr.bf16.mxu0 %v12447_v59  ;;  %11233 = vmatpush3.bf16.msra.mxu1 %v12446_v60  ;;  %v12493_v59 = vld [vmem:[%s16051_s1 + $0x4d0] sm:$0xff]  }
  0x5e   :  { %11234 = vmatprep.subr.bf16.mxu1 %v12448_v63  ;;  %v12494_v60 = vld [vmem:[%s16051_s1 + $0x410] sm:$0xff]  }
  0x5f   :  { %v12495_v63 = vld [vmem:[%s16051_s1 + $0x490] sm:$0xff]  }
  0x60   :  { %11213 = vmatpush3.bf16.msra.mxu0 %v12449_v0  ;;  %v12497_v0 = vld [vmem:[%s16051_s1 + $0x4d8] sm:$0xff]  }
  0x61   :  { %11242 = vmatprep.subr.bf16.mxu0 %v12451_v3  ;;  %11235 = vmatpush3.bf16.msra.mxu1 %v12450_v4  ;;  %v12498_v3 = vld [vmem:[%s16051_s1 + $0x418] sm:$0xff]   ;;  %v12500_v4 = vld [vmem:[%s16051_s1 + $0x460] sm:$0xff]  }
  0x62   :  { %11264 = vmatprep.subr.bf16.mxu1 %v12452_v6  ;;  %v12499_v6 = vld [vmem:[%s16051_s1 + $0x498] sm:$0xff]  }
  0x63   :  { %1987 = vmatmul.mubr.bf16.vlgmr.msra.gmra.mrb[8].mxu0 %v13582_v2 }
  0x64   :  { %11243 = vmatpush3.bf16.msra.mxu0 %v12453_v7  ;;  %2066 = vmatprep.mubr.bf16.mxu0 %v13592_v5  ;;  %v12501_v7 = vld [vmem:[%s16051_s1 + $0x4e0] sm:$0xff]  }
  0x65   :  { %2027 = vmatmul.mubr.bf16.vlgmr.msra.gmra.mrb[8].mxu1 %v13602_v8  ;;  %11244 = vmatprep.subr.bf16.mxu0 %v12455_v9  ;;  %v12502_v9 = vld [vmem:[%s16051_s1 + $0x420] sm:$0xff]  }
  0x66   :  { %11265 = vmatpush3.bf16.msra.mxu1 %v12454_v10  ;;  %2106 = vmatprep.mubr.bf16.mxu1 %v13612_v11  ;;  %v12504_v10 = vld [vmem:[%s16051_s1 + $0x468] sm:$0xff]  }
  0x67   :  { %11266 = vmatprep.subr.bf16.mxu1 %v12456_v12  ;;  %v12503_v12 = vld [vmem:[%s16051_s1 + $0x4a0] sm:$0xff]  }
  0x68   :  { %11245 = vmatpush3.bf16.msra.mxu0 %v12457_v13  ;;  %v12505_v13 = vld [vmem:[%s16051_s1 + $0x4e8] sm:$0xff]  }
  0x69   :  { %11246 = vmatprep.subr.bf16.mxu0 %v12459_v14  ;;  %v12506_v14 = vld [vmem:[%s16051_s1 + $0x428] sm:$0xff]  }
  0x6a   :  { %11267 = vmatpush3.bf16.msra.mxu1 %v12458_v15  ;;  %v12508_v15 = vld [vmem:[%s16051_s1 + $0x470] sm:$0xff]  }
  0x6b   :  { %11268 = vmatprep.subr.bf16.mxu1 %v12460_v16  ;;  %v24_v16 = vld [vmem:[%s16050_s0 + $0x10] sm:$0xff] }
  0x6c   :  { %11247 = vmatpush3.bf16.msra.mxu0 %v12461_v18  ;;  %v12507_v18 = vld [vmem:[%s16051_s1 + $0x4a8] sm:$0xff]  }
  0x6d   :  { %11248 = vmatprep.subr.bf16.mxu0 %v12463_v19  ;;  %v534_v19 = vrot.slane %v24_v16, %v13336_v41 }
  0x6e   :  { %11269 = vmatpush3.bf16.msra.mxu1 %v12462_v20  ;;  %v527_v20 = vcombine.high %v24_v16, %v24_v16  ;;  %v12544_v16 = vld [vmem:[%s16051_s1 + $0x578] sm:$0xff]  }
  0x6f   :  { %11270 = vmatprep.subr.bf16.mxu1 %v12464_v21  ;;  %v12509_v21 = vld [vmem:[%s16051_s1 + $0x4f0] sm:$0xff]  }
  0x70   :  { %11249 = vmatpush3.bf16.msra.mxu0 %v12465_v23  ;;  %v12510_v23 = vld [vmem:[%s16051_s1 + $0x430] sm:$0xff]  }
  0x71   :  { %11250 = vmatprep.subr.bf16.mxu0 %v12467_v24  ;;  %v542_v24 = vcombine.high %v534_v19, %v534_v19 }
  0x72   :  { %11271 = vmatpush3.bf16.msra.mxu1 %v12466_v25  ;;  %v13795_v25 = vrot.slane %v527_v20, %v13336_v41  ;;  %v12546_v20 = vld [vmem:[%s16051_s1 + $0x538] sm:$0xff]  }
  0x73   :  { %11272 = vmatprep.subr.bf16.mxu1 %v12468_v26  ;;  %v12512_v26 = vld [vmem:[%s16051_s1 + $0x478] sm:$0xff]  }
  0x74   :  { %11251 = vmatpush3.bf16.msra.mxu0 %v12469_v27  ;;  %v12511_v27 = vld [vmem:[%s16051_s1 + $0x4b0] sm:$0xff]  }
  0x75   :  { %11252 = vmatprep.subr.bf16.mxu0 %v12471_v28  ;;  %v13804_v28 = vrot.slane %v542_v24, %v13336_v41  ;;  %v12547_v24 = vld [vmem:[%s16051_s1 + $0x5b8] sm:$0xff]  }
  0x76   :  { %11273 = vmatpush3.bf16.msra.mxu1 %v12470_v29  ;;  %v543_v29 = vcombine.high %v13795_v25, %v13795_v25 }
  0x77   :  { %11274 = vmatprep.subr.bf16.mxu1 %v12472_v30  ;;  %v12513_v30 = vld [vmem:[%s16051_s1 + $0x4f8] sm:$0xff]  }
  0x78   :  { %11253 = vmatpush3.bf16.msra.mxu0 %v12473_v31  ;;  %v12514_v31 = vld [vmem:[%s16051_s1 + $0x438] sm:$0xff]  }
  0x79   :  { %11254 = vmatprep.subr.bf16.mxu0 %v12475_v32  ;;  %v13817_v32 = vcombine.high %v13804_v28, %v13804_v28 }
  0x7a   :  { %11275 = vmatpush3.bf16.msra.mxu1 %v12474_v33  ;;  %v13820_v33 = vrot.slane %v534_v19, %v13336_v41  ;;  %v12545_v19 = vld [vmem:[%s16051_s1 + $0x5f8] sm:$0xff]  }
  0x7b   :  { %11276 = vmatprep.subr.bf16.mxu1 %v12476_v34  ;;  %v12516_v34 = vld [vmem:[%s16051_s1 + $0x540] sm:$0xff]  }
  0x7c   :  { %11255 = vmatpush3.bf16.msra.mxu0 %v12477_v35  ;;  %v12515_v35 = vld [vmem:[%s16051_s1 + $0x4b8] sm:$0xff]  }
  0x7d   :  { %11256 = vmatprep.subr.bf16.mxu0 %v12479_v36  ;;  %v13830_v36 = vrot.slane %v543_v29, %v13336_v41  ;;  %v12549_v29 = vld [vmem:[%s16051_s1 + $0x600] sm:$0xff]  }
  0x7e   :  { %11277 = vmatpush3.bf16.msra.mxu1 %v12478_v37  ;;  %v12517_v37 = vld [vmem:[%s16051_s1 + $0x5c0] sm:$0xff]  }
  0x7f   :  { %11278 = vmatprep.subr.bf16.mxu1 %v12480_v38  ;;  %v12518_v38 = vld [vmem:[%s16051_s1 + $0x500] sm:$0xff]  }
  0x80   :  { %11257 = vmatpush3.bf16.msra.mxu0 %v12481_v39  ;;  %v13840_v39 = vcombine.high %v13820_v33, %v13820_v33 }
  0x81   :  { %11286 = vmatprep.subr.bf16.mxu0 %v12484_v42  ;;  %v12520_v42 = vld [vmem:[%s16051_s1 + $0x548] sm:$0xff]  }
  0x82   :  { %11279 = vmatpush3.bf16.msra.mxu1 %v12482_v43  ;;  %v12519_v43 = vld [vmem:[%s16051_s1 + $0x580] sm:$0xff]  }
  0x83   :  { %2067 = vmatmul.mubr.bf16.vlgmr.msra.gmra.mrb[12].mxu0 %v13698_v40  ;;  %11308 = vmatprep.subr.bf16.mxu1 %v12485_v44  ;;  %v13850_v44 = vcombine.high %v13830_v36, %v13830_v36 }
  0x84   :  { %11287 = vmatpush3.bf16.msra.mxu0 %v12486_v46  ;;  %2146 = vmatprep.mubr.bf16.mxu0 %v13804_v28  ;;  %v12521_v46 = vld [vmem:[%s16051_s1 + $0x5c8] sm:$0xff]  }
  0x85   :  { %2107 = vmatmul.mubr.bf16.vlgmr.msra.gmra.mrb[12].mxu1 %v13714_v48  ;;  %11288 = vmatprep.subr.bf16.mxu0 %v12488_v51  ;;  %v12522_v51 = vld [vmem:[%s16051_s1 + $0x508] sm:$0xff]  }
  0x86   :  { %11309 = vmatpush3.bf16.msra.mxu1 %v12487_v53  ;;  %2186 = vmatprep.mubr.bf16.mxu1 %v13817_v32  ;;  %v12524_v53 = vld [vmem:[%s16051_s1 + $0x550] sm:$0xff]  }
  0x87   :  { %11310 = vmatprep.subr.bf16.mxu1 %v12489_v54  ;;  %v12523_v54 = vld [vmem:[%s16051_s1 + $0x588] sm:$0xff]  }
  0x88   :  { %11289 = vmatpush3.bf16.msra.mxu0 %v12490_v56  ;;  %v12525_v56 = vld [vmem:[%s16051_s1 + $0x5d0] sm:$0xff]  }
  0x89   :  { %11290 = vmatprep.subr.bf16.mxu0 %v12492_v57  ;;  %v12526_v57 = vld [vmem:[%s16051_s1 + $0x510] sm:$0xff]  }
  0x8a   :  { %11311 = vmatpush3.bf16.msra.mxu1 %v12491_v58  ;;  %v12528_v58 = vld [vmem:[%s16051_s1 + $0x558] sm:$0xff]  }
  0x8b   :  { %11312 = vmatprep.subr.bf16.mxu1 %v12493_v59  ;;  %v12527_v59 = vld [vmem:[%s16051_s1 + $0x590] sm:$0xff]  }
  0x8c   :  { %11291 = vmatpush3.bf16.msra.mxu0 %v12494_v60  ;;  %v12529_v60 = vld [vmem:[%s16051_s1 + $0x5d8] sm:$0xff]  }
  0x8d   :  { %11292 = vmatprep.subr.bf16.mxu0 %v12496_v62  ;;  %v12530_v62 = vld [vmem:[%s16051_s1 + $0x518] sm:$0xff]  }
  0x8e   :  { %11313 = vmatpush3.bf16.msra.mxu1 %v12495_v63  ;;  %v12532_v63 = vld [vmem:[%s16051_s1 + $0x560] sm:$0xff]  }
  0x8f   :  { %11314 = vmatprep.subr.bf16.mxu1 %v12497_v0  ;;  %v12531_v0 = vld [vmem:[%s16051_s1 + $0x598] sm:$0xff]  }
  0x90   :  { %11293 = vmatpush3.bf16.msra.mxu0 %v12498_v3  ;;  %v12533_v3 = vld [vmem:[%s16051_s1 + $0x5e0] sm:$0xff]  }
  0x91   :  { %11294 = vmatprep.subr.bf16.mxu0 %v12500_v4  ;;  %v12534_v4 = vld [vmem:[%s16051_s1 + $0x520] sm:$0xff]  }
  0x92   :  { %11315 = vmatpush3.bf16.msra.mxu1 %v12499_v6  ;;  %v12536_v6 = vld [vmem:[%s16051_s1 + $0x568] sm:$0xff]  }
  0x93   :  { %11316 = vmatprep.subr.bf16.mxu1 %v12501_v7  ;;  %v12535_v7 = vld [vmem:[%s16051_s1 + $0x5a0] sm:$0xff]  }
  0x94   :  { %11295 = vmatpush3.bf16.msra.mxu0 %v12502_v9  ;;  %v12537_v9 = vld [vmem:[%s16051_s1 + $0x5e8] sm:$0xff]  }
  0x95   :  { %11296 = vmatprep.subr.bf16.mxu0 %v12504_v10  ;;  %v12538_v10 = vld [vmem:[%s16051_s1 + $0x528] sm:$0xff]  }
  0x96   :  { %11317 = vmatpush3.bf16.msra.mxu1 %v12503_v12  ;;  %v12540_v12 = vld [vmem:[%s16051_s1 + $0x570] sm:$0xff]  }
  0x97   :  { %11318 = vmatprep.subr.bf16.mxu1 %v12505_v13  ;;  %v12539_v13 = vld [vmem:[%s16051_s1 + $0x5a8] sm:$0xff]  }
  0x98   :  { %11297 = vmatpush3.bf16.msra.mxu0 %v12506_v14  ;;  %v12541_v14 = vld [vmem:[%s16051_s1 + $0x5f0] sm:$0xff]  }
  0x99   :  { %11298 = vmatprep.subr.bf16.mxu0 %v12508_v15  ;;  %v12542_v15 = vld [vmem:[%s16051_s1 + $0x530] sm:$0xff]  }
  0x9a   :  { %11319 = vmatpush3.bf16.msra.mxu1 %v12507_v18  ;;  %v12543_v18 = vld [vmem:[%s16051_s1 + $0x5b0] sm:$0xff]  }
  0x9b   :  { %11320 = vmatprep.subr.bf16.mxu1 %v12509_v21  ;;  %v13936_v21 = vrot.slane %v13795_v25, %v13336_v41  ;;  %v12559_v25 = vld [vmem:[%s16051_s1 + $0x6e8] sm:$0xff]  }
  0x9c   :  { %11299 = vmatpush3.bf16.msra.mxu0 %v12510_v23  ;;  %v12555_v23 = vld [vmem:[%s16051_s1 + $0x6e0] sm:$0xff]  }
  0x9d   :  { %11300 = vmatprep.subr.bf16.mxu0 %v12512_v26  ;;  %v12556_v26 = vld [vmem:[%s16051_s1 + $0x6a0] sm:$0xff]  }
  0x9e   :  { %11321 = vmatpush3.bf16.msra.mxu1 %v12511_v27  ;;  %v13949_v27 = vcombine.high %v13936_v21, %v13936_v21 }
  0x9f   :  { %11322 = vmatprep.subr.bf16.mxu1 %v12513_v30  ;;  %v13198_v30 = vmov 0.0  }
  0xa0   :  { %11301 = vmatpush3.bf16.msra.mxu0 %v12514_v31  ;;  %v12560_v31 = vld [vmem:[%s16051_s1 + $0x6a8] sm:$0xff]  }
  0xa1   :  { %11330 = vmatprep.subr.bf16.mxu0 %v12516_v34  ;;  %v12563_v34 = vld [vmem:[%s16051_s1 + $0x6f0] sm:$0xff]  }
  0xa2   :  { %11323 = vmatpush3.bf16.msra.mxu1 %v12515_v35  ;;  %v12550_v35 = vld [vmem:[%s16051_s1 + $0x608] sm:$0xff]  }
  0xa3   :  { %2147 = vmatmul.mubr.bf16.vlgmr.msra.gmra.mrb[16].mxu0 %v13820_v33  ;;  %11352 = vmatprep.subr.bf16.mxu1 %v12517_v37  ;;  %v12564_v37 = vld [vmem:[%s16051_s1 + $0x6b0] sm:$0xff]  }
  0xa4   :  { %11331 = vmatpush3.bf16.msra.mxu0 %v12518_v38  ;;  %2226 = vmatprep.mubr.bf16.mxu0 %v13830_v36  ;;  %v12567_v38 = vld [vmem:[%s16051_s1 + $0x6f8] sm:$0xff]  }
  0xa5   :  { %2187 = vmatmul.mubr.bf16.vlgmr.msra.gmra.mrb[16].mxu1 %v13840_v39  ;;  %11332 = vmatprep.subr.bf16.mxu0 %v12520_v42  ;;  %v12551_v42 = vld [vmem:[%s16051_s1 + $0x610] sm:$0xff]  }
  0xa6   :  { %11353 = vmatpush3.bf16.msra.mxu1 %v12519_v43  ;;  %2266 = vmatprep.mubr.bf16.mxu1 %v13850_v44  ;;  %v9058_v43 = vld.sshfl [vmem:[%s16050_s0 + $0x18] sm:$0x1 pattern:$0x75316420] }
  0xa7   :  { %11354 = vmatprep.subr.bf16.mxu1 %v12521_v46  ;;  %v12568_v46 = vld [vmem:[%s16051_s1 + $0x6b8] sm:$0xff]  }
  0xa8   :  { %11333 = vmatpush3.bf16.msra.mxu0 %v12522_v51  ;;  %v12571_v51 = vld [vmem:[%s16051_s1 + $0x700] sm:$0xff]  }
  0xa9   :  { %11334 = vmatprep.subr.bf16.mxu0 %v12524_v53  ;;  %v12552_v53 = vld [vmem:[%s16051_s1 + $0x618] sm:$0xff]  }
  0xaa   :  { %11355 = vmatpush3.bf16.msra.mxu1 %v12523_v54  ;;  %v12553_v54 = vld [vmem:[%s16051_s1 + $0x660] sm:$0xff]  }
  0xab   :  { %11356 = vmatprep.subr.bf16.mxu1 %v12525_v56  ;;  %v12572_v56 = vld [vmem:[%s16051_s1 + $0x6c0] sm:$0xff]  }
  0xac   :  { %11335 = vmatpush3.bf16.msra.mxu0 %v12526_v57  ;;  %v14003_v57 = vrot.slane %v9058_v43, %v13336_v41  ;;  %v12576_v41 = vld [vmem:[%s16051_s1 + $0x6c8] sm:$0xff]  }
  0xad   :  { %11336 = vmatprep.subr.bf16.mxu0 %v12528_v58  ;;  %v12575_v58 = vld [vmem:[%s16051_s1 + $0x708] sm:$0xff]  }
  0xae   :  { %11357 = vmatpush3.bf16.msra.mxu1 %v12527_v59  ;;  %v12554_v59 = vld [vmem:[%s16051_s1 + $0x620] sm:$0xff]   ;;  %v12607_v43 = vld [vmem:[%s16051_s1 + $0x808] sm:$0xff]  }
  0xaf   :  { %11358 = vmatprep.subr.bf16.mxu1 %v12529_v60  ;;  %v12557_v60 = vld [vmem:[%s16051_s1 + $0x668] sm:$0xff]  }
  0xb0   :  { %11337 = vmatpush3.bf16.msra.mxu0 %v12530_v62  ;;  %v12579_v62 = vld [vmem:[%s16051_s1 + $0x710] sm:$0xff]  }
  0xb1   :  { %11338 = vmatprep.subr.bf16.mxu0 %v12532_v63  ;;  %v12558_v63 = vld [vmem:[%s16051_s1 + $0x628] sm:$0xff]  }
  0xb2   :  { %11359 = vmatpush3.bf16.msra.mxu1 %v12531_v0  ;;  %v12561_v0 = vld [vmem:[%s16051_s1 + $0x670] sm:$0xff]  }
  0xb3   :  { %11360 = vmatprep.subr.bf16.mxu1 %v12533_v3  ;;  %v12580_v3 = vld [vmem:[%s16051_s1 + $0x6d0] sm:$0xff]  }
  0xb4   :  { %11339 = vmatpush3.bf16.msra.mxu0 %v12534_v4  ;;  %v12583_v4 = vld [vmem:[%s16051_s1 + $0x718] sm:$0xff]  }
  0xb5   :  { %11340 = vmatprep.subr.bf16.mxu0 %v12536_v6  ;;  %v12562_v6 = vld [vmem:[%s16051_s1 + $0x630] sm:$0xff]  }
  0xb6   :  { %11361 = vmatpush3.bf16.msra.mxu1 %v12535_v7  ;;  %v12565_v7 = vld [vmem:[%s16051_s1 + $0x678] sm:$0xff]  }
  0xb7   :  { %11362 = vmatprep.subr.bf16.mxu1 %v12537_v9  ;;  %v12584_v9 = vld [vmem:[%s16051_s1 + $0x6d8] sm:$0xff]  }
  0xb8   :  { %11341 = vmatpush3.bf16.msra.mxu0 %v12538_v10  ;;  %v12587_v10 = vld [vmem:[%s16051_s1 + $0x7e0] sm:$0xff]  }
  0xb9   :  { %11342 = vmatprep.subr.bf16.mxu0 %v12540_v12  ;;  %v12566_v12 = vld [vmem:[%s16051_s1 + $0x638] sm:$0xff]  }
  0xba   :  { %11363 = vmatpush3.bf16.msra.mxu1 %v12539_v13  ;;  %v12569_v13 = vld [vmem:[%s16051_s1 + $0x680] sm:$0xff]  }
  0xbb   :  { %11364 = vmatprep.subr.bf16.mxu1 %v12541_v14  ;;  %v12588_v14 = vld [vmem:[%s16051_s1 + $0x7a0] sm:$0xff]  }
  0xbc   :  { %11343 = vmatpush3.bf16.msra.mxu0 %v12542_v15  ;;  %v12591_v15 = vld [vmem:[%s16051_s1 + $0x7e8] sm:$0xff]  }
  0xbd   :  { %11344 = vmatprep.subr.bf16.mxu0 %v12544_v16  ;;  %v12570_v16 = vld [vmem:[%s16051_s1 + $0x640] sm:$0xff]  }
  0xbe   :  { %11365 = vmatpush3.bf16.msra.mxu1 %v12543_v18  ;;  %v12573_v18 = vld [vmem:[%s16051_s1 + $0x688] sm:$0xff]  }
  0xbf   :  { %11366 = vmatprep.subr.bf16.mxu1 %v12545_v19  ;;  %v12592_v19 = vld [vmem:[%s16051_s1 + $0x7a8] sm:$0xff]  }
  0xc0   :  { %11345 = vmatpush3.bf16.msra.mxu0 %v12546_v20  ;;  %v12595_v20 = vld [vmem:[%s16051_s1 + $0x7f0] sm:$0xff]  }
  0xc1   :  { %11401 = vmatprep.subr.bf16.mxu0 %v12555_v23  ;;  %v12574_v23 = vld [vmem:[%s16051_s1 + $0x648] sm:$0xff]  }
  0xc2   :  { %11367 = vmatpush3.bf16.msra.mxu1 %v12547_v24  ;;  %v12577_v24 = vld [vmem:[%s16051_s1 + $0x690] sm:$0xff]  }
  0xc3   :  { %2227 = vmatmul.mubr.bf16.vlgmr.msra.gmra.mrb[20].mxu0 %v13936_v21  ;;  %12222 = vmatprep.subr.bf16.mxu1 %v13198_v30 }
  0xc4   :  { %11402 = vmatpush3.bf16.msra.mxu0 %v12556_v26  ;;  %3981 = vmatprep.mubr.bf16.mxu0 %v13366_v52  ;;  %v12596_v26 = vld [vmem:[%s16051_s1 + $0x7b0] sm:$0xff]  }
  0xc5   :  { %2267 = vmatmul.mubr.bf16.vlgmr.msra.gmra.mrb[20].mxu1 %v13949_v27  ;;  %11403 = vmatprep.subr.bf16.mxu0 %v12559_v25  ;;  %v12599_v25 = vld [vmem:[%s16051_s1 + $0x7f8] sm:$0xff]  }
  0xc6   :  { %12223 = vmatpush3.bf16.msra.mxu1 %v12549_v29  ;;  %12230 = vmatprep.mubr.msk.bf16.mxu1 %vm13199_vm0, %v13198_v30  ;;  %v12578_v29 = vld [vmem:[%s16051_s1 + $0x650] sm:$0xff]  }
  0xc7   :  { %12224 = vmatprep.subr.bf16.mxu1 %v13198_v30 }
  0xc8   :  { %11404 = vmatpush3.bf16.msra.mxu0 %v12560_v31  ;;  %v12581_v31 = vld [vmem:[%s16051_s1 + $0x698] sm:$0xff]  }
  0xc9   :  { %11405 = vmatprep.subr.bf16.mxu0 %v12563_v34  ;;  %v12600_v34 = vld [vmem:[%s16051_s1 + $0x7b8] sm:$0xff]  }
  0xca   :  { %12225 = vmatpush3.bf16.msra.mxu1 %v12550_v35  ;;  %v12603_v35 = vld [vmem:[%s16051_s1 + $0x800] sm:$0xff]  }
  0xcb   :  { %12226 = vmatprep.subr.bf16.mxu1 %v13198_v30 }
  0xcc   :  { %11406 = vmatpush3.bf16.msra.mxu0 %v12564_v37  ;;  %v12582_v37 = vld [vmem:[%s16051_s1 + $0x658] sm:$0xff]  }
  0xcd   :  { %11407 = vmatprep.subr.bf16.mxu0 %v12567_v38  ;;  %v12585_v38 = vld [vmem:[%s16051_s1 + $0x760] sm:$0xff]  }
  0xce   :  { %12227 = vmatpush3.bf16.msra.mxu1 %v12551_v42  ;;  %v12604_v42 = vld [vmem:[%s16051_s1 + $0x7c0] sm:$0xff]  }
  0xcf   :  { %12228 = vmatprep.subr.bf16.mxu1 %v13198_v30 }
  0xd0   :  { %11408 = vmatpush3.bf16.msra.mxu0 %v12568_v46  ;;  %v12586_v46 = vld [vmem:[%s16051_s1 + $0x720] sm:$0xff]  }
  0xd1   :  { %11409 = vmatprep.subr.bf16.mxu0 %v12571_v51  ;;  %v12589_v51 = vld [vmem:[%s16051_s1 + $0x768] sm:$0xff]  }
  0xd2   :  { %12229 = vmatpush3.bf16.msra.mxu1 %v12552_v53  ;;  %v12608_v53 = vld [vmem:[%s16051_s1 + $0x7c8] sm:$0xff]  }
  0xd3   :  { %11379 = vmatprep.subr.bf16.mxu1 %v12553_v54  ;;  %v9057_v54 = vld [vmem:[%s16052_s2] ss:$0 sm:$0xff] }
  0xd4   :  { %11410 = vmatpush3.bf16.msra.mxu0 %v12572_v56  ;;  %v12611_v56 = vld [vmem:[%s16051_s1 + $0x810] sm:$0xff]  }
  0xd5   :  { %12231 = vmatmul.mubr.msk.bf16.vlgmr.msra.gmra.mrb[24].mxu1 %vm1790_vm1, %v14003_v57  ;;  %11411 = vmatprep.subr.bf16.mxu0 %v12575_v58 }
  0xd6   :  { %11380 = vmatpush3.bf16.msra.mxu1 %v12554_v59  ;;  %3941 = vmatprep.mubr.bf16.mxu1 %v13348_v47  ;;  %v12590_v59 = vld [vmem:[%s16051_s1 + $0x728] sm:$0xff]  }
  0xd7   :  { %11381 = vmatprep.subr.bf16.mxu1 %v12557_v60 }
  0xd8   :  { %11412 = vmatpush3.bf16.msra.mxu0 %v12576_v41  ;;  %v12593_v41 = vld [vmem:[%s16051_s1 + $0x770] sm:$0xff]  }
  0xd9   :  { %11413 = vmatprep.subr.bf16.mxu0 %v12579_v62 }
  0xda   :  { %11382 = vmatpush3.bf16.msra.mxu1 %v12558_v63 }
  0xdb   :  { %11383 = vmatprep.subr.bf16.mxu1 %v12561_v0  ;;  %v12594_v0 = vld [vmem:[%s16051_s1 + $0x730] sm:$0xff]  }
  0xdc   :  { %11414 = vmatpush3.bf16.msra.mxu0 %v12580_v3  ;;  %v12612_v3 = vld [vmem:[%s16051_s1 + $0x7d0] sm:$0xff]  }
  0xdd   :  { %11415 = vmatprep.subr.bf16.mxu0 %v12583_v4 }
  0xde   :  { %11384 = vmatpush3.bf16.msra.mxu1 %v12562_v6 }
  0xdf   :  { %11385 = vmatprep.subr.bf16.mxu1 %v12565_v7 }
  0xe0   :  { %11416 = vmatpush3.bf16.msra.mxu0 %v12584_v9 }
  0xe1   :  { %11445 = vmatprep.subr.bf16.mxu0 %v12587_v10 }
  0xe2   :  { %11386 = vmatpush3.bf16.msra.mxu1 %v12566_v12  ;;  %v12597_v12 = vld [vmem:[%s16051_s1 + $0x778] sm:$0xff]  }
  0xe3   :  { %11387 = vmatprep.subr.bf16.mxu1 %v12569_v13  ;;  %3982 = vmatmul.mubr.bf16.vlgmr.msra.gmra.mrb[24].mxu0 %v13358_v50  ;;  %v12615_v13 = vld [vmem:[%s16051_s1 + $0x818] sm:$0xff]  }
  0xe4   :  { %11446 = vmatpush3.bf16.msra.mxu0 %v12588_v14  ;;  %4061 = vmatprep.mubr.bf16.mxu0 %v13377_v55 }
  0xe5   :  { %11447 = vmatprep.subr.bf16.mxu0 %v12591_v15 }
  0xe6   :  { %11388 = vmatpush3.bf16.msra.mxu1 %v12570_v16  ;;  %v12616_v16 = vld [vmem:[%s16051_s1 + $0x7d8] sm:$0xff]  }
  0xe7   :  { %11389 = vmatprep.subr.bf16.mxu1 %v12573_v18 }
  0xe8   :  { %11448 = vmatpush3.bf16.msra.mxu0 %v12592_v19  ;;  %v12598_v19 = vld [vmem:[%s16051_s1 + $0x738] sm:$0xff]  }
  0xe9   :  { %11449 = vmatprep.subr.bf16.mxu0 %v12595_v20  ;;  %v12619_v20 = vld [vmem:[%s16051_s1 + $0x8e0] sm:$0xff]  }
  0xea   :  { %11390 = vmatpush3.bf16.msra.mxu1 %v12574_v23  ;;  %v12601_v23 = vld [vmem:[%s16051_s1 + $0x780] sm:$0xff]  }
  0xeb   :  { %11391 = vmatprep.subr.bf16.mxu1 %v12577_v24  ;;  %v12620_v24 = vld [vmem:[%s16051_s1 + $0x8a0] sm:$0xff]  }
  0xec   :  { %11450 = vmatpush3.bf16.msra.mxu0 %v12596_v26  ;;  %v12602_v26 = vld [vmem:[%s16051_s1 + $0x740] sm:$0xff]  }
  0xed   :  { %11451 = vmatprep.subr.bf16.mxu0 %v12599_v25  ;;  %v12623_v25 = vld [vmem:[%s16051_s1 + $0x8e8] sm:$0xff]  }
  0xee   :  { %11392 = vmatpush3.bf16.msra.mxu1 %v12578_v29  ;;  %v12605_v29 = vld [vmem:[%s16051_s1 + $0x788] sm:$0xff]  }
  0xef   :  { %11393 = vmatprep.subr.bf16.mxu1 %v12581_v31  ;;  %v12624_v31 = vld [vmem:[%s16051_s1 + $0x8a8] sm:$0xff]  }
  0xf0   :  { %11452 = vmatpush3.bf16.msra.mxu0 %v12600_v34  ;;  %v12606_v34 = vld [vmem:[%s16051_s1 + $0x748] sm:$0xff]  }
  0xf1   :  { %11453 = vmatprep.subr.bf16.mxu0 %v12603_v35  ;;  %v12627_v35 = vld [vmem:[%s16051_s1 + $0x8f0] sm:$0xff]  }
  0xf2   :  { %11394 = vmatpush3.bf16.msra.mxu1 %v12582_v37  ;;  %v12609_v37 = vld [vmem:[%s16051_s1 + $0x790] sm:$0xff]  }
  0xf3   :  { %11423 = vmatprep.subr.bf16.mxu1 %v12585_v38  ;;  %v12628_v38 = vld [vmem:[%s16051_s1 + $0x8b0] sm:$0xff]  }
  0xf4   :  { %11454 = vmatpush3.bf16.msra.mxu0 %v12604_v42  ;;  %v12610_v42 = vld [vmem:[%s16051_s1 + $0x750] sm:$0xff]  }
  0xf5   :  { %3942 = vmatmul.mubr.bf16.vlgmr.msra.gmra.mrb[28].mxu1 %v13343_v45  ;;  %11455 = vmatprep.subr.bf16.mxu0 %v12607_v43  ;;  %v12631_v43 = vld [vmem:[%s16051_s1 + $0x8f8] sm:$0xff]  }
  0xf6   :  { %11424 = vmatpush3.bf16.msra.mxu1 %v12586_v46  ;;  %v11126_v58 = vpop.f32.mrb[0].mxu0  ;;  %4021 = vmatprep.mubr.bf16.mxu1 %v13354_v49  ;;  %v12613_v46 = vld [vmem:[%s16051_s1 + $0x798] sm:$0xff]  }
  0xf7   :  { %v11127_v60 = vpop.f32.mrb[1].mxu0  ;;  %11425 = vmatprep.subr.bf16.mxu1 %v12589_v51  ;;  %v11148_v62 = vpop.f32.mrb[0].mxu1  ;;  %v12632_v51 = vld [vmem:[%s16051_s1 + $0x8b8] sm:$0xff]  }
  0xf8   :  { %v11128_v63 = vadd.f32 %v11127_v60, %v11126_v58  ;;  %11456 = vmatpush3.bf16.msra.mxu0 %v12608_v53  ;;  %v11149_v4 = vpop.f32.mrb[1].mxu1  ;;  %v11129_v6 = vpop.f32.mrb[2].mxu0  ;;  %v12614_v53 = vld [vmem:[%s16051_s1 + $0x758] sm:$0xff]   ;;  %v12636_v58 = vld [vmem:[%s16051_s1 + $0x8c0] sm:$0xff]   ;;  %v12639_v60 = vld [vmem:[%s16051_s1 + $0x908] sm:$0xff]  }
  0xf9   :  { %11457 = vmatprep.subr.bf16.mxu0 %v12611_v56  ;;  %v11150_v9 = vadd.f32 %v11149_v4, %v11148_v62  ;;  %v11151_v10 = vpop.f32.mrb[2].mxu1  ;;  %v11130_v14 = vpop.f32.mrb[3].mxu0  ;;  %v12617_v56 = vld [vmem:[%s16051_s1 + $0x860] sm:$0xff]   ;;  %v12640_v62 = vld [vmem:[%s16051_s1 + $0x8c8] sm:$0xff]   ;;  %v12625_v6 = vld [vmem:[%s16051_s1 + $0x870] sm:$0xff]  }
  0xfa   :  { %v1829_v7 = vadd.f32 %v11128_v63, %v9057_v54  ;;  %11426 = vmatpush3.bf16.msra.mxu1 %v12590_v59  ;;  %v11152_v15 = vpop.f32.mrb[3].mxu1  ;;  %v12635_v54 = vld [vmem:[%s16051_s1 + $0x900] sm:$0xff]   ;;  %v12622_v63 = vld [vmem:[%s16051_s1 + $0x828] sm:$0xff]   ;;  %v12644_v10 = vld [vmem:[%s16051_s1 + $0x8d0] sm:$0xff]  }
  0xfb   :  { %11427 = vmatprep.subr.bf16.mxu1 %v12593_v41  ;;  %v12618_v59 = vld [vmem:[%s16051_s1 + $0x820] sm:$0xff]   ;;  %v12621_v41 = vld [vmem:[%s16051_s1 + $0x868] sm:$0xff]   ;;  %v12647_v15 = vld [vmem:[%s16051_s1 + $0x918] sm:$0xff]  }
  0xfc   :  { %v14147_v18 = vadd.f32 %v11150_v9, %v1829_v7  ;;  %11458 = vmatpush3.bf16.msra.mxu0 %v12612_v3  ;;  %v12643_v3 = vld [vmem:[%s16051_s1 + $0x910] sm:$0xff]  }
  0xfd   :  { %11459 = vmatprep.subr.bf16.mxu0 %v12615_v13  ;;  %v12626_v13 = vld [vmem:[%s16051_s1 + $0x830] sm:$0xff]  }
  0xfe   :  { %11428 = vmatpush3.bf16.msra.mxu1 %v12594_v0 }
  0xff   :  { %11429 = vmatprep.subr.bf16.mxu1 %v12597_v12 }
 0x100   :  { %11460 = vmatpush3.bf16.msra.mxu0 %v12616_v16 }
 0x101   :  { %11489 = vmatprep.subr.bf16.mxu0 %v12619_v20 }
 0x102   :  { %11430 = vmatpush3.bf16.msra.mxu1 %v12598_v19 }
 0x103   :  { %11431 = vmatprep.subr.bf16.mxu1 %v12601_v23  ;;  %4062 = vmatmul.mubr.bf16.vlgmr.msra.gmra.mrb[28].mxu0 %v13476_v22 }
 0x104   :  { %11490 = vmatpush3.bf16.msra.mxu0 %v12620_v24  ;;  %4141 = vmatprep.mubr.bf16.mxu0 %v13579_v1 }
 0x105   :  { %11491 = vmatprep.subr.bf16.mxu0 %v12623_v25 }
 0x106   :  { %11432 = vmatpush3.bf16.msra.mxu1 %v12602_v26  ;;  %v12629_v26 = vld [vmem:[%s16051_s1 + $0x878] sm:$0xff]  }
 0x107   :  { %11433 = vmatprep.subr.bf16.mxu1 %v12605_v29  ;;  %v12648_v29 = vld [vmem:[%s16051_s1 + $0x8d8] sm:$0xff]  }
 0x108   :  { %11492 = vmatpush3.bf16.msra.mxu0 %v12624_v31  ;;  %v12651_v31 = vld [vmem:[%s16051_s1 + $0x9e0] sm:$0xff]  }
 0x109   :  { %11493 = vmatprep.subr.bf16.mxu0 %v12627_v35  ;;  %v12652_v35 = vld [vmem:[%s16051_s1 + $0x9a0] sm:$0xff]  }
 0x10a   :  { %11434 = vmatpush3.bf16.msra.mxu1 %v12606_v34  ;;  %v12633_v34 = vld [vmem:[%s16051_s1 + $0x880] sm:$0xff]  }
 0x10b   :  { %11435 = vmatprep.subr.bf16.mxu1 %v12609_v37  ;;  %v12634_v37 = vld [vmem:[%s16051_s1 + $0x840] sm:$0xff]  }
 0x10c   :  { %11494 = vmatpush3.bf16.msra.mxu0 %v12628_v38  ;;  %v12655_v38 = vld [vmem:[%s16051_s1 + $0x9e8] sm:$0xff]  }
 0x10d   :  { %11495 = vmatprep.subr.bf16.mxu0 %v12631_v43  ;;  %v12656_v43 = vld [vmem:[%s16051_s1 + $0x9a8] sm:$0xff]  }
 0x10e   :  { %11436 = vmatpush3.bf16.msra.mxu1 %v12610_v42  ;;  %v12637_v42 = vld [vmem:[%s16051_s1 + $0x888] sm:$0xff]  }
 0x10f   :  { %11437 = vmatprep.subr.bf16.mxu1 %v12613_v46  ;;  %v12638_v46 = vld [vmem:[%s16051_s1 + $0x848] sm:$0xff]  }
 0x110   :  { %11496 = vmatpush3.bf16.msra.mxu0 %v12632_v51  ;;  %v12659_v51 = vld [vmem:[%s16051_s1 + $0x9f0] sm:$0xff]  }
 0x111   :  { %11497 = vmatprep.subr.bf16.mxu0 %v12635_v54  ;;  %v12660_v54 = vld [vmem:[%s16051_s1 + $0x9b0] sm:$0xff]  }
 0x112   :  { %11438 = vmatpush3.bf16.msra.mxu1 %v12614_v53  ;;  %v12641_v53 = vld [vmem:[%s16051_s1 + $0x890] sm:$0xff]  }
 0x113   :  { %11467 = vmatprep.subr.bf16.mxu1 %v12617_v56  ;;  %v12642_v56 = vld [vmem:[%s16051_s1 + $0x850] sm:$0xff]  }
 0x114   :  { %11498 = vmatpush3.bf16.msra.mxu0 %v12636_v58  ;;  %v12663_v58 = vld [vmem:[%s16051_s1 + $0x9f8] sm:$0xff]  }
 0x115   :  { %4022 = vmatmul.mubr.bf16.vlgmr.msra.gmra.mrb[32].mxu1 %v13460_v17  ;;  %11499 = vmatprep.subr.bf16.mxu0 %v12639_v60  ;;  %v12664_v60 = vld [vmem:[%s16051_s1 + $0x9b8] sm:$0xff]  }
 0x116   :  { %11468 = vmatpush3.bf16.msra.mxu1 %v12618_v59  ;;  %v11170_v0 = vpop.f32.mrb[4].mxu0  ;;  %4101 = vmatprep.mubr.bf16.mxu1 %v13566_v61  ;;  %v12645_v59 = vld [vmem:[%s16051_s1 + $0x898] sm:$0xff]  }
 0x117   :  { %v11171_v4 = vpop.f32.mrb[5].mxu0  ;;  %11469 = vmatprep.subr.bf16.mxu1 %v12621_v41  ;;  %v11192_v7 = vpop.f32.mrb[4].mxu1  ;;  %v12646_v41 = vld [vmem:[%s16051_s1 + $0x858] sm:$0xff]  }
 0x118   :  { %v11172_v9 = vadd.f32 %v11171_v4, %v11170_v0  ;;  %11500 = vmatpush3.bf16.msra.mxu0 %v12640_v62  ;;  %v11193_v12 = vpop.f32.mrb[5].mxu1  ;;  %v11173_v14 = vpop.f32.mrb[6].mxu0  ;;  %v12667_v62 = vld [vmem:[%s16051_s1 + $0xa00] sm:$0xff]   ;;  %v12671_v4 = vld [vmem:[%s16051_s1 + $0xa08] sm:$0xff]  }
 0x119   :  { %11501 = vmatprep.subr.bf16.mxu0 %v12643_v3  ;;  %v11194_v19 = vadd.f32 %v11193_v12, %v11192_v7  ;;  %v11195_v20 = vpop.f32.mrb[6].mxu1  ;;  %v11174_v23 = vpop.f32.mrb[7].mxu0  ;;  %v12668_v0 = vld [vmem:[%s16051_s1 + $0x9c0] sm:$0xff]   ;;  %v12672_v7 = vld [vmem:[%s16051_s1 + $0x9c8] sm:$0xff]   ;;  %v12675_v12 = vld [vmem:[%s16051_s1 + $0xa10] sm:$0xff]  }
 0x11a   :  { %v1909_v16 = vadd.f32 %v11172_v9, %v14147_v18  ;;  %11470 = vmatpush3.bf16.msra.mxu1 %v12622_v63  ;;  %v11196_v24 = vpop.f32.mrb[7].mxu1  ;;  %v12630_v18 = vld [vmem:[%s16051_s1 + $0x838] sm:$0xff]   ;;  %v12649_v63 = vld [vmem:[%s16051_s1 + $0x960] sm:$0xff]   ;;  %v12654_v9 = vld [vmem:[%s16051_s1 + $0x928] sm:$0xff]  }
 0x11b   :  { %11471 = vmatprep.subr.bf16.mxu1 %v12625_v6  ;;  %v12650_v3 = vld [vmem:[%s16051_s1 + $0x920] sm:$0xff]   ;;  %v12653_v6 = vld [vmem:[%s16051_s1 + $0x968] sm:$0xff]   ;;  %v12657_v14 = vld [vmem:[%s16051_s1 + $0x970] sm:$0xff]  }
 0x11c   :  { %v14247_v25 = vadd.f32 %v11194_v19, %v1909_v16  ;;  %11502 = vmatpush3.bf16.msra.mxu0 %v12644_v10  ;;  %v12676_v19 = vld [vmem:[%s16051_s1 + $0x9d0] sm:$0xff]  }
 0x11d   :  { %11503 = vmatprep.subr.bf16.mxu0 %v12647_v15  ;;  %v12658_v23 = vld [vmem:[%s16051_s1 + $0x930] sm:$0xff]  }
 0x11e   :  { %11472 = vmatpush3.bf16.msra.mxu1 %v12626_v13 }
 0x11f   :  { %11473 = vmatprep.subr.bf16.mxu1 %v12629_v26  ;;  %v12679_v26 = vld [vmem:[%s16051_s1 + $0xa18] sm:$0xff]  }
 0x120   :  { %11504 = vmatpush3.bf16.msra.mxu0 %v12648_v29 }
 0x121   :  { %11533 = vmatprep.subr.bf16.mxu0 %v12651_v31 }
 0x122   :  { %11474 = vmatpush3.bf16.msra.mxu1 %v12630_v18 }
 0x123   :  { %11475 = vmatprep.subr.bf16.mxu1 %v12633_v34  ;;  %4142 = vmatmul.mubr.bf16.vlgmr.msra.gmra.mrb[32].mxu0 %v13602_v8 }
 0x124   :  { %11534 = vmatpush3.bf16.msra.mxu0 %v12652_v35  ;;  %4221 = vmatprep.mubr.bf16.mxu0 %v13612_v11 }
 0x125   :  { %11535 = vmatprep.subr.bf16.mxu0 %v12655_v38 }
 0x126   :  { %11476 = vmatpush3.bf16.msra.mxu1 %v12634_v37  ;;  %v12661_v37 = vld [vmem:[%s16051_s1 + $0x978] sm:$0xff]  }
 0x127   :  { %11477 = vmatprep.subr.bf16.mxu1 %v12637_v42  ;;  %v12680_v42 = vld [vmem:[%s16051_s1 + $0x9d8] sm:$0xff]  }
 0x128   :  { %11536 = vmatpush3.bf16.msra.mxu0 %v12656_v43  ;;  %v12683_v43 = vld [vmem:[%s16051_s1 + $0xae0] sm:$0xff]  }
 0x129   :  { %11537 = vmatprep.subr.bf16.mxu0 %v12659_v51  ;;  %v12684_v51 = vld [vmem:[%s16051_s1 + $0xaa0] sm:$0xff]  }
 0x12a   :  { %11478 = vmatpush3.bf16.msra.mxu1 %v12638_v46  ;;  %v12665_v46 = vld [vmem:[%s16051_s1 + $0x980] sm:$0xff]  }
 0x12b   :  { %11479 = vmatprep.subr.bf16.mxu1 %v12641_v53  ;;  %v12666_v53 = vld [vmem:[%s16051_s1 + $0x940] sm:$0xff]  }
 0x12c   :  { %11538 = vmatpush3.bf16.msra.mxu0 %v12660_v54  ;;  %v12687_v54 = vld [vmem:[%s16051_s1 + $0xae8] sm:$0xff]  }
 0x12d   :  { %11539 = vmatprep.subr.bf16.mxu0 %v12663_v58  ;;  %v12688_v58 = vld [vmem:[%s16051_s1 + $0xaa8] sm:$0xff]  }
 0x12e   :  { %11480 = vmatpush3.bf16.msra.mxu1 %v12642_v56  ;;  %v12669_v56 = vld [vmem:[%s16051_s1 + $0x988] sm:$0xff]  }
 0x12f   :  { %11481 = vmatprep.subr.bf16.mxu1 %v12645_v59  ;;  %v12670_v59 = vld [vmem:[%s16051_s1 + $0x948] sm:$0xff]  }
 0x130   :  { %11540 = vmatpush3.bf16.msra.mxu0 %v12664_v60  ;;  %v12691_v60 = vld [vmem:[%s16051_s1 + $0xaf0] sm:$0xff]  }
 0x131   :  { %11541 = vmatprep.subr.bf16.mxu0 %v12667_v62  ;;  %v12692_v62 = vld [vmem:[%s16051_s1 + $0xab0] sm:$0xff]  }
 0x132   :  { %11482 = vmatpush3.bf16.msra.mxu1 %v12646_v41  ;;  %v12673_v41 = vld [vmem:[%s16051_s1 + $0x990] sm:$0xff]  }
 0x133   :  { %11511 = vmatprep.subr.bf16.mxu1 %v12649_v63  ;;  %v12674_v63 = vld [vmem:[%s16051_s1 + $0x950] sm:$0xff]  }
 0x134   :  { %11542 = vmatpush3.bf16.msra.mxu0 %v12668_v0  ;;  %v12695_v0 = vld [vmem:[%s16051_s1 + $0xaf8] sm:$0xff]  }
 0x135   :  { %4102 = vmatmul.mubr.bf16.vlgmr.msra.gmra.mrb[36].mxu1 %v13582_v2  ;;  %11543 = vmatprep.subr.bf16.mxu0 %v12671_v4  ;;  %v12696_v4 = vld [vmem:[%s16051_s1 + $0xab8] sm:$0xff]  }
 0x136   :  { %11512 = vmatpush3.bf16.msra.mxu1 %v12650_v3  ;;  %v11214_v10 = vpop.f32.mrb[8].mxu0  ;;  %4181 = vmatprep.mubr.bf16.mxu1 %v13592_v5  ;;  %v12677_v3 = vld [vmem:[%s16051_s1 + $0x998] sm:$0xff]  }
 0x137   :  { %v11215_v13 = vpop.f32.mrb[9].mxu0  ;;  %11513 = vmatprep.subr.bf16.mxu1 %v12653_v6  ;;  %v12678_v6 = vld [vmem:[%s16051_s1 + $0x958] sm:$0xff]  }
 0x138   :  { %v11236_v15 = vpop.f32.mrb[8].mxu1  ;;  %v11216_v16 = vadd.f32 %v11215_v13, %v11214_v10  ;;  %11544 = vmatpush3.bf16.msra.mxu0 %v12672_v7  ;;  %v11217_v24 = vpop.f32.mrb[10].mxu0  ;;  %v12699_v7 = vld [vmem:[%s16051_s1 + $0xb00] sm:$0xff]   ;;  %v12703_v13 = vld [vmem:[%s16051_s1 + $0xb08] sm:$0xff]  }
 0x139   :  { %v11237_v20 = vpop.f32.mrb[9].mxu1  ;;  %11545 = vmatprep.subr.bf16.mxu0 %v12675_v12  ;;  %v11218_v34 = vpop.f32.mrb[11].mxu0  ;;  %v12700_v10 = vld [vmem:[%s16051_s1 + $0xac0] sm:$0xff]   ;;  %v12689_v24 = vld [vmem:[%s16051_s1 + $0xa70] sm:$0xff]  }
 0x13a   :  { %v1989_v29 = vadd.f32 %v11216_v16, %v14247_v25  ;;  %v11238_v18 = vadd.f32 %v11237_v20, %v11236_v15  ;;  %v11239_v31 = vpop.f32.mrb[10].mxu1  ;;  %11514 = vmatpush3.bf16.msra.mxu1 %v12654_v9  ;;  %v12662_v25 = vld [vmem:[%s16051_s1 + $0x938] sm:$0xff]   ;;  %v12681_v9 = vld [vmem:[%s16051_s1 + $0xa60] sm:$0xff]   ;;  %v12704_v15 = vld [vmem:[%s16051_s1 + $0xac8] sm:$0xff]  }
 0x13b   :  { %v11240_v35 = vpop.f32.mrb[11].mxu1  ;;  %11515 = vmatprep.subr.bf16.mxu1 %v12657_v14  ;;  %v12682_v12 = vld [vmem:[%s16051_s1 + $0xa20] sm:$0xff]   ;;  %v12685_v14 = vld [vmem:[%s16051_s1 + $0xa68] sm:$0xff]   ;;  %v12707_v20 = vld [vmem:[%s16051_s1 + $0xb10] sm:$0xff]  }
 0x13c   :  { %v14350_v38 = vadd.f32 %v11238_v18, %v1989_v29  ;;  %11546 = vmatpush3.bf16.msra.mxu0 %v12676_v19  ;;  %v12686_v16 = vld [vmem:[%s16051_s1 + $0xa28] sm:$0xff]   ;;  %v12690_v18 = vld [vmem:[%s16051_s1 + $0xa30] sm:$0xff]   ;;  %v12693_v35 = vld [vmem:[%s16051_s1 + $0xa78] sm:$0xff]  }
 0x13d   :  { %11547 = vmatprep.subr.bf16.mxu0 %v12679_v26  ;;  %v12708_v31 = vld [vmem:[%s16051_s1 + $0xad0] sm:$0xff]  }
 0x13e   :  { %11516 = vmatpush3.bf16.msra.mxu1 %v12658_v23 }
 0x13f   :  { %11517 = vmatprep.subr.bf16.mxu1 %v12661_v37 }
 0x140   :  { %11548 = vmatpush3.bf16.msra.mxu0 %v12680_v42 }
 0x141   :  { %11577 = vmatprep.subr.bf16.mxu0 %v12683_v43 }
 0x142   :  { %11518 = vmatpush3.bf16.msra.mxu1 %v12662_v25 }
 0x143   :  { %11519 = vmatprep.subr.bf16.mxu1 %v12665_v46  ;;  %4222 = vmatmul.mubr.bf16.vlgmr.msra.gmra.mrb[36].mxu0 %v13714_v48 }
 0x144   :  { %11578 = vmatpush3.bf16.msra.mxu0 %v12684_v51  ;;  %4301 = vmatprep.mubr.bf16.mxu0 %v13817_v32  ;;  %v12711_v51 = vld [vmem:[%s16051_s1 + $0xb18] sm:$0xff]  }
 0x145   :  { %11579 = vmatprep.subr.bf16.mxu0 %v12687_v54  ;;  %v12712_v54 = vld [vmem:[%s16051_s1 + $0xad8] sm:$0xff]  }
 0x146   :  { %11520 = vmatpush3.bf16.msra.mxu1 %v12666_v53 }
 0x147   :  { %11521 = vmatprep.subr.bf16.mxu1 %v12669_v56 }
 0x148   :  { %11580 = vmatpush3.bf16.msra.mxu0 %v12688_v58  ;;  %v12697_v58 = vld [vmem:[%s16051_s1 + $0xa80] sm:$0xff]  }
 0x149   :  { %11581 = vmatprep.subr.bf16.mxu0 %v12691_v60  ;;  %v12716_v60 = vld [vmem:[%s16051_s1 + $0xba0] sm:$0xff]  }
 0x14a   :  { %11522 = vmatpush3.bf16.msra.mxu1 %v12670_v59  ;;  %v12715_v59 = vld [vmem:[%s16051_s1 + $0xbe0] sm:$0xff]  }
 0x14b   :  { %11523 = vmatprep.subr.bf16.mxu1 %v12673_v41  ;;  %v12698_v41 = vld [vmem:[%s16051_s1 + $0xa40] sm:$0xff]  }
 0x14c   :  { %11582 = vmatpush3.bf16.msra.mxu0 %v12692_v62  ;;  %v12701_v62 = vld [vmem:[%s16051_s1 + $0xa88] sm:$0xff]  }
 0x14d   :  { %11583 = vmatprep.subr.bf16.mxu0 %v12695_v0  ;;  %v12720_v0 = vld [vmem:[%s16051_s1 + $0xba8] sm:$0xff]  }
 0x14e   :  { %11524 = vmatpush3.bf16.msra.mxu1 %v12674_v63  ;;  %v12719_v63 = vld [vmem:[%s16051_s1 + $0xbe8] sm:$0xff]  }
 0x14f   :  { %11525 = vmatprep.subr.bf16.mxu1 %v12677_v3  ;;  %v12702_v3 = vld [vmem:[%s16051_s1 + $0xa48] sm:$0xff]  }
 0x150   :  { %11584 = vmatpush3.bf16.msra.mxu0 %v12696_v4  ;;  %v12705_v4 = vld [vmem:[%s16051_s1 + $0xa90] sm:$0xff]  }
 0x151   :  { %11585 = vmatprep.subr.bf16.mxu0 %v12699_v7  ;;  %v12724_v7 = vld [vmem:[%s16051_s1 + $0xbb0] sm:$0xff]  }
 0x152   :  { %11526 = vmatpush3.bf16.msra.mxu1 %v12678_v6  ;;  %v12723_v6 = vld [vmem:[%s16051_s1 + $0xbf0] sm:$0xff]  }
 0x153   :  { %11555 = vmatprep.subr.bf16.mxu1 %v12681_v9  ;;  %v12706_v9 = vld [vmem:[%s16051_s1 + $0xa50] sm:$0xff]  }
 0x154   :  { %11586 = vmatpush3.bf16.msra.mxu0 %v12700_v10  ;;  %v12709_v10 = vld [vmem:[%s16051_s1 + $0xa98] sm:$0xff]  }
 0x155   :  { %4182 = vmatmul.mubr.bf16.vlgmr.msra.gmra.mrb[40].mxu1 %v13698_v40  ;;  %11587 = vmatprep.subr.bf16.mxu0 %v12703_v13  ;;  %v12728_v13 = vld [vmem:[%s16051_s1 + $0xbb8] sm:$0xff]  }
 0x156   :  { %11556 = vmatpush3.bf16.msra.mxu1 %v12682_v12  ;;  %v11258_v19 = vpop.f32.mrb[12].mxu0  ;;  %4261 = vmatprep.mubr.bf16.mxu1 %v13804_v28  ;;  %v12727_v12 = vld [vmem:[%s16051_s1 + $0xbf8] sm:$0xff]  }
 0x157   :  { %v11259_v23 = vpop.f32.mrb[13].mxu0  ;;  %11557 = vmatprep.subr.bf16.mxu1 %v12685_v14  ;;  %v12710_v14 = vld [vmem:[%s16051_s1 + $0xa58] sm:$0xff]  }
 0x158   :  { %v11280_v26 = vpop.f32.mrb[12].mxu1  ;;  %v11260_v29 = vadd.f32 %v11259_v23, %v11258_v19  ;;  %11588 = vmatpush3.bf16.msra.mxu0 %v12704_v15  ;;  %v11261_v43 = vpop.f32.mrb[14].mxu0  ;;  %v12713_v15 = vld [vmem:[%s16051_s1 + $0xb60] sm:$0xff]   ;;  %v12717_v23 = vld [vmem:[%s16051_s1 + $0xb68] sm:$0xff]  }
 0x159   :  { %v11281_v34 = vpop.f32.mrb[13].mxu1  ;;  %11589 = vmatprep.subr.bf16.mxu0 %v12707_v20  ;;  %v11262_v53 = vpop.f32.mrb[15].mxu0  ;;  %v12732_v19 = vld [vmem:[%s16051_s1 + $0xbc0] sm:$0xff]  }
 0x15a   :  { %v2069_v37 = vadd.f32 %v11260_v29, %v14350_v38  ;;  %v11282_v42 = vadd.f32 %v11281_v34, %v11280_v26  ;;  %v11283_v25 = vpop.f32.mrb[14].mxu1  ;;  %11558 = vmatpush3.bf16.msra.mxu1 %v12686_v16  ;;  %v12694_v38 = vld [vmem:[%s16051_s1 + $0xa38] sm:$0xff]   ;;  %v12731_v16 = vld [vmem:[%s16051_s1 + $0xc00] sm:$0xff]   ;;  %v12736_v26 = vld [vmem:[%s16051_s1 + $0xbc8] sm:$0xff]  }
 0x15b   :  { %v11284_v46 = vpop.f32.mrb[15].mxu1  ;;  %11559 = vmatprep.subr.bf16.mxu1 %v12689_v24  ;;  %v12714_v20 = vld [vmem:[%s16051_s1 + $0xb20] sm:$0xff]   ;;  %v12735_v24 = vld [vmem:[%s16051_s1 + $0xc08] sm:$0xff]   ;;  %v12740_v25 = vld [vmem:[%s16051_s1 + $0xbd0] sm:$0xff]  }
 0x15c   :  { %v14456_v56 = vadd.f32 %v11282_v42, %v2069_v37  ;;  %11590 = vmatpush3.bf16.msra.mxu0 %v12708_v31  ;;  %v12718_v29 = vld [vmem:[%s16051_s1 + $0xb28] sm:$0xff]   ;;  %v12721_v31 = vld [vmem:[%s16051_s1 + $0xb70] sm:$0xff]  }
 0x15d   :  { %11591 = vmatprep.subr.bf16.mxu0 %v12711_v51  ;;  %v12722_v46 = vld [vmem:[%s16051_s1 + $0xb30] sm:$0xff]  }
 0x15e   :  { %11560 = vmatpush3.bf16.msra.mxu1 %v12690_v18 }
 0x15f   :  { %11561 = vmatprep.subr.bf16.mxu1 %v12693_v35  ;;  %v12739_v35 = vld [vmem:[%s16051_s1 + $0xc10] sm:$0xff]  }
 0x160   :  { %11592 = vmatpush3.bf16.msra.mxu0 %v12712_v54 }
 0x161   :  { %11621 = vmatprep.subr.bf16.mxu0 %v12715_v59  ;;  %v12743_v59 = vld [vmem:[%s16051_s1 + $0xc18] sm:$0xff]  }
 0x162   :  { %11562 = vmatpush3.bf16.msra.mxu1 %v12694_v38  ;;  %v12725_v38 = vld [vmem:[%s16051_s1 + $0xb78] sm:$0xff]  }
 0x163   :  { %11563 = vmatprep.subr.bf16.mxu1 %v12697_v58  ;;  %4302 = vmatmul.mubr.bf16.vlgmr.msra.gmra.mrb[40].mxu0 %v13840_v39 }
 0x164   :  { %11622 = vmatpush3.bf16.msra.mxu0 %v12716_v60  ;;  %4381 = vmatprep.mubr.bf16.mxu0 %v13850_v44 }
 0x165   :  { %11623 = vmatprep.subr.bf16.mxu0 %v12719_v63  ;;  %v12726_v63 = vld [vmem:[%s16051_s1 + $0xb38] sm:$0xff]  }
 0x166   :  { %11564 = vmatpush3.bf16.msra.mxu1 %v12698_v41 }
 0x167   :  { %11565 = vmatprep.subr.bf16.mxu1 %v12701_v62 }
 0x168   :  { %11624 = vmatpush3.bf16.msra.mxu0 %v12720_v0  ;;  %v12729_v0 = vld [vmem:[%s16051_s1 + $0xb80] sm:$0xff]  }
 0x169   :  { %11625 = vmatprep.subr.bf16.mxu0 %v12723_v6  ;;  %v12734_v6 = vld [vmem:[%s16051_s1 + $0xb48] sm:$0xff]  }
 0x16a   :  { %11566 = vmatpush3.bf16.msra.mxu1 %v12702_v3  ;;  %v12730_v3 = vld [vmem:[%s16051_s1 + $0xb40] sm:$0xff]  }
 0x16b   :  { %11567 = vmatprep.subr.bf16.mxu1 %v12705_v4  ;;  %v12733_v4 = vld [vmem:[%s16051_s1 + $0xb88] sm:$0xff]  }
 0x16c   :  { %11626 = vmatpush3.bf16.msra.mxu0 %v12724_v7  ;;  %v12737_v7 = vld [vmem:[%s16051_s1 + $0xb90] sm:$0xff]  }
 0x16d   :  { %11627 = vmatprep.subr.bf16.mxu0 %v12727_v12  ;;  %v12742_v12 = vld [vmem:[%s16051_s1 + $0xb58] sm:$0xff]  }
 0x16e   :  { %11568 = vmatpush3.bf16.msra.mxu1 %v12706_v9  ;;  %v12738_v9 = vld [vmem:[%s16051_s1 + $0xb50] sm:$0xff]  }
 0x16f   :  { %11569 = vmatprep.subr.bf16.mxu1 %v12709_v10  ;;  %v12741_v10 = vld [vmem:[%s16051_s1 + $0xb98] sm:$0xff]  }
 0x170   :  { %11628 = vmatpush3.bf16.msra.mxu0 %v12728_v13  ;;  %v12745_v13 = vld [vmem:[%s16051_s1 + $0xc20] sm:$0xff]  }
 0x171   :  { %11629 = vmatprep.subr.bf16.mxu0 %v12731_v16 }
 0x172   :  { %11570 = vmatpush3.bf16.msra.mxu1 %v12710_v14 }
 0x173   :  { %11599 = vmatprep.subr.bf16.mxu1 %v12713_v15  ;;  %v12746_v15 = vld [vmem:[%s16051_s1 + $0xc28] sm:$0xff]  }
 0x174   :  { %11630 = vmatpush3.bf16.msra.mxu0 %v12732_v19 }
 0x175   :  { %4262 = vmatmul.mubr.bf16.vlgmr.msra.gmra.mrb[44].mxu1 %v13820_v33  ;;  %11631 = vmatprep.subr.bf16.mxu0 %v12735_v24 }
 0x176   :  { %11600 = vmatpush3.bf16.msra.mxu1 %v12714_v20  ;;  %v11302_v18 = vpop.f32.mrb[16].mxu0  ;;  %4341 = vmatprep.mubr.bf16.mxu1 %v13830_v36 }
 0x177   :  { %v11303_v34 = vpop.f32.mrb[17].mxu0  ;;  %11601 = vmatprep.subr.bf16.mxu1 %v12717_v23 }
 0x178   :  { %v11324_v37 = vpop.f32.mrb[16].mxu1  ;;  %v11304_v42 = vadd.f32 %v11303_v34, %v11302_v18  ;;  %11632 = vmatpush3.bf16.msra.mxu0 %v12736_v26  ;;  %v11305_v58 = vpop.f32.mrb[18].mxu0  ;;  %v12747_v34 = vld [vmem:[%s16051_s1 + $0xc30] sm:$0xff]  }
 0x179   :  { %v11325_v43 = vpop.f32.mrb[17].mxu1  ;;  %11633 = vmatprep.subr.bf16.mxu0 %v12739_v35  ;;  %v11306_v41 = vpop.f32.mrb[19].mxu0 }
 0x17a   :  { %v2149_v51 = vadd.f32 %v11304_v42, %v14456_v56  ;;  %v11326_v53 = vadd.f32 %v11325_v43, %v11324_v37  ;;  %v11327_v54 = vpop.f32.mrb[18].mxu1  ;;  %11602 = vmatpush3.bf16.msra.mxu1 %v12718_v29  ;;  %v12744_v56 = vld [vmem:[%s16051_s1 + $0xbd8] sm:$0xff]   ;;  %v12750_v43 = vld [vmem:[%s16053_s3 + $0x8] sm:$0xff]  }
 0x17b   :  { %v11328_v60 = vpop.f32.mrb[19].mxu1  ;;  %11603 = vmatprep.subr.bf16.mxu1 %v12721_v31  ;;  %v12748_v37 = vld [vmem:[%s16051_s1 + $0xc38] sm:$0xff]   ;;  %v12754_v41 = vld [vmem:[%s16053_s3 + $0x28] sm:$0xff]  }
 0x17c   :  { %v2189_v62 = vadd.f32 %v11326_v53, %v2149_v51  ;;  %11634 = vmatpush3.bf16.msra.mxu0 %v12740_v25  ;;  %v12749_v25 = vld [vmem:[%s16053_s3] sm:$0xff]  }
 0x17d   :  { %11635 = vmatprep.subr.bf16.mxu0 %v12743_v59  ;;  %v12752_v59 = vld [vmem:[%s16053_s3 + $0x18] sm:$0xff]   ;;  %v12753_v60 = vld [vmem:[%s16053_s3 + $0x20] sm:$0xff]  }
 0x17e   :  { %11604 = vmatpush3.bf16.msra.mxu1 %v12722_v46 }
 0x17f   :  { %11605 = vmatprep.subr.bf16.mxu1 %v12725_v38  ;;  %v12751_v38 = vld [vmem:[%s16053_s3 + $0x10] sm:$0xff]  }
 0x180   :  { %11636 = vmatpush3.bf16.msra.mxu0 %v12744_v56 }
 0x181   :  { %12246 = vmatprep.subr.bf16.mxu0 %v13198_v30 }
 0x182   :  { %11606 = vmatpush3.bf16.msra.mxu1 %v12726_v63  ;;  %v12755_v63 = vld [vmem:[%s16053_s3 + $0x30] sm:$0xff]  }
 0x183   :  { %11607 = vmatprep.subr.bf16.mxu1 %v12729_v0  ;;  %4382 = vmatmul.mubr.bf16.vlgmr.msra.gmra.mrb[44].mxu0 %v13949_v27 }
 0x184   :  { %12262 = vmatprep.mubr.msk.bf16.mxu0 %vm13199_vm0, %v13198_v30 }
 0x186   :  { %11608 = vmatpush3.bf16.msra.mxu1 %v12730_v3 }
 0x187   :  { %11609 = vmatprep.subr.bf16.mxu1 %v12733_v4 }
 0x18a   :  { %11610 = vmatpush3.bf16.msra.mxu1 %v12734_v6 }
 0x18b   :  { %11611 = vmatprep.subr.bf16.mxu1 %v12737_v7  ;;  %v12756_v7 = vld [vmem:[%s16053_s3 + $0x38] sm:$0xff]  }
 0x18e   :  { %11612 = vmatpush3.bf16.msra.mxu1 %v12738_v9 }
 0x18f   :  { %11613 = vmatprep.subr.bf16.mxu1 %v12741_v10  ;;  %v9649_v10 = vld [vmem:[%s16052_s2 + $0x1] ss:$0 sm:$0xff] }
 0x192   :  { %11614 = vmatpush3.bf16.msra.mxu1 %v12742_v12 }
 0x193   :  { %12234 = vmatprep.subr.bf16.mxu1 %v13198_v30 }
 0x195   :  { %4342 = vmatmul.mubr.bf16.vlgmr.msra.gmra.mrb[48].mxu1 %v13936_v21 }
 0x196   :  { %12235 = vmatpush3.bf16.msra.mxu1 %v12745_v13  ;;  %v11346_v14 = vpop.f32.mrb[20].mxu0  ;;  %12242 = vmatprep.mubr.msk.bf16.mxu1 %vm13199_vm0, %v13198_v30 }
 0x197   :  { %v11347_v16 = vpop.f32.mrb[21].mxu0  ;;  %12236 = vmatprep.subr.bf16.mxu1 %v13198_v30 }
 0x198   :  { %v11368_v19 = vpop.f32.mrb[20].mxu1  ;;  %v11348_v20 = vadd.f32 %v11347_v16, %v11346_v14  ;;  %v11349_v23 = vpop.f32.mrb[22].mxu0 }
 0x199   :  { %v11369_v24 = vpop.f32.mrb[21].mxu1  ;;  %v11350_v26 = vpop.f32.mrb[23].mxu0  ;;  %v12757_v23 = vld [vmem:[%s16053_s3 + $0x40] sm:$0xff]  }
 0x19a   :  { %v2229_v29 = vadd.f32 %v11348_v20, %v2189_v62  ;;  %v11370_v18 = vadd.f32 %v11369_v24, %v11368_v19  ;;  %v11371_v31 = vpop.f32.mrb[22].mxu1  ;;  %12237 = vmatpush3.bf16.msra.mxu1 %v12746_v15  ;;  %v12758_v24 = vld [vmem:[%s16053_s3 + $0x48] sm:$0xff]   ;;  %12247 = vmatpush3.bf16.msra.mxu0 %v12757_v23  ;;  %v12759_v26 = vld [vmem:[%s16053_s3 + $0x50] sm:$0xff]  }
 0x19b   :  { %v11372_v35 = vpop.f32.mrb[23].mxu1  ;;  %12238 = vmatprep.subr.bf16.mxu1 %v13198_v30  ;;  %12248 = vmatprep.subr.bf16.mxu0 %v13198_v30 }
 0x19c   :  { %v2269_v42 = vadd.f32 %v11370_v18, %v2229_v29 }
 0x19e   :  { %12239 = vmatpush3.bf16.msra.mxu1 %v12747_v34  ;;  %12249 = vmatpush3.bf16.msra.mxu0 %v12758_v24  ;;  %v12780_v24 = vld [vmem:[%s16051_s1 + $0xcd8] sm:$0xff]  }
 0x19f   :  { %12240 = vmatprep.subr.bf16.mxu1 %v13198_v30  ;;  %12250 = vmatprep.subr.bf16.mxu0 %v13198_v30 }
 0x1a2   :  { %12241 = vmatpush3.bf16.msra.mxu1 %v12748_v37  ;;  %12251 = vmatpush3.bf16.msra.mxu0 %v12759_v26 }
 0x1a3   :  { %12266 = vmatprep.subr.bf16.mxu1 %v13198_v30  ;;  %12252 = vmatprep.subr.bf16.mxu0 %v13198_v30 }
 0x1a5   :  { %12243 = vmatmul.mubr.msk.bf16.vlgmr.msra.gmra.mrb[52].mxu1 %vm1790_vm1, %v14003_v57 }
 0x1a6   :  { %12267 = vmatpush3.bf16.msra.mxu1 %v12749_v25  ;;  %12282 = vmatprep.mubr.msk.bf16.mxu1 %vm13199_vm0, %v13198_v30  ;;  %v12760_v25 = vld [vmem:[%s16053_s3 + $0x58] sm:$0xff]  }
 0x1a7   :  { %12268 = vmatprep.subr.bf16.mxu1 %v13198_v30  ;;  %12253 = vmatpush3.bf16.msra.mxu0 %v12760_v25 }
 0x1a8   :  { %v2308_v46 = vpop.f32.mrb[24].mxu1  ;;  %12254 = vmatprep.subr.bf16.mxu0 %v13198_v30 }
 0x1a9   :  { %v2309_v51 = vadd.f32 %v2308_v46, %v2269_v42  ;;  %v12232_v53 = vpop.f32.mrb[25].mxu1 }
 0x1aa   :  { %v2311_v54 = vpop.f32.mrb[26].mxu1  ;;  %12269 = vmatpush3.bf16.msra.mxu1 %v12750_v43 }
 0x1ab   :  { %v12233_v58 = vpop.f32.mrb[27].mxu1  ;;  %12270 = vmatprep.subr.bf16.mxu1 %v13198_v30  ;;  %v2314_v4 = vmax.f32 %v2309_v51, 0.0  ;;  %v12761_v54 = vld [vmem:[%s16053_s3 + $0x60] sm:$0xff]  }
 0x1ac   :  { %12255 = vmatpush3.bf16.msra.mxu0 %v12761_v54  ;;  %v12796_v54 = vld [vmem:[%s16051_s1 + $0xcf8] sm:$0xff]  }
 0x1ad   :  { %v2315_v9 = vpack.c.bf16 %v2314_v4, %v2314_v4  ;;  %12256 = vmatprep.subr.bf16.mxu0 %v13198_v30  ;;  %v12767_v4 = vld [vmem:[%s16051_s1 + $0xd00] sm:$0xff]  }
 0x1ae   :  { %12271 = vmatpush3.bf16.msra.mxu1 %v12751_v38  ;;  %v12762_v38 = vld [vmem:[%s16053_s3 + $0x68] sm:$0xff]  }
 0x1af   :  { %12272 = vmatprep.subr.bf16.mxu1 %v13198_v30 }
 0x1b0   :  { %12257 = vmatpush3.bf16.msra.mxu0 %v12762_v38  ;;  %v12799_v38 = vld [vmem:[%s16051_s1 + $0xe00] sm:$0xff]  }
 0x1b1   :  { %12258 = vmatprep.subr.bf16.mxu0 %v13198_v30 }
 0x1b2   :  { %12273 = vmatpush3.bf16.msra.mxu1 %v12752_v59  ;;  %v12763_v59 = vld [vmem:[%s16053_s3 + $0x70] sm:$0xff]  }
 0x1b3   :  { %12274 = vmatprep.subr.bf16.mxu1 %v13198_v30 }
 0x1b4   :  { %12259 = vmatpush3.bf16.msra.mxu0 %v12763_v59  ;;  %v12803_v59 = vld [vmem:[%s16051_s1 + $0xe08] sm:$0xff]  }
 0x1b5   :  { %12260 = vmatprep.subr.bf16.mxu0 %v13198_v30 }
 0x1b6   :  { %12275 = vmatpush3.bf16.msra.mxu1 %v12753_v60  ;;  %v11417_v62 = vpop.f32.mrb[24].mxu0 }
 0x1b7   :  { %12276 = vmatprep.subr.bf16.mxu1 %v13198_v30  ;;  %v11418_v56 = vpop.f32.mrb[25].mxu0 }
 0x1b8   :  { %v11419_v0 = vadd.f32 %v11418_v56, %v11417_v62  ;;  %v11420_v3 = vpop.f32.mrb[26].mxu0 }
 0x1b9   :  { %v11421_v6 = vpop.f32.mrb[27].mxu0  ;;  %v12765_v3 = vld [vmem:[%s16051_s1 + $0xc80] sm:$0xff]  }
 0x1ba   :  { %12277 = vmatpush3.bf16.msra.mxu1 %v12754_v41  ;;  %v12768_v6 = vld [vmem:[%s16051_s1 + $0xcc0] sm:$0xff]  }
 0x1bb   :  { %12278 = vmatprep.subr.bf16.mxu1 %v13198_v30 }
 0x1be   :  { %12279 = vmatpush3.bf16.msra.mxu1 %v12755_v63 }
 0x1bf   :  { %12280 = vmatprep.subr.bf16.mxu1 %v13198_v30 }
 0x1c2   :  { %12281 = vmatpush3.bf16.msra.mxu1 %v12756_v7  ;;  %v12771_v7 = vld [vmem:[%s16051_s1 + $0xd08] sm:$0xff]  }
 0x1c3   :  { %11688 = vmatprep.subr.bf16.mxu1 %v12767_v4 }
 0x1c5   :  { %12283 = vmatmul.mubr.bf16.vlgmr.msra.gmra.mrb[56].mxu1 %v2315_v9  ;;  %v12772_v9 = vld [vmem:[%s16051_s1 + $0xcc8] sm:$0xff]  }
 0x1c6   :  { %6273 = vmatprep.mubr.bf16.mxu1 %v13366_v52  ;;  %11689 = vmatpush3.bf16.msra.mxu1 %v12768_v6  ;;  %v12811_v6 = vld [vmem:[%s16051_s1 + $0xe18] sm:$0xff]  }
 0x1c7   :  { %11690 = vmatprep.subr.bf16.mxu1 %v12771_v7 }
 0x1c8   :  { %v11395_v12 = vpop.f32.mrb[28].mxu1 }
 0x1c9   :  { %v11396_v13 = vpop.f32.mrb[29].mxu1 }
 0x1ca   :  { %v11397_v14 = vadd.f32 %v11396_v13, %v11395_v12  ;;  %v11398_v15 = vpop.f32.mrb[30].mxu1  ;;  %11691 = vmatpush3.bf16.msra.mxu1 %v12772_v9  ;;  %v12776_v13 = vld [vmem:[%s16051_s1 + $0xcd0] sm:$0xff]   ;;  %v12812_v9 = vld [vmem:[%s16051_s1 + $0xdd8] sm:$0xff]  }
 0x1cb   :  { %v11399_v16 = vpop.f32.mrb[31].mxu1 }
 0x1cc   :  { %v3944_v19 = vadd.f32 %v11397_v14, %v9649_v10  ;;  %v12775_v10 = vld [vmem:[%s16051_s1 + $0xd10] sm:$0xff]  }
 0x1cd   :  { %11692 = vmatprep.subr.bf16.mxu1 %v12775_v10 }
 0x1ce   :  { %v3984_v20 = vadd.f32 %v11419_v0, %v3944_v19  ;;  %v12764_v0 = vld [vmem:[%s16053_s3 + $0x78] sm:$0xff]   ;;  %11693 = vmatpush3.bf16.msra.mxu1 %v12776_v13  ;;  %v12816_v13 = vld [vmem:[%s16051_s1 + $0xde0] sm:$0xff]  }
 0x1cf   :  { %12261 = vmatpush3.bf16.msra.mxu0 %v12764_v0 }
 0x1d0   :  { %11666 = vmatprep.subr.bf16.mxu0 %v12765_v3 }
 0x1d6   :  { %v11461_v29 = vpop.f32.mrb[28].mxu0 }
 0x1d7   :  { %v11462_v18 = vpop.f32.mrb[29].mxu0 }
 0x1d8   :  { %v11463_v31 = vadd.f32 %v11462_v18, %v11461_v29  ;;  %v11464_v34 = vpop.f32.mrb[30].mxu0  ;;  %v12783_v29 = vld [vmem:[%s16051_s1 + $0xd20] sm:$0xff]  }
 0x1d9   :  { %v11465_v35 = vpop.f32.mrb[31].mxu0  ;;  %v12784_v18 = vld [vmem:[%s16051_s1 + $0xce0] sm:$0xff]   ;;  %v12788_v34 = vld [vmem:[%s16051_s1 + $0xce8] sm:$0xff]  }
 0x1e8   :  { %v11439_v37 = vpop.f32.mrb[32].mxu1 }
 0x1e9   :  { %v11440_v42 = vpop.f32.mrb[33].mxu1 }
 0x1ea   :  { %v11441_v43 = vadd.f32 %v11440_v42, %v11439_v37  ;;  %v11442_v46 = vpop.f32.mrb[34].mxu1  ;;  %v12791_v42 = vld [vmem:[%s16051_s1 + $0xd30] sm:$0xff]  }
 0x1eb   :  { %v11443_v51 = vpop.f32.mrb[35].mxu1  ;;  %v12792_v46 = vld [vmem:[%s16051_s1 + $0xcf0] sm:$0xff]  }
 0x1ec   :  { %v4024_v53 = vadd.f32 %v11441_v43, %v3984_v20  ;;  %v12779_v20 = vld [vmem:[%s16051_s1 + $0xd18] sm:$0xff]  }
 0x1ed   :  { %11694 = vmatprep.subr.bf16.mxu1 %v12779_v20  ;;  %v12823_v20 = vld [vmem:[%s16051_s1 + $0xe30] sm:$0xff]  }
 0x1ee   :  { %v4064_v58 = vadd.f32 %v11463_v31, %v4024_v53  ;;  %11695 = vmatpush3.bf16.msra.mxu1 %v12780_v24  ;;  %v12787_v31 = vld [vmem:[%s16051_s1 + $0xd28] sm:$0xff]   ;;  %v12795_v53 = vld [vmem:[%s16051_s1 + $0xd38] sm:$0xff]  }
 0x1ef   :  { %11696 = vmatprep.subr.bf16.mxu1 %v12783_v29 }
 0x1f2   :  { %11697 = vmatpush3.bf16.msra.mxu1 %v12784_v18  ;;  %v12827_v18 = vld [vmem:[%s16051_s1 + $0xe38] sm:$0xff]  }
 0x1f3   :  { %11698 = vmatprep.subr.bf16.mxu1 %v12787_v31  ;;  %v12828_v31 = vld [vmem:[%s16051_s1 + $0xdf8] sm:$0xff]  }
 0x1f6   :  { %v11505_v60 = vpop.f32.mrb[32].mxu0  ;;  %11699 = vmatpush3.bf16.msra.mxu1 %v12788_v34  ;;  %v12831_v34 = vld [vmem:[%s16051_s1 + $0xf00] sm:$0xff]  }
 0x1f7   :  { %v11506_v41 = vpop.f32.mrb[33].mxu0  ;;  %11700 = vmatprep.subr.bf16.mxu1 %v12791_v42  ;;  %v12836_v42 = vld [vmem:[%s16051_s1 + $0xec8] sm:$0xff]  }
 0x1f8   :  { %v11507_v62 = vadd.f32 %v11506_v41, %v11505_v60  ;;  %v11508_v56 = vpop.f32.mrb[34].mxu0  ;;  %v12804_v60 = vld [vmem:[%s16051_s1 + $0xdc8] sm:$0xff]   ;;  %v12807_v41 = vld [vmem:[%s16051_s1 + $0xe10] sm:$0xff]  }
 0x1f9   :  { %v11509_v63 = vpop.f32.mrb[35].mxu0  ;;  %v12808_v56 = vld [vmem:[%s16051_s1 + $0xdd0] sm:$0xff]  }
 0x1fa   :  { %11701 = vmatpush3.bf16.msra.mxu1 %v12792_v46  ;;  %v12840_v46 = vld [vmem:[%s16051_s1 + $0xed0] sm:$0xff]  }
 0x1fb   :  { %11702 = vmatprep.subr.bf16.mxu1 %v12795_v53 }
 0x1fe   :  { %11703 = vmatpush3.bf16.msra.mxu1 %v12796_v54 }
 0x1ff   :  { %11732 = vmatprep.subr.bf16.mxu1 %v12799_v38 }
 0x201   :  { %6274 = vmatmul.mubr.bf16.vlgmr.msra.gmra.mrb[60].mxu1 %v13358_v50 }
 0x202   :  { %6353 = vmatprep.mubr.bf16.mxu1 %v13377_v55 }
 0x208   :  { %v11483_v12 = vpop.f32.mrb[36].mxu1 }
 0x209   :  { %v11484_v14 = vpop.f32.mrb[37].mxu1 }
 0x20a   :  { %v11485_v15 = vadd.f32 %v11484_v14, %v11483_v12  ;;  %v11486_v16 = vpop.f32.mrb[38].mxu1  ;;  %v12815_v12 = vld [vmem:[%s16051_s1 + $0xe20] sm:$0xff]   ;;  %v12819_v14 = vld [vmem:[%s16051_s1 + $0xe28] sm:$0xff]  }
 0x20b   :  { %v11487_v19 = vpop.f32.mrb[39].mxu1 }
 0x20c   :  { %v4104_v23 = vadd.f32 %v11485_v15, %v4064_v58  ;;  %v12800_v58 = vld [vmem:[%s16051_s1 + $0xdc0] sm:$0xff]   ;;  %v12820_v15 = vld [vmem:[%s16051_s1 + $0xde8] sm:$0xff]  }
 0x20d   :  { %11733 = vmatpush3.bf16.msra.mxu1 %v12800_v58  ;;  %v12843_v58 = vld [vmem:[%s16051_s1 + $0xf18] sm:$0xff]  }
 0x20e   :  { %v4144_v26 = vadd.f32 %v11507_v62, %v4104_v23  ;;  %11734 = vmatprep.subr.bf16.mxu1 %v12803_v59 }
 0x211   :  { %11735 = vmatpush3.bf16.msra.mxu1 %v12804_v60  ;;  %v12844_v60 = vld [vmem:[%s16051_s1 + $0xed8] sm:$0xff]  }
 0x212   :  { %11736 = vmatprep.subr.bf16.mxu1 %v12807_v41 }
 0x215   :  { %11737 = vmatpush3.bf16.msra.mxu1 %v12808_v56  ;;  %v12848_v56 = vld [vmem:[%s16051_s1 + $0xee0] sm:$0xff]  }
 0x216   :  { %v11549_v35 = vpop.f32.mrb[36].mxu0  ;;  %11738 = vmatprep.subr.bf16.mxu1 %v12811_v6  ;;  %v12855_v6 = vld [vmem:[%s16051_s1 + $0xf30] sm:$0xff]  }
 0x217   :  { %v11550_v37 = vpop.f32.mrb[37].mxu0 }
 0x218   :  { %v11551_v25 = vadd.f32 %v11550_v37, %v11549_v35  ;;  %v11552_v43 = vpop.f32.mrb[38].mxu0  ;;  %v12832_v35 = vld [vmem:[%s16051_s1 + $0xec0] sm:$0xff]   ;;  %v12835_v37 = vld [vmem:[%s16051_s1 + $0xf08] sm:$0xff]  }
 0x219   :  { %v11553_v51 = vpop.f32.mrb[39].mxu0  ;;  %11739 = vmatpush3.bf16.msra.mxu1 %v12812_v9 }
 0x21a   :  { %11740 = vmatprep.subr.bf16.mxu1 %v12815_v12 }
 0x21d   :  { %11741 = vmatpush3.bf16.msra.mxu1 %v12816_v13  ;;  %v12859_v13 = vld [vmem:[%s16051_s1 + $0xf38] sm:$0xff]  }
 0x21e   :  { %11742 = vmatprep.subr.bf16.mxu1 %v12819_v14  ;;  %v12860_v14 = vld [vmem:[%s16051_s1 + $0xef8] sm:$0xff]  }
 0x221   :  { %11743 = vmatpush3.bf16.msra.mxu1 %v12820_v15  ;;  %v12863_v15 = vld [vmem:[%s16051_s1 + $0x1000] sm:$0xff]  }
 0x222   :  { %11744 = vmatprep.subr.bf16.mxu1 %v12823_v20  ;;  %v12868_v20 = vld [vmem:[%s16051_s1 + $0xfc8] sm:$0xff]  }
 0x228   :  { %v11527_v62 = vpop.f32.mrb[40].mxu1 }
 0x229   :  { %v11528_v63 = vpop.f32.mrb[41].mxu1 }
 0x22a   :  { %v11529_v0 = vadd.f32 %v11528_v63, %v11527_v62  ;;  %v11530_v3 = vpop.f32.mrb[42].mxu1  ;;  %v12847_v62 = vld [vmem:[%s16051_s1 + $0xf20] sm:$0xff]   ;;  %v12851_v63 = vld [vmem:[%s16051_s1 + $0xf28] sm:$0xff]  }
 0x22b   :  { %v11531_v4 = vpop.f32.mrb[43].mxu1 }
 0x22c   :  { %v4184_v7 = vadd.f32 %v11529_v0, %v4144_v26  ;;  %v12824_v26 = vld [vmem:[%s16051_s1 + $0xdf0] sm:$0xff]   ;;  %v12852_v0 = vld [vmem:[%s16051_s1 + $0xee8] sm:$0xff]  }
 0x22d   :  { %11745 = vmatpush3.bf16.msra.mxu1 %v12824_v26  ;;  %v12872_v26 = vld [vmem:[%s16051_s1 + $0xfd0] sm:$0xff]  }
 0x22e   :  { %v4224_v10 = vadd.f32 %v11551_v25, %v4184_v7  ;;  %11746 = vmatprep.subr.bf16.mxu1 %v12827_v18  ;;  %v12839_v25 = vld [vmem:[%s16051_s1 + $0xf10] sm:$0xff]  }
 0x231   :  { %11747 = vmatpush3.bf16.msra.mxu1 %v12828_v31 }
 0x232   :  { %11776 = vmatprep.subr.bf16.mxu1 %v12831_v34 }
 0x234   :  { %6354 = vmatmul.mubr.bf16.vlgmr.msra.gmra.mrb[64].mxu1 %v13476_v22 }
 0x235   :  { %11777 = vmatpush3.bf16.msra.mxu1 %v12832_v35  ;;  %6433 = vmatprep.mubr.bf16.mxu1 %v13579_v1  ;;  %v12875_v35 = vld [vmem:[%s16051_s1 + $0x1018] sm:$0xff]  }
 0x236   :  { %v11593_v16 = vpop.f32.mrb[40].mxu0  ;;  %11778 = vmatprep.subr.bf16.mxu1 %v12835_v37 }
 0x237   :  { %v11594_v19 = vpop.f32.mrb[41].mxu0 }
 0x238   :  { %v11595_v23 = vadd.f32 %v11594_v19, %v11593_v16  ;;  %v11596_v24 = vpop.f32.mrb[42].mxu0  ;;  %v12864_v16 = vld [vmem:[%s16051_s1 + $0xfc0] sm:$0xff]   ;;  %v12867_v19 = vld [vmem:[%s16051_s1 + $0x1008] sm:$0xff]  }
 0x239   :  { %v11597_v29 = vpop.f32.mrb[43].mxu0  ;;  %11779 = vmatpush3.bf16.msra.mxu1 %v12836_v42  ;;  %v12876_v42 = vld [vmem:[%s16051_s1 + $0xfd8] sm:$0xff]  }
 0x23a   :  { %11780 = vmatprep.subr.bf16.mxu1 %v12839_v25 }
 0x23d   :  { %11781 = vmatpush3.bf16.msra.mxu1 %v12840_v46  ;;  %v12880_v46 = vld [vmem:[%s16051_s1 + $0xfe0] sm:$0xff]  }
 0x23e   :  { %11782 = vmatprep.subr.bf16.mxu1 %v12843_v58  ;;  %v12888_v58 = vld [vmem:[%s16051_s1 + $0xff0] sm:$0xff]  }
 0x241   :  { %11783 = vmatpush3.bf16.msra.mxu1 %v12844_v60 }
 0x242   :  { %11784 = vmatprep.subr.bf16.mxu1 %v12847_v62 }
 0x245   :  { %11785 = vmatpush3.bf16.msra.mxu1 %v12848_v56 }
 0x246   :  { %11786 = vmatprep.subr.bf16.mxu1 %v12851_v63  ;;  %v12766_v63 = vld [vmem:[%s16051_s1 + $0xc40] sm:$0xff]  }
 0x248   :  { %v11571_v43 = vpop.f32.mrb[44].mxu1 }
 0x249   :  { %v11572_v51 = vpop.f32.mrb[45].mxu1  ;;  %11787 = vmatpush3.bf16.msra.mxu1 %v12852_v0  ;;  %v12891_v0 = vld [vmem:[%s16051_s1 + $0x1038] sm:$0xff]  }
 0x24a   :  { %v11573_v53 = vadd.f32 %v11572_v51, %v11571_v43  ;;  %v11574_v54 = vpop.f32.mrb[46].mxu1  ;;  %11788 = vmatprep.subr.bf16.mxu1 %v12855_v6  ;;  %v12879_v43 = vld [vmem:[%s16051_s1 + $0x1020] sm:$0xff]   ;;  %v12883_v51 = vld [vmem:[%s16051_s1 + $0x1028] sm:$0xff]  }
 0x24b   :  { %v11575_v38 = vpop.f32.mrb[47].mxu1  ;;  %v12887_v54 = vld [vmem:[%s16051_s1 + $0x1030] sm:$0xff]   ;;  %v12769_v6 = vld [vmem:[%s16051_s1 + $0xc88] sm:$0xff]  }
 0x24c   :  { %v4264_v59 = vadd.f32 %v11573_v53, %v4224_v10  ;;  %v12856_v10 = vld [vmem:[%s16051_s1 + $0xef0] sm:$0xff]   ;;  %v12884_v53 = vld [vmem:[%s16051_s1 + $0xfe8] sm:$0xff]  }
 0x24d   :  { %11789 = vmatpush3.bf16.msra.mxu1 %v12856_v10  ;;  %v12896_v10 = vld [vmem:[%s16051_s1 + $0x10c0] sm:$0xff]  }
 0x24e   :  { %v4304_v41 = vadd.f32 %v11595_v23, %v4264_v59  ;;  %11790 = vmatprep.subr.bf16.mxu1 %v12859_v13  ;;  %v12871_v23 = vld [vmem:[%s16051_s1 + $0x1010] sm:$0xff]   ;;  %v12899_v13 = vld [vmem:[%s16051_s1 + $0x1108] sm:$0xff]  }
 0x251   :  { %11791 = vmatpush3.bf16.msra.mxu1 %v12860_v14  ;;  %v12774_v14 = vld [vmem:[%s16051_s1 + $0xc50] sm:$0xff]  }
 0x252   :  { %11820 = vmatprep.subr.bf16.mxu1 %v12863_v15  ;;  %v12900_v15 = vld [vmem:[%s16051_s1 + $0x10c8] sm:$0xff]  }
 0x254   :  { %6434 = vmatmul.mubr.bf16.vlgmr.msra.gmra.mrb[68].mxu1 %v13602_v8 }
 0x255   :  { %11821 = vmatpush3.bf16.msra.mxu1 %v12864_v16  ;;  %6513 = vmatprep.mubr.bf16.mxu1 %v13612_v11  ;;  %v12777_v16 = vld [vmem:[%s16051_s1 + $0xc98] sm:$0xff]  }
 0x256   :  { %v11637_v3 = vpop.f32.mrb[44].mxu0  ;;  %11822 = vmatprep.subr.bf16.mxu1 %v12867_v19  ;;  %v12903_v19 = vld [vmem:[%s16051_s1 + $0x1110] sm:$0xff]  }
 0x257   :  { %v11638_v4 = vpop.f32.mrb[45].mxu0 }
 0x258   :  { %v11639_v7 = vadd.f32 %v11638_v4, %v11637_v3  ;;  %v11640_v9 = vpop.f32.mrb[46].mxu0  ;;  %v12892_v3 = vld [vmem:[%s16051_s1 + $0xff8] sm:$0xff]  }
 0x259   :  { %v11641_v12 = vpop.f32.mrb[47].mxu0  ;;  %11823 = vmatpush3.bf16.msra.mxu1 %v12868_v20  ;;  %v12770_v9 = vld [vmem:[%s16051_s1 + $0xc48] sm:$0xff]   ;;  %v12778_v20 = vld [vmem:[%s16051_s1 + $0xc58] sm:$0xff]  }
 0x25a   :  { %11824 = vmatprep.subr.bf16.mxu1 %v12871_v23  ;;  %v12773_v12 = vld [vmem:[%s16051_s1 + $0xc90] sm:$0xff]  }
 0x25b   :  { %v12904_v23 = vld [vmem:[%s16051_s1 + $0x10d0] sm:$0xff]  }
 0x25d   :  { %11825 = vmatpush3.bf16.msra.mxu1 %v12872_v26  ;;  %v12907_v26 = vld [vmem:[%s16051_s1 + $0x1118] sm:$0xff]  }
 0x25e   :  { %11826 = vmatprep.subr.bf16.mxu1 %v12875_v35  ;;  %v12786_v35 = vld [vmem:[%s16051_s1 + $0xc68] sm:$0xff]  }
 0x261   :  { %11827 = vmatpush3.bf16.msra.mxu1 %v12876_v42  ;;  %v12789_v42 = vld [vmem:[%s16051_s1 + $0xcb0] sm:$0xff]  }
 0x262   :  { %11828 = vmatprep.subr.bf16.mxu1 %v12879_v43  ;;  %v12790_v43 = vld [vmem:[%s16051_s1 + $0xc70] sm:$0xff]  }
 0x265   :  { %11829 = vmatpush3.bf16.msra.mxu1 %v12880_v46  ;;  %v12916_v46 = vld [vmem:[%s16051_s1 + $0x10e8] sm:$0xff]  }
 0x266   :  { %11830 = vmatprep.subr.bf16.mxu1 %v12883_v51  ;;  %v12793_v51 = vld [vmem:[%s16051_s1 + $0xcb8] sm:$0xff]  }
 0x268   :  { %v11615_v24 = vpop.f32.mrb[48].mxu1 }
 0x269   :  { %v11616_v29 = vpop.f32.mrb[49].mxu1  ;;  %11831 = vmatpush3.bf16.msra.mxu1 %v12884_v53  ;;  %v12919_v53 = vld [vmem:[%s16051_s1 + $0x1130] sm:$0xff]  }
 0x26a   :  { %v11617_v18 = vadd.f32 %v11616_v29, %v11615_v24  ;;  %v11618_v31 = vpop.f32.mrb[50].mxu1  ;;  %11832 = vmatprep.subr.bf16.mxu1 %v12887_v54  ;;  %v12781_v24 = vld [vmem:[%s16051_s1 + $0xca0] sm:$0xff]  }
 0x26b   :  { %v11619_v34 = vpop.f32.mrb[51].mxu1  ;;  %v12782_v29 = vld [vmem:[%s16051_s1 + $0xc60] sm:$0xff]   ;;  %v12785_v31 = vld [vmem:[%s16051_s1 + $0xca8] sm:$0xff]  }
 0x26c   :  { %v4344_v37 = vadd.f32 %v11617_v18, %v4304_v41  ;;  %v12908_v18 = vld [vmem:[%s16051_s1 + $0x10d8] sm:$0xff]   ;;  %v12911_v34 = vld [vmem:[%s16051_s1 + $0x1120] sm:$0xff]  }
 0x26d   :  { %11833 = vmatpush3.bf16.msra.mxu1 %v12888_v58  ;;  %v12920_v58 = vld [vmem:[%s16051_s1 + $0x10f0] sm:$0xff]  }
 0x26e   :  { %v4384_v25 = vadd.f32 %v11639_v7, %v4344_v37  ;;  %11834 = vmatprep.subr.bf16.mxu1 %v12891_v0  ;;  %v12895_v7 = vld [vmem:[%s16051_s1 + $0x1100] sm:$0xff]   ;;  %v12924_v0 = vld [vmem:[%s16051_s1 + $0x10f8] sm:$0xff]  }
 0x26f   :  { %v12912_v37 = vld [vmem:[%s16051_s1 + $0x10e0] sm:$0xff]  }
 0x271   :  { %11835 = vmatpush3.bf16.msra.mxu1 %v12892_v3  ;;  %v12801_v3 = vld [vmem:[%s16051_s1 + $0xd88] sm:$0xff]  }
 0x272   :  { %11864 = vmatprep.subr.bf16.mxu1 %v12895_v7  ;;  %v12928_v7 = vld [vmem:[%s16051_s1 + $0x11c0] sm:$0xff]  }
 0x274   :  { %6514 = vmatmul.mubr.bf16.vlgmr.msra.gmra.mrb[72].mxu1 %v13714_v48 }
 0x275   :  { %6593 = vmatprep.mubr.bf16.mxu1 %v13817_v32  ;;  %11865 = vmatpush3.bf16.msra.mxu1 %v12896_v10  ;;  %v12931_v10 = vld [vmem:[%s16051_s1 + $0x1208] sm:$0xff]  }
 0x276   :  { %11866 = vmatprep.subr.bf16.mxu1 %v12899_v13  ;;  %v12932_v13 = vld [vmem:[%s16051_s1 + $0x11c8] sm:$0xff]  }
 0x278   :  { %v4423_v38 = vpop.f32.mrb[52].mxu1 }
 0x279   :  { %v4424_v59 = vadd.f32 %v4423_v38, %v4384_v25  ;;  %v12244_v60 = vpop.f32.mrb[53].mxu1  ;;  %11867 = vmatpush3.bf16.msra.mxu1 %v12900_v15  ;;  %v12915_v25 = vld [vmem:[%s16051_s1 + $0x1128] sm:$0xff]   ;;  %v12794_v38 = vld [vmem:[%s16051_s1 + $0xc78] sm:$0xff]   ;;  %v12935_v15 = vld [vmem:[%s16051_s1 + $0x1210] sm:$0xff]  }
 0x27a   :  { %v4426_v41 = vpop.f32.mrb[54].mxu1  ;;  %11868 = vmatprep.subr.bf16.mxu1 %v12903_v19  ;;  %v12797_v60 = vld [vmem:[%s16051_s1 + $0xd80] sm:$0xff]   ;;  %v12936_v19 = vld [vmem:[%s16051_s1 + $0x11d0] sm:$0xff]  }
 0x27b   :  { %v4429_v62 = vmax.f32 %v4424_v59, 0.0  ;;  %v12245_v56 = vpop.f32.mrb[55].mxu1 }
 0x27d   :  { %v4430_v4 = vpack.c.bf16 %v4429_v62, %v4429_v62  ;;  %11869 = vmatpush3.bf16.msra.mxu1 %v12904_v23  ;;  %v12798_v62 = vld [vmem:[%s16051_s1 + $0xd40] sm:$0xff]   ;;  %v12939_v23 = vld [vmem:[%s16051_s1 + $0x1218] sm:$0xff]  }
 0x27e   :  { %11870 = vmatprep.subr.bf16.mxu1 %v12907_v26  ;;  %v12940_v26 = vld [vmem:[%s16051_s1 + $0x11d8] sm:$0xff]  }
 0x27f   :  { %12263 = vmatmul.mubr.bf16.vlgmr.msra.gmra.mrb[48].mxu0 %v4430_v4  ;;  %v12927_v4 = vld [vmem:[%s16051_s1 + $0x1200] sm:$0xff]  }
 0x280   :  { %11667 = vmatpush3.bf16.msra.mxu0 %v12766_v63  ;;  %6233 = vmatprep.mubr.bf16.mxu0 %v13348_v47  ;;  %v12923_v63 = vld [vmem:[%s16051_s1 + $0x1138] sm:$0xff]  }
 0x281   :  { %11668 = vmatprep.subr.bf16.mxu0 %v12769_v6  ;;  %11871 = vmatpush3.bf16.msra.mxu1 %v12908_v18  ;;  %v12802_v6 = vld [vmem:[%s16051_s1 + $0xd48] sm:$0xff]   ;;  %v12943_v18 = vld [vmem:[%s16051_s1 + $0x1220] sm:$0xff]  }
 0x282   :  { %11872 = vmatprep.subr.bf16.mxu1 %v12911_v34  ;;  %v12944_v34 = vld [vmem:[%s16051_s1 + $0x11e0] sm:$0xff]  }
 0x284   :  { %11669 = vmatpush3.bf16.msra.mxu0 %v12770_v9  ;;  %v12805_v9 = vld [vmem:[%s16051_s1 + $0xd90] sm:$0xff]  }
 0x285   :  { %11670 = vmatprep.subr.bf16.mxu0 %v12773_v12  ;;  %11873 = vmatpush3.bf16.msra.mxu1 %v12912_v37  ;;  %v12806_v12 = vld [vmem:[%s16051_s1 + $0xd50] sm:$0xff]   ;;  %v12947_v37 = vld [vmem:[%s16051_s1 + $0x1228] sm:$0xff]  }
 0x286   :  { %11874 = vmatprep.subr.bf16.mxu1 %v12915_v25  ;;  %v12948_v25 = vld [vmem:[%s16051_s1 + $0x11e8] sm:$0xff]  }
 0x288   :  { %11671 = vmatpush3.bf16.msra.mxu0 %v12774_v14  ;;  %v12809_v14 = vld [vmem:[%s16051_s1 + $0xd98] sm:$0xff]  }
 0x289   :  { %11672 = vmatprep.subr.bf16.mxu0 %v12777_v16  ;;  %11875 = vmatpush3.bf16.msra.mxu1 %v12916_v46  ;;  %v12810_v16 = vld [vmem:[%s16051_s1 + $0xd58] sm:$0xff]   ;;  %v12951_v46 = vld [vmem:[%s16051_s1 + $0x1230] sm:$0xff]  }
 0x28a   :  { %11876 = vmatprep.subr.bf16.mxu1 %v12919_v53  ;;  %v12952_v53 = vld [vmem:[%s16051_s1 + $0x11f0] sm:$0xff]  }
 0x28c   :  { %11673 = vmatpush3.bf16.msra.mxu0 %v12778_v20  ;;  %v12813_v20 = vld [vmem:[%s16051_s1 + $0xda0] sm:$0xff]  }
 0x28d   :  { %11674 = vmatprep.subr.bf16.mxu0 %v12781_v24  ;;  %11877 = vmatpush3.bf16.msra.mxu1 %v12920_v58  ;;  %v12814_v24 = vld [vmem:[%s16051_s1 + $0xd60] sm:$0xff]  }
 0x28e   :  { %11878 = vmatprep.subr.bf16.mxu1 %v12923_v63  ;;  %v12830_v58 = vld [vmem:[%s16051_s1 + $0xe40] sm:$0xff]   ;;  %v12838_v63 = vld [vmem:[%s16051_s1 + $0xe50] sm:$0xff]  }
 0x290   :  { %11675 = vmatpush3.bf16.msra.mxu0 %v12782_v29  ;;  %v12817_v29 = vld [vmem:[%s16051_s1 + $0xda8] sm:$0xff]  }
 0x291   :  { %11676 = vmatprep.subr.bf16.mxu0 %v12785_v31  ;;  %11879 = vmatpush3.bf16.msra.mxu1 %v12924_v0  ;;  %v12818_v31 = vld [vmem:[%s16051_s1 + $0xd68] sm:$0xff]   ;;  %v12841_v0 = vld [vmem:[%s16051_s1 + $0xe98] sm:$0xff]  }
 0x292   :  { %11908 = vmatprep.subr.bf16.mxu1 %v12927_v4  ;;  %v12845_v4 = vld [vmem:[%s16051_s1 + $0xea0] sm:$0xff]  }
 0x294   :  { %11677 = vmatpush3.bf16.msra.mxu0 %v12786_v35  ;;  %6594 = vmatmul.mubr.bf16.vlgmr.msra.gmra.mrb[76].mxu1 %v13840_v39  ;;  %v12821_v35 = vld [vmem:[%s16051_s1 + $0xdb0] sm:$0xff]  }
 0x295   :  { %11678 = vmatprep.subr.bf16.mxu0 %v12789_v42  ;;  %11909 = vmatpush3.bf16.msra.mxu1 %v12928_v7  ;;  %v12822_v42 = vld [vmem:[%s16051_s1 + $0xd70] sm:$0xff]   ;;  %v12849_v7 = vld [vmem:[%s16051_s1 + $0xea8] sm:$0xff]  }
 0x296   :  { %6673 = vmatprep.mubr.bf16.mxu1 %v13850_v44  ;;  %11910 = vmatprep.subr.bf16.mxu1 %v12931_v10  ;;  %v12853_v10 = vld [vmem:[%s16051_s1 + $0xeb0] sm:$0xff]  }
 0x298   :  { %11679 = vmatpush3.bf16.msra.mxu0 %v12790_v43  ;;  %v14965_v54 = vpop.f32.mrb[56].mxu1  ;;  %v12825_v43 = vld [vmem:[%s16051_s1 + $0xdb8] sm:$0xff]  }
 0x299   :  { %v12284_v59 = vpop.f32.mrb[57].mxu1  ;;  %11680 = vmatprep.subr.bf16.mxu0 %v12793_v51  ;;  %11911 = vmatpush3.bf16.msra.mxu1 %v12932_v13  ;;  %v12826_v51 = vld [vmem:[%s16051_s1 + $0xd78] sm:$0xff]  }
 0x29a   :  { %v4621_v41 = vpop.f32.mrb[58].mxu1  ;;  %11912 = vmatprep.subr.bf16.mxu1 %v12935_v15  ;;  %v12833_v59 = vld [vmem:[%s16051_s1 + $0xe88] sm:$0xff]   ;;  %v12857_v13 = vld [vmem:[%s16051_s1 + $0xeb8] sm:$0xff]   ;;  %v12861_v15 = vld [vmem:[%s16051_s1 + $0xf80] sm:$0xff]  }
 0x29b   :  { %v12285_v56 = vpop.f32.mrb[59].mxu1  ;;  %v12956_v41 = vld [vmem:[%s16051_s1 + $0x11f8] sm:$0xff]  }
 0x29c   :  { %11681 = vmatpush3.bf16.msra.mxu0 %v12794_v38  ;;  %v12829_v38 = vld [vmem:[%s16051_s1 + $0xe80] sm:$0xff]   ;;  %v12837_v56 = vld [vmem:[%s16051_s1 + $0xe90] sm:$0xff]  }
 0x29d   :  { %11710 = vmatprep.subr.bf16.mxu0 %v12797_v60  ;;  %11913 = vmatpush3.bf16.msra.mxu1 %v12936_v19  ;;  %v12955_v60 = vld [vmem:[%s16051_s1 + $0x1238] sm:$0xff]   ;;  %v12865_v19 = vld [vmem:[%s16051_s1 + $0xf88] sm:$0xff]  }
 0x29e   :  { %11914 = vmatprep.subr.bf16.mxu1 %v12939_v23  ;;  %v12869_v23 = vld [vmem:[%s16051_s1 + $0xf90] sm:$0xff]  }
 0x29f   :  { %6234 = vmatmul.mubr.bf16.vlgmr.msra.gmra.mrb[52].mxu0 %v13343_v45 }
 0x2a0   :  { %11711 = vmatpush3.bf16.msra.mxu0 %v12798_v62  ;;  %6313 = vmatprep.mubr.bf16.mxu0 %v13354_v49  ;;  %v12834_v62 = vld [vmem:[%s16051_s1 + $0xe48] sm:$0xff]  }
 0x2a1   :  { %11712 = vmatprep.subr.bf16.mxu0 %v12801_v3  ;;  %11915 = vmatpush3.bf16.msra.mxu1 %v12940_v26  ;;  %v12842_v3 = vld [vmem:[%s16051_s1 + $0xe58] sm:$0xff]  }
 0x2a2   :  { %11916 = vmatprep.subr.bf16.mxu1 %v12943_v18  ;;  %v12873_v26 = vld [vmem:[%s16051_s1 + $0xf98] sm:$0xff]   ;;  %v12877_v18 = vld [vmem:[%s16051_s1 + $0xfa0] sm:$0xff]  }
 0x2a4   :  { %11713 = vmatpush3.bf16.msra.mxu0 %v12802_v6  ;;  %v12846_v6 = vld [vmem:[%s16051_s1 + $0xe60] sm:$0xff]  }
 0x2a5   :  { %11714 = vmatprep.subr.bf16.mxu0 %v12805_v9  ;;  %11917 = vmatpush3.bf16.msra.mxu1 %v12944_v34  ;;  %v12850_v9 = vld [vmem:[%s16051_s1 + $0xe68] sm:$0xff]  }
 0x2a6   :  { %11918 = vmatprep.subr.bf16.mxu1 %v12947_v37  ;;  %v12881_v34 = vld [vmem:[%s16051_s1 + $0xfa8] sm:$0xff]  }
 0x2a8   :  { %11715 = vmatpush3.bf16.msra.mxu0 %v12806_v12  ;;  %v12854_v12 = vld [vmem:[%s16051_s1 + $0xe70] sm:$0xff]  }
 0x2a9   :  { %11716 = vmatprep.subr.bf16.mxu0 %v12809_v14  ;;  %11919 = vmatpush3.bf16.msra.mxu1 %v12948_v25  ;;  %v12858_v14 = vld [vmem:[%s16051_s1 + $0xe78] sm:$0xff]  }
 0x2aa   :  { %11920 = vmatprep.subr.bf16.mxu1 %v12951_v46 }
 0x2ac   :  { %11717 = vmatpush3.bf16.msra.mxu0 %v12810_v16  ;;  %v12862_v16 = vld [vmem:[%s16051_s1 + $0xf40] sm:$0xff]  }
 0x2ad   :  { %11718 = vmatprep.subr.bf16.mxu0 %v12813_v20  ;;  %11921 = vmatpush3.bf16.msra.mxu1 %v12952_v53  ;;  %v12866_v20 = vld [vmem:[%s16051_s1 + $0xf48] sm:$0xff]  }
 0x2ae   :  { %11922 = vmatprep.subr.bf16.mxu1 %v12955_v60 }
 0x2b0   :  { %11719 = vmatpush3.bf16.msra.mxu0 %v12814_v24  ;;  %v12870_v24 = vld [vmem:[%s16051_s1 + $0xf50] sm:$0xff]  }
 0x2b1   :  { %11720 = vmatprep.subr.bf16.mxu0 %v12817_v29  ;;  %11923 = vmatpush3.bf16.msra.mxu1 %v12956_v41  ;;  %v12874_v29 = vld [vmem:[%s16051_s1 + $0xf58] sm:$0xff]  }
 0x2b2   :  { %12298 = vmatprep.subr.bf16.mxu1 %v13198_v30 }
 0x2b4   :  { %11721 = vmatpush3.bf16.msra.mxu0 %v12818_v31  ;;  %6674 = vmatmul.mubr.bf16.vlgmr.msra.gmra.mrb[80].mxu1 %v13949_v27  ;;  %v12878_v31 = vld [vmem:[%s16051_s1 + $0xf60] sm:$0xff]  }
 0x2b5   :  { %11722 = vmatprep.subr.bf16.mxu0 %v12821_v35  ;;  %12314 = vmatprep.mubr.msk.bf16.mxu1 %vm13199_vm0, %v13198_v30 }
 0x2b8   :  { %11723 = vmatpush3.bf16.msra.mxu0 %v12822_v42 }
 0x2b9   :  { %11724 = vmatprep.subr.bf16.mxu0 %v12825_v43 }
 0x2bc   :  { %11725 = vmatpush3.bf16.msra.mxu0 %v12826_v51 }
 0x2bd   :  { %11754 = vmatprep.subr.bf16.mxu0 %v12829_v38 }
 0x2bf   :  { %6314 = vmatmul.mubr.bf16.vlgmr.msra.gmra.mrb[56].mxu0 %v13460_v17 }
 0x2c0   :  { %11755 = vmatpush3.bf16.msra.mxu0 %v12830_v58  ;;  %6393 = vmatprep.mubr.bf16.mxu0 %v13566_v61 }
 0x2c1   :  { %11756 = vmatprep.subr.bf16.mxu0 %v12833_v59 }
 0x2c4   :  { %11757 = vmatpush3.bf16.msra.mxu0 %v12834_v62 }
 0x2c5   :  { %11758 = vmatprep.subr.bf16.mxu0 %v12837_v56 }
 0x2c8   :  { %11759 = vmatpush3.bf16.msra.mxu0 %v12838_v63 }
 0x2c9   :  { %11760 = vmatprep.subr.bf16.mxu0 %v12841_v0 }
 0x2cc   :  { %11761 = vmatpush3.bf16.msra.mxu0 %v12842_v3 }
 0x2cd   :  { %11762 = vmatprep.subr.bf16.mxu0 %v12845_v4 }
 0x2d0   :  { %11763 = vmatpush3.bf16.msra.mxu0 %v12846_v6 }
 0x2d1   :  { %11764 = vmatprep.subr.bf16.mxu0 %v12849_v7 }
 0x2d4   :  { %11765 = vmatpush3.bf16.msra.mxu0 %v12850_v9 }
 0x2d5   :  { %11766 = vmatprep.subr.bf16.mxu0 %v12853_v10 }
 0x2d8   :  { %11767 = vmatpush3.bf16.msra.mxu0 %v12854_v12 }
 0x2d9   :  { %11768 = vmatprep.subr.bf16.mxu0 %v12857_v13 }
 0x2dc   :  { %11769 = vmatpush3.bf16.msra.mxu0 %v12858_v14 }
 0x2dd   :  { %11798 = vmatprep.subr.bf16.mxu0 %v12861_v15 }
 0x2df   :  { %6394 = vmatmul.mubr.bf16.vlgmr.msra.gmra.mrb[60].mxu0 %v13582_v2 }
 0x2e0   :  { %11799 = vmatpush3.bf16.msra.mxu0 %v12862_v16  ;;  %6473 = vmatprep.mubr.bf16.mxu0 %v13592_v5 }
 0x2e1   :  { %11800 = vmatprep.subr.bf16.mxu0 %v12865_v19 }
 0x2e4   :  { %11801 = vmatpush3.bf16.msra.mxu0 %v12866_v20 }
 0x2e5   :  { %11802 = vmatprep.subr.bf16.mxu0 %v12869_v23 }
 0x2e8   :  { %11803 = vmatpush3.bf16.msra.mxu0 %v12870_v24 }
 0x2e9   :  { %11804 = vmatprep.subr.bf16.mxu0 %v12873_v26 }
 0x2ec   :  { %11805 = vmatpush3.bf16.msra.mxu0 %v12874_v29 }
 0x2ed   :  { %11806 = vmatprep.subr.bf16.mxu0 %v12877_v18 }
 0x2ee   :  { %10 = vsyncpa [#allocation3], 0  ;;  %v12882_v35 = vld [vmem:[%s16051_s1 + $0xf68] sm:$0xff]   ;;  %v12885_v37 = vld [vmem:[%s16051_s1 + $0xfb0] sm:$0xff]   ;;  %v11704_v25 = vpop.f32.mrb[60].mxu1  ;;  %s13200_s17 = smov [#allocation2]  }
 0x2ef   :  { %v12886_v42 = vld [vmem:[%s16051_s1 + $0xf70] sm:$0xff]   ;;  %v12889_v43 = vld [vmem:[%s16051_s1 + $0xfb8] sm:$0xff]   ;;  %v11705_v46 = vpop.f32.mrb[61].mxu1  ;;  %v12893_v59 = vld [vmem:[%s16051_s1 + $0x1080] sm:$0xff]   ;;  %s9049_s18 = sshll.u32 %s13200_s17, 4  ;;  %s9050_s18 = int_to_ptr.vmem [resolvable:$true] %s9049_s18 }
 0x2f0   :  { %11807 = vmatpush3.bf16.msra.mxu0 %v12878_v31  ;;  %v15180_v51 = vadd.f32 %v11705_v46, %v11704_v25  ;;  %v11707_v53 = vpop.f32.mrb[62].mxu1  ;;  %v12890_v58 = vld [vmem:[%s16051_s1 + $0xf78] sm:$0xff]   ;;  %v12894_v60 = vld [vmem:[%s16051_s1 + $0x1040] sm:$0xff]   ;;  %v12897_v41 = vld [vmem:[%s16051_s1 + $0x1088] sm:$0xff]   ;;  %s13173_s19 = scalar_lea.vmem %s9050_s18, 32  ;;  %p13178_p1 = scmp.lt.s32.totalorder %s9050_s18, %s9050_s18 }
 0x2f1   :  { %11808 = vmatprep.subr.bf16.mxu0 %v12881_v34  ;;  %v11708_v38 = vpop.f32.mrb[63].mxu1  ;;  %v12898_v62 = vld [vmem:[%s16051_s1 + $0x1048] sm:$0xff]   ;;  %v12901_v56 = vld [vmem:[%s16051_s1 + $0x1090] sm:$0xff]   ;;  %v12905_v0 = vld [vmem:[%s16051_s1 + $0x1098] sm:$0xff]   ;;  %p13174_p0 = scmp.ne.s32.totalorder %s9050_s18, %s13173_s19  ;;  %p13179_p2 = scmp.lt.s32.totalorder %s13173_s19, %s13173_s19 }
 0x2f2   :  { %v12902_v63 = vld [vmem:[%s16051_s1 + $0x1050] sm:$0xff]   ;;  %v12906_v3 = vld [vmem:[%s16051_s1 + $0x1058] sm:$0xff]   ;;  %v12909_v4 = vld [vmem:[%s16051_s1 + $0x10a0] sm:$0xff]  }
 0x2f3   :  { %v12910_v6 = vld [vmem:[%s16051_s1 + $0x1060] sm:$0xff]   ;;  %v12913_v7 = vld [vmem:[%s16051_s1 + $0x10a8] sm:$0xff]   ;;  %v12917_v10 = vld [vmem:[%s16051_s1 + $0x10b0] sm:$0xff]   ;;  %p13180_p3 = por %p13179_p2, %p13178_p1 }
 0x2f4   :  { %11809 = vmatpush3.bf16.msra.mxu0 %v12882_v35  ;;  %v12914_v9 = vld [vmem:[%s16051_s1 + $0x1068] sm:$0xff]   ;;  %v12918_v12 = vld [vmem:[%s16051_s1 + $0x1070] sm:$0xff]   ;;  %v12921_v14 = vld [vmem:[%s16051_s1 + $0x10b8] sm:$0xff]  }
 0x2f5   :  { %11810 = vmatprep.subr.bf16.mxu0 %v12885_v37  ;;  %v12922_v23 = vld [vmem:[%s16051_s1 + $0x1078] sm:$0xff]   ;;  %v12925_v24 = vld [vmem:[%s16051_s1 + $0x1180] sm:$0xff]   ;;  %v12929_v29 = vld [vmem:[%s16051_s1 + $0x1188] sm:$0xff]   ;;  %p13181_p4 = pnand %p13180_p3, %p13174_p0 }
 0x2f6   :  { %v12926_v26 = vld [vmem:[%s16051_s1 + $0x1140] sm:$0xff]   ;;  %v12930_v18 = vld [vmem:[%s16051_s1 + $0x1148] sm:$0xff]   ;;  %v12933_v31 = vld [vmem:[%s16051_s1 + $0x1190] sm:$0xff]  }
 0x2f7   :  { %v12934_v34 = vld [vmem:[%s16051_s1 + $0x1150] sm:$0xff]   ;;  %v12937_v35 = vld [vmem:[%s16051_s1 + $0x1198] sm:$0xff]   ;;  %v12942_v25 = vld [vmem:[%s16051_s1 + $0x1160] sm:$0xff]  }
 0x2f8   :  { %11811 = vmatpush3.bf16.msra.mxu0 %v12886_v42  ;;  %v12938_v37 = vld [vmem:[%s16051_s1 + $0x1158] sm:$0xff]   ;;  %v12941_v42 = vld [vmem:[%s16051_s1 + $0x11a0] sm:$0xff]   ;;  %v12946_v46 = vld [vmem:[%s16051_s1 + $0x1168] sm:$0xff]  }
 0x2f9   :  { %11812 = vmatprep.subr.bf16.mxu0 %v12889_v43  ;;  %v12945_v43 = vld [vmem:[%s16051_s1 + $0x11a8] sm:$0xff]   ;;  %v12949_v53 = vld [vmem:[%s16051_s1 + $0x11b0] sm:$0xff]  }
 0x2fa   :  { %v12950_v38 = vld [vmem:[%s16051_s1 + $0x1170] sm:$0xff]  }
 0x2fc   :  { %11813 = vmatpush3.bf16.msra.mxu0 %v12890_v58 }
 0x2fd   :  { %11842 = vmatprep.subr.bf16.mxu0 %v12893_v59  ;;  %v12953_v59 = vld [vmem:[%s16051_s1 + $0x11b8] sm:$0xff]  }
 0x2ff   :  { %6474 = vmatmul.mubr.bf16.vlgmr.msra.gmra.mrb[64].mxu0 %v13698_v40 }
 0x300   :  { %11843 = vmatpush3.bf16.msra.mxu0 %v12894_v60  ;;  %6553 = vmatprep.mubr.bf16.mxu0 %v13804_v28 }
 0x301   :  { %11844 = vmatprep.subr.bf16.mxu0 %v12897_v41 }
 0x304   :  { %11845 = vmatpush3.bf16.msra.mxu0 %v12898_v62 }
 0x305   :  { %11846 = vmatprep.subr.bf16.mxu0 %v12901_v56 }
 0x307   :  { %v11748_v13 = vpop.f32.mrb[64].mxu1 }
 0x308   :  { %11847 = vmatpush3.bf16.msra.mxu0 %v12902_v63  ;;  %v11749_v15 = vpop.f32.mrb[65].mxu1  ;;  %v12954_v63 = vld [vmem:[%s16051_s1 + $0x1178] sm:$0xff]  }
 0x309   :  { %11848 = vmatprep.subr.bf16.mxu0 %v12905_v0  ;;  %v15232_v16 = vadd.f32 %v11749_v15, %v11748_v13  ;;  %v11751_v19 = vpop.f32.mrb[66].mxu1  ;;  %v12957_v0 = vld [vmem:[%s16051_s1 + $0x1240] sm:$0xff]  }
 0x30a   :  { %v11752_v20 = vpop.f32.mrb[67].mxu1 }
 0x30c   :  { %11849 = vmatpush3.bf16.msra.mxu0 %v12906_v3  ;;  %v12958_v3 = vld [vmem:[%s16051_s1 + $0x1248] sm:$0xff]  }
 0x30d   :  { %11850 = vmatprep.subr.bf16.mxu0 %v12909_v4  ;;  %v12959_v4 = vld [vmem:[%s16051_s1 + $0x1250] sm:$0xff]  }
 0x310   :  { %11851 = vmatpush3.bf16.msra.mxu0 %v12910_v6  ;;  %v12960_v6 = vld [vmem:[%s16051_s1 + $0x1258] sm:$0xff]  }
 0x311   :  { %11852 = vmatprep.subr.bf16.mxu0 %v12913_v7 }
 0x314   :  { %11853 = vmatpush3.bf16.msra.mxu0 %v12914_v9 }
 0x315   :  { %11854 = vmatprep.subr.bf16.mxu0 %v12917_v10 }
 0x318   :  { %11855 = vmatpush3.bf16.msra.mxu0 %v12918_v12 }
 0x319   :  { %11856 = vmatprep.subr.bf16.mxu0 %v12921_v14 }
 0x31c   :  { %11857 = vmatpush3.bf16.msra.mxu0 %v12922_v23 }
 0x31d   :  { %11886 = vmatprep.subr.bf16.mxu0 %v12925_v24 }
 0x31f   :  { %6554 = vmatmul.mubr.bf16.vlgmr.msra.gmra.mrb[68].mxu0 %v13820_v33 }
 0x320   :  { %11887 = vmatpush3.bf16.msra.mxu0 %v12926_v26  ;;  %6633 = vmatprep.mubr.bf16.mxu0 %v13830_v36  ;;  %v10272_v26 = vld [vmem:[%s16052_s2 + $0x2] ss:$0 sm:$0xff] }
 0x321   :  { %11888 = vmatprep.subr.bf16.mxu0 %v12929_v29 }
 0x324   :  { %11889 = vmatpush3.bf16.msra.mxu0 %v12930_v18 }
 0x325   :  { %11890 = vmatprep.subr.bf16.mxu0 %v12933_v31 }
 0x327   :  { %v11792_v58 = vpop.f32.mrb[68].mxu1 }
 0x328   :  { %11891 = vmatpush3.bf16.msra.mxu0 %v12934_v34  ;;  %v11793_v60 = vpop.f32.mrb[69].mxu1 }
 0x329   :  { %11892 = vmatprep.subr.bf16.mxu0 %v12937_v35  ;;  %v15284_v41 = vadd.f32 %v11793_v60, %v11792_v58  ;;  %v11795_v62 = vpop.f32.mrb[70].mxu1  ;;  %v12965_v58 = vld [vmem:[%s16051_s1 + $0x12a8] sm:$0xff]   ;;  %v12967_v60 = vld [vmem:[%s16053_s3 + $0x90] sm:$0xff]  }
 0x32a   :  { %v11796_v56 = vpop.f32.mrb[71].mxu1  ;;  %v12968_v62 = vld [vmem:[%s16051_s1 + $0x12b0] sm:$0xff]  }
 0x32b   :  { %v12969_v56 = vld [vmem:[%s16051_s1 + $0x1270] sm:$0xff]  }
 0x32c   :  { %11893 = vmatpush3.bf16.msra.mxu0 %v12938_v37 }
 0x32d   :  { %11894 = vmatprep.subr.bf16.mxu0 %v12941_v42 }
 0x330   :  { %11895 = vmatpush3.bf16.msra.mxu0 %v12942_v25 }
 0x331   :  { %11896 = vmatprep.subr.bf16.mxu0 %v12945_v43 }
 0x334   :  { %11897 = vmatpush3.bf16.msra.mxu0 %v12946_v46  ;;  %v12961_v46 = vld [vmem:[%s16053_s3 + $0x80] sm:$0xff]  }
 0x335   :  { %11898 = vmatprep.subr.bf16.mxu0 %v12949_v53  ;;  %v12962_v53 = vld [vmem:[%s16051_s1 + $0x12a0] sm:$0xff]   ;;  %12299 = vmatpush3.bf16.msra.mxu1 %v12961_v46  ;;  %v12984_v46 = vld [vmem:[%s16051_s1 + $0x1298] sm:$0xff]  }
 0x336   :  { %12300 = vmatprep.subr.bf16.mxu1 %v13198_v30 }
 0x338   :  { %11899 = vmatpush3.bf16.msra.mxu0 %v12950_v38  ;;  %v12963_v38 = vld [vmem:[%s16051_s1 + $0x1260] sm:$0xff]  }
 0x339   :  { %11900 = vmatprep.subr.bf16.mxu0 %v12953_v59  ;;  %v12966_v59 = vld [vmem:[%s16051_s1 + $0x1268] sm:$0xff]  }
 0x33c   :  { %11901 = vmatpush3.bf16.msra.mxu0 %v12954_v63 }
 0x33d   :  { %12286 = vmatprep.subr.bf16.mxu0 %v13198_v30 }
 0x33f   :  { %6634 = vmatmul.mubr.bf16.vlgmr.msra.gmra.mrb[72].mxu0 %v13936_v21 }
 0x340   :  { %12287 = vmatpush3.bf16.msra.mxu0 %v12957_v0  ;;  %12294 = vmatprep.mubr.msk.bf16.mxu0 %vm13199_vm0, %v13198_v30 }
 0x341   :  { %12288 = vmatprep.subr.bf16.mxu0 %v13198_v30 }
 0x344   :  { %12289 = vmatpush3.bf16.msra.mxu0 %v12958_v3  ;;  %v12970_v3 = vld [vmem:[%s16053_s3 + $0x98] sm:$0xff]  }
 0x345   :  { %12290 = vmatprep.subr.bf16.mxu0 %v13198_v30 }
 0x347   :  { %v11836_v13 = vpop.f32.mrb[72].mxu1 }
 0x348   :  { %12291 = vmatpush3.bf16.msra.mxu0 %v12959_v4  ;;  %v11837_v15 = vpop.f32.mrb[73].mxu1 }
 0x349   :  { %12292 = vmatprep.subr.bf16.mxu0 %v13198_v30  ;;  %v15314_v19 = vadd.f32 %v11837_v15, %v11836_v13  ;;  %v11839_v20 = vpop.f32.mrb[74].mxu1  ;;  %v12972_v13 = vld [vmem:[%s16051_s1 + $0x1278] sm:$0xff]  }
 0x34a   :  { %v11840_v23 = vpop.f32.mrb[75].mxu1  ;;  %v12973_v20 = vld [vmem:[%s16053_s3 + $0xa0] sm:$0xff]  }
 0x34b   :  { %v12974_v23 = vld [vmem:[%s16051_s1 + $0x12c0] sm:$0xff]  }
 0x34c   :  { %12293 = vmatpush3.bf16.msra.mxu0 %v12960_v6 }
 0x34d   :  { %11944 = vmatprep.subr.bf16.mxu0 %v12962_v53  ;;  %v12985_v53 = vld [vmem:[%s16051_s1 + $0x1320] sm:$0xff]  }
 0x34f   :  { %12295 = vmatmul.mubr.msk.bf16.vlgmr.msra.gmra.mrb[76].mxu0 %vm1790_vm1, %v14003_v57 }
 0x350   :  { %8438 = vmatprep.mubr.bf16.mxu0 %v13348_v47  ;;  %11945 = vmatpush3.bf16.msra.mxu0 %v12963_v38  ;;  %v12987_v38 = vld [vmem:[%s16051_s1 + $0x13a0] sm:$0xff]  }
 0x351   :  { %11946 = vmatprep.subr.bf16.mxu0 %v12965_v58  ;;  %v12988_v58 = vld [vmem:[%s16051_s1 + $0x1360] sm:$0xff]  }
 0x352   :  { %v4530_v7 = vpop.f32.mrb[48].mxu0 }
 0x353   :  { %v15312_v9 = vadd.f32 %v14965_v54, %v4530_v7  ;;  %v12264_v10 = vpop.f32.mrb[49].mxu0  ;;  %v12971_v7 = vld [vmem:[%s16051_s1 + $0x12b8] sm:$0xff]  }
 0x354   :  { %v4533_v12 = vpop.f32.mrb[50].mxu0  ;;  %11947 = vmatpush3.bf16.msra.mxu0 %v12966_v59  ;;  %v12992_v59 = vld [vmem:[%s16051_s1 + $0x1368] sm:$0xff]  }
 0x355   :  { %v12265_v14 = vpop.f32.mrb[51].mxu0  ;;  %11948 = vmatprep.subr.bf16.mxu0 %v12968_v62 }
 0x358   :  { %11949 = vmatpush3.bf16.msra.mxu0 %v12969_v56 }
 0x359   :  { %11950 = vmatprep.subr.bf16.mxu0 %v12971_v7 }
 0x35c   :  { %11951 = vmatpush3.bf16.msra.mxu0 %v12972_v13  ;;  %v13007_v13 = vld [vmem:[%s16051_s1 + $0x13c8] sm:$0xff]  }
 0x35d   :  { %11952 = vmatprep.subr.bf16.mxu0 %v12974_v23  ;;  %v13016_v23 = vld [vmem:[%s16051_s1 + $0x1398] sm:$0xff]  }
 0x367   :  { %v11880_v54 = vpop.f32.mrb[76].mxu1 }
 0x368   :  { %v11881_v35 = vpop.f32.mrb[77].mxu1 }
 0x369   :  { %v15319_v37 = vadd.f32 %v11881_v35, %v11880_v54  ;;  %v11883_v42 = vpop.f32.mrb[78].mxu1  ;;  %v12976_v54 = vld [vmem:[%s16053_s3 + $0xa8] sm:$0xff]   ;;  %v12980_v35 = vld [vmem:[%s16051_s1 + $0x12d0] sm:$0xff]  }
 0x36a   :  { %v11884_v43 = vpop.f32.mrb[79].mxu1  ;;  %v12981_v42 = vld [vmem:[%s16051_s1 + $0x1290] sm:$0xff]  }
 0x36b   :  { %v12983_v43 = vld [vmem:[%s16051_s1 + $0x12d8] sm:$0xff]  }
 0x372   :  { %v11682_v24 = vpop.f32.mrb[52].mxu0 }
 0x373   :  { %v11683_v29 = vpop.f32.mrb[53].mxu0 }
 0x374   :  { %v11684_v47 = vadd.f32 %v11683_v29, %v11682_v24  ;;  %v11685_v18 = vpop.f32.mrb[54].mxu0 }
 0x375   :  { %v11686_v31 = vpop.f32.mrb[55].mxu0 }
 0x376   :  { %v6236_v34 = vadd.f32 %v11684_v47, %v10272_v26  ;;  %v12975_v26 = vld [vmem:[%s16051_s1 + $0x1280] sm:$0xff]   ;;  %v12977_v31 = vld [vmem:[%s16051_s1 + $0x12c8] sm:$0xff]  }
 0x377   :  { %11953 = vmatpush3.bf16.msra.mxu0 %v12975_v26  ;;  %v13019_v26 = vld [vmem:[%s16051_s1 + $0x14a0] sm:$0xff]  }
 0x378   :  { %v6276_v25 = vadd.f32 %v15180_v51, %v6236_v34  ;;  %v12964_v51 = vld [vmem:[%s16053_s3 + $0x88] sm:$0xff]   ;;  %11954 = vmatprep.subr.bf16.mxu0 %v12977_v31  ;;  %v13027_v31 = vld [vmem:[%s16051_s1 + $0x14b0] sm:$0xff]  }
 0x379   :  { %12301 = vmatpush3.bf16.msra.mxu1 %v12964_v51  ;;  %v12978_v34 = vld [vmem:[%s16051_s1 + $0x1288] sm:$0xff]  }
 0x37a   :  { %12302 = vmatprep.subr.bf16.mxu1 %v13198_v30  ;;  %v12991_v51 = vld [vmem:[%s16051_s1 + $0x13a8] sm:$0xff]  }
 0x37b   :  { %11955 = vmatpush3.bf16.msra.mxu0 %v12978_v34 }
 0x37c   :  { %11956 = vmatprep.subr.bf16.mxu0 %v12980_v35 }
 0x37d   :  { %12303 = vmatpush3.bf16.msra.mxu1 %v12967_v60 }
 0x37e   :  { %12304 = vmatprep.subr.bf16.mxu1 %v13198_v30 }
 0x37f   :  { %11957 = vmatpush3.bf16.msra.mxu0 %v12981_v42  ;;  %v13031_v42 = vld [vmem:[%s16051_s1 + $0x14b8] sm:$0xff]  }
 0x380   :  { %11958 = vmatprep.subr.bf16.mxu0 %v12983_v43  ;;  %v13032_v43 = vld [vmem:[%s16051_s1 + $0x1478] sm:$0xff]  }
 0x381   :  { %12305 = vmatpush3.bf16.msra.mxu1 %v12970_v3  ;;  %v12999_v3 = vld [vmem:[%s16051_s1 + $0x13b8] sm:$0xff]  }
 0x382   :  { %12306 = vmatprep.subr.bf16.mxu1 %v13198_v30 }
 0x383   :  { %11959 = vmatpush3.bf16.msra.mxu0 %v12984_v46 }
 0x384   :  { %11988 = vmatprep.subr.bf16.mxu0 %v12987_v38  ;;  %v13036_v38 = vld [vmem:[%s16051_s1 + $0x1480] sm:$0xff]  }
 0x385   :  { %12307 = vmatpush3.bf16.msra.mxu1 %v12973_v20  ;;  %v13015_v20 = vld [vmem:[%s16051_s1 + $0x13d8] sm:$0xff]  }
 0x386   :  { %12308 = vmatprep.subr.bf16.mxu1 %v13198_v30  ;;  %8439 = vmatmul.mubr.bf16.vlgmr.msra.gmra.mrb[80].mxu0 %v13343_v45  ;;  %v12995_v45 = vld [vmem:[%s16051_s1 + $0x13b0] sm:$0xff]  }
 0x387   :  { %v11924_v12 = vpop.f32.mrb[80].mxu1  ;;  %8518 = vmatprep.mubr.bf16.mxu0 %v13354_v49  ;;  %11989 = vmatpush3.bf16.msra.mxu0 %v12988_v58  ;;  %v12996_v49 = vld [vmem:[%s16051_s1 + $0x1370] sm:$0xff]   ;;  %v13039_v58 = vld [vmem:[%s16051_s1 + $0x14c8] sm:$0xff]  }
 0x388   :  { %v11925_v15 = vpop.f32.mrb[81].mxu1  ;;  %11990 = vmatprep.subr.bf16.mxu0 %v12991_v51  ;;  %v13040_v51 = vld [vmem:[%s16051_s1 + $0x1488] sm:$0xff]  }
 0x389   :  { %v15368_v24 = vadd.f32 %v11925_v15, %v11924_v12  ;;  %v11927_v29 = vpop.f32.mrb[82].mxu1  ;;  %12309 = vmatpush3.bf16.msra.mxu1 %v12976_v54  ;;  %v13004_v12 = vld [vmem:[%s16051_s1 + $0x1380] sm:$0xff]   ;;  %v13012_v15 = vld [vmem:[%s16051_s1 + $0x1390] sm:$0xff]  }
 0x38a   :  { %v11928_v18 = vpop.f32.mrb[83].mxu1  ;;  %12310 = vmatprep.subr.bf16.mxu1 %v13198_v30  ;;  %v13020_v29 = vld [vmem:[%s16051_s1 + $0x1460] sm:$0xff]  }
 0x38b   :  { %11991 = vmatpush3.bf16.msra.mxu0 %v12992_v59  ;;  %v13024_v18 = vld [vmem:[%s16051_s1 + $0x1468] sm:$0xff]   ;;  %v13044_v59 = vld [vmem:[%s16051_s1 + $0x1490] sm:$0xff]  }
 0x38c   :  { %11992 = vmatprep.subr.bf16.mxu0 %v12995_v45  ;;  %v13047_v45 = vld [vmem:[%s16051_s1 + $0x14d8] sm:$0xff]  }
 0x38f   :  { %11993 = vmatpush3.bf16.msra.mxu0 %v12996_v49  ;;  %v13051_v49 = vld [vmem:[%s16051_s1 + $0x15a0] sm:$0xff]  }
 0x390   :  { %11994 = vmatprep.subr.bf16.mxu0 %v12999_v3 }
 0x392   :  { %v11726_v63 = vpop.f32.mrb[56].mxu0 }
 0x393   :  { %v11727_v0 = vpop.f32.mrb[57].mxu0 }
 0x394   :  { %v11728_v4 = vadd.f32 %v11727_v0, %v11726_v63  ;;  %v11729_v6 = vpop.f32.mrb[58].mxu0 }
 0x395   :  { %v11730_v10 = vpop.f32.mrb[59].mxu0  ;;  %v13000_v6 = vld [vmem:[%s16051_s1 + $0x1378] sm:$0xff]  }
 0x396   :  { %v6316_v14 = vadd.f32 %v11728_v4, %v6276_v25  ;;  %v12982_v25 = vld [vmem:[%s16053_s3 + $0xb8] sm:$0xff]   ;;  %11995 = vmatpush3.bf16.msra.mxu0 %v13000_v6  ;;  %v13003_v10 = vld [vmem:[%s16051_s1 + $0x13c0] sm:$0xff]  }
 0x397   :  { %11996 = vmatprep.subr.bf16.mxu0 %v13003_v10  ;;  %v13063_v10 = vld [vmem:[%s16051_s1 + $0x15b8] sm:$0xff]  }
 0x398   :  { %v6356_v47 = vadd.f32 %v15232_v16, %v6316_v14  ;;  %v12979_v16 = vld [vmem:[%s16053_s3 + $0xb0] sm:$0xff]   ;;  %v13008_v14 = vld [vmem:[%s16051_s1 + $0x1388] sm:$0xff]  }
 0x399   :  { %12311 = vmatpush3.bf16.msra.mxu1 %v12979_v16 }
 0x39a   :  { %12312 = vmatprep.subr.bf16.mxu1 %v13198_v30  ;;  %11997 = vmatpush3.bf16.msra.mxu0 %v13004_v12 }
 0x39b   :  { %11998 = vmatprep.subr.bf16.mxu0 %v13007_v13  ;;  %v13064_v13 = vld [vmem:[%s16051_s1 + $0x1578] sm:$0xff]  }
 0x39d   :  { %12313 = vmatpush3.bf16.msra.mxu1 %v12982_v25 }
 0x39e   :  { %11966 = vmatprep.subr.bf16.mxu1 %v12985_v53  ;;  %11999 = vmatpush3.bf16.msra.mxu0 %v13008_v14  ;;  %v13035_v53 = vld [vmem:[%s16051_s1 + $0x14c0] sm:$0xff]  }
 0x3b2   :  { %v11770_v60 = vpop.f32.mrb[60].mxu0 }
 0x3b3   :  { %v11771_v62 = vpop.f32.mrb[61].mxu0 }
 0x3b4   :  { %v11772_v56 = vadd.f32 %v11771_v62, %v11770_v60  ;;  %v11773_v63 = vpop.f32.mrb[62].mxu0  ;;  %v13048_v60 = vld [vmem:[%s16051_s1 + $0x1498] sm:$0xff]   ;;  %v13052_v62 = vld [vmem:[%s16051_s1 + $0x1560] sm:$0xff]  }
 0x3b5   :  { %v11774_v0 = vpop.f32.mrb[63].mxu0  ;;  %v13056_v63 = vld [vmem:[%s16051_s1 + $0x1568] sm:$0xff]  }
 0x3b6   :  { %v6396_v4 = vadd.f32 %v11772_v56, %v6356_v47  ;;  %v13023_v47 = vld [vmem:[%s16051_s1 + $0x14a8] sm:$0xff]   ;;  %v13059_v0 = vld [vmem:[%s16051_s1 + $0x15b0] sm:$0xff]  }
 0x3b7   :  { %v13055_v56 = vld [vmem:[%s16051_s1 + $0x15a8] sm:$0xff]  }
 0x3b8   :  { %v6436_v7 = vadd.f32 %v15284_v41, %v6396_v4  ;;  %v13011_v41 = vld [vmem:[%s16051_s1 + $0x13d0] sm:$0xff]  }
 0x3b9   :  { %12000 = vmatprep.subr.bf16.mxu0 %v13011_v41  ;;  %v13067_v41 = vld [vmem:[%s16051_s1 + $0x15c0] sm:$0xff]  }
 0x3ba   :  { %12001 = vmatpush3.bf16.msra.mxu0 %v13012_v15  ;;  %v13068_v15 = vld [vmem:[%s16051_s1 + $0x1580] sm:$0xff]  }
 0x3bb   :  { %12002 = vmatprep.subr.bf16.mxu0 %v13015_v20  ;;  %v13071_v20 = vld [vmem:[%s16051_s1 + $0x15c8] sm:$0xff]  }
 0x3be   :  { %12003 = vmatpush3.bf16.msra.mxu0 %v13016_v23  ;;  %v13072_v23 = vld [vmem:[%s16051_s1 + $0x1588] sm:$0xff]  }
 0x3bf   :  { %12032 = vmatprep.subr.bf16.mxu0 %v13019_v26  ;;  %v13076_v26 = vld [vmem:[%s16051_s1 + $0x1590] sm:$0xff]  }
 0x3c1   :  { %8519 = vmatmul.mubr.bf16.vlgmr.msra.gmra.mrb[84].mxu0 %v13460_v17  ;;  %v13028_v17 = vld [vmem:[%s16051_s1 + $0x1470] sm:$0xff]  }
 0x3c2   :  { %12033 = vmatpush3.bf16.msra.mxu0 %v13020_v29  ;;  %8598 = vmatprep.mubr.bf16.mxu0 %v13566_v61  ;;  %v13079_v29 = vld [vmem:[%s16051_s1 + $0x15d8] sm:$0xff]  }
 0x3c3   :  { %12034 = vmatprep.subr.bf16.mxu0 %v13023_v47  ;;  %v13080_v47 = vld [vmem:[%s16051_s1 + $0x1598] sm:$0xff]  }
 0x3c6   :  { %12035 = vmatpush3.bf16.msra.mxu0 %v13024_v18  ;;  %v13083_v18 = vld [vmem:[%s16051_s1 + $0x16a0] sm:$0xff]  }
 0x3c7   :  { %12036 = vmatprep.subr.bf16.mxu0 %v13027_v31  ;;  %v13084_v31 = vld [vmem:[%s16051_s1 + $0x1660] sm:$0xff]  }
 0x3ca   :  { %12037 = vmatpush3.bf16.msra.mxu0 %v13028_v17  ;;  %v13088_v17 = vld [vmem:[%s16051_s1 + $0x1668] sm:$0xff]  }
 0x3cb   :  { %12038 = vmatprep.subr.bf16.mxu0 %v13031_v42 }
 0x3ce   :  { %12039 = vmatpush3.bf16.msra.mxu0 %v13032_v43 }
 0x3cf   :  { %12040 = vmatprep.subr.bf16.mxu0 %v13035_v53 }
 0x3d2   :  { %v11814_v54 = vpop.f32.mrb[64].mxu0  ;;  %12041 = vmatpush3.bf16.msra.mxu0 %v13036_v38  ;;  %v13099_v38 = vld [vmem:[%s16051_s1 + $0x16c0] sm:$0xff]  }
 0x3d3   :  { %v11815_v61 = vpop.f32.mrb[65].mxu0  ;;  %12042 = vmatprep.subr.bf16.mxu0 %v13039_v58  ;;  %v13100_v58 = vld [vmem:[%s16051_s1 + $0x1680] sm:$0xff]  }
 0x3d4   :  { %v11816_v34 = vadd.f32 %v11815_v61, %v11814_v54  ;;  %v11817_v16 = vpop.f32.mrb[66].mxu0  ;;  %v13087_v54 = vld [vmem:[%s16051_s1 + $0x16a8] sm:$0xff]   ;;  %v13091_v61 = vld [vmem:[%s16051_s1 + $0x16b0] sm:$0xff]  }
 0x3d5   :  { %v11818_v35 = vpop.f32.mrb[67].mxu0 }
 0x3d6   :  { %v6476_v25 = vadd.f32 %v11816_v34, %v6436_v7  ;;  %12043 = vmatpush3.bf16.msra.mxu0 %v13040_v51  ;;  %v13103_v51 = vld [vmem:[%s16051_s1 + $0x16c8] sm:$0xff]  }
 0x3d8   :  { %v6516_v46 = vadd.f32 %v15314_v19, %v6476_v25  ;;  %v13043_v19 = vld [vmem:[%s16051_s1 + $0x14d0] sm:$0xff]   ;;  %v13095_v25 = vld [vmem:[%s16051_s1 + $0x16b8] sm:$0xff]  }
 0x3d9   :  { %12044 = vmatprep.subr.bf16.mxu0 %v13043_v19  ;;  %v13104_v19 = vld [vmem:[%s16051_s1 + $0x1688] sm:$0xff]  }
 0x3da   :  { %12045 = vmatpush3.bf16.msra.mxu0 %v13044_v59 }
 0x3db   :  { %12046 = vmatprep.subr.bf16.mxu0 %v13047_v45  ;;  %v13108_v45 = vld [vmem:[%s16051_s1 + $0x1690] sm:$0xff]  }
 0x3de   :  { %12047 = vmatpush3.bf16.msra.mxu0 %v13048_v60 }
 0x3df   :  { %12076 = vmatprep.subr.bf16.mxu0 %v13051_v49 }
 0x3e1   :  { %8599 = vmatmul.mubr.bf16.vlgmr.msra.gmra.mrb[88].mxu0 %v13582_v2  ;;  %v13060_v2 = vld [vmem:[%s16051_s1 + $0x1570] sm:$0xff]  }
 0x3e2   :  { %12077 = vmatpush3.bf16.msra.mxu0 %v13052_v62  ;;  %8678 = vmatprep.mubr.bf16.mxu0 %v13592_v5 }
 0x3e3   :  { %12078 = vmatprep.subr.bf16.mxu0 %v13055_v56 }
 0x3e6   :  { %12079 = vmatpush3.bf16.msra.mxu0 %v13056_v63 }
 0x3e7   :  { %12080 = vmatprep.subr.bf16.mxu0 %v13059_v0  ;;  %v13111_v0 = vld [vmem:[%s16051_s1 + $0x16d8] sm:$0xff]  }
 0x3ea   :  { %12081 = vmatpush3.bf16.msra.mxu0 %v13060_v2  ;;  %v13112_v2 = vld [vmem:[%s16051_s1 + $0x1698] sm:$0xff]  }
 0x3eb   :  { %12082 = vmatprep.subr.bf16.mxu0 %v13063_v10  ;;  %v13116_v10 = vld [vmem:[%s16051_s1 + $0x1760] sm:$0xff]  }
 0x3ee   :  { %12083 = vmatpush3.bf16.msra.mxu0 %v13064_v13  ;;  %v13119_v13 = vld [vmem:[%s16051_s1 + $0x17a8] sm:$0xff]  }
 0x3ef   :  { %12084 = vmatprep.subr.bf16.mxu0 %v13067_v41  ;;  %v12998_v41 = vld [vmem:[%s16051_s1 + $0x12f8] sm:$0xff]  }
 0x3f2   :  { %v11858_v3 = vpop.f32.mrb[68].mxu0  ;;  %12085 = vmatpush3.bf16.msra.mxu0 %v13068_v15  ;;  %v13124_v15 = vld [vmem:[%s16051_s1 + $0x1770] sm:$0xff]  }
 0x3f3   :  { %v11859_v5 = vpop.f32.mrb[69].mxu0  ;;  %12086 = vmatprep.subr.bf16.mxu0 %v13071_v20  ;;  %v13001_v20 = vld [vmem:[%s16051_s1 + $0x1340] sm:$0xff]  }
 0x3f4   :  { %v11860_v4 = vadd.f32 %v11859_v5, %v11858_v3  ;;  %v11861_v6 = vpop.f32.mrb[70].mxu0  ;;  %v12986_v3 = vld [vmem:[%s16051_s1 + $0x12e0] sm:$0xff]  }
 0x3f5   :  { %v11862_v7 = vpop.f32.mrb[71].mxu0  ;;  %v13115_v6 = vld [vmem:[%s16051_s1 + $0x17a0] sm:$0xff]  }
 0x3f6   :  { %v6556_v12 = vadd.f32 %v11860_v4, %v6516_v46  ;;  %12087 = vmatpush3.bf16.msra.mxu0 %v13072_v23  ;;  %v13096_v46 = vld [vmem:[%s16051_s1 + $0x1678] sm:$0xff]   ;;  %v12989_v4 = vld [vmem:[%s16051_s1 + $0x1328] sm:$0xff]  }
 0x3f7   :  { %v12990_v7 = vld [vmem:[%s16051_s1 + $0x12e8] sm:$0xff]   ;;  %v13127_v23 = vld [vmem:[%s16051_s1 + $0x17b8] sm:$0xff]  }
 0x3f8   :  { %v6596_v14 = vadd.f32 %v15319_v37, %v6556_v12  ;;  %v13075_v37 = vld [vmem:[%s16051_s1 + $0x15d0] sm:$0xff]  }
 0x3f9   :  { %12088 = vmatprep.subr.bf16.mxu0 %v13075_v37  ;;  %v12993_v12 = vld [vmem:[%s16051_s1 + $0x1330] sm:$0xff]   ;;  %v13002_v37 = vld [vmem:[%s16051_s1 + $0x1300] sm:$0xff]  }
 0x3fa   :  { %12089 = vmatpush3.bf16.msra.mxu0 %v13076_v26  ;;  %v13128_v26 = vld [vmem:[%s16051_s1 + $0x1778] sm:$0xff]  }
 0x3fb   :  { %12090 = vmatprep.subr.bf16.mxu0 %v13079_v29  ;;  %v13005_v29 = vld [vmem:[%s16051_s1 + $0x1348] sm:$0xff]  }
 0x3fe   :  { %12091 = vmatpush3.bf16.msra.mxu0 %v13080_v47  ;;  %v13131_v47 = vld [vmem:[%s16051_s1 + $0x17c0] sm:$0xff]  }
 0x3ff   :  { %12120 = vmatprep.subr.bf16.mxu0 %v13083_v18  ;;  %v13006_v18 = vld [vmem:[%s16051_s1 + $0x1308] sm:$0xff]  }
 0x401   :  { %8679 = vmatmul.mubr.bf16.vlgmr.msra.gmra.mrb[92].mxu0 %v13698_v40  ;;  %v13092_v40 = vld [vmem:[%s16051_s1 + $0x1670] sm:$0xff]  }
 0x402   :  { %12121 = vmatpush3.bf16.msra.mxu0 %v13084_v31  ;;  %8758 = vmatprep.mubr.bf16.mxu0 %v13804_v28  ;;  %v13132_v31 = vld [vmem:[%s16051_s1 + $0x1780] sm:$0xff]  }
 0x403   :  { %12122 = vmatprep.subr.bf16.mxu0 %v13087_v54  ;;  %v13009_v54 = vld [vmem:[%s16051_s1 + $0x1350] sm:$0xff]  }
 0x406   :  { %12123 = vmatpush3.bf16.msra.mxu0 %v13088_v17  ;;  %v13135_v17 = vld [vmem:[%s16051_s1 + $0x17c8] sm:$0xff]  }
 0x407   :  { %12124 = vmatprep.subr.bf16.mxu0 %v13091_v61  ;;  %v13010_v61 = vld [vmem:[%s16051_s1 + $0x1310] sm:$0xff]  }
 0x40a   :  { %12125 = vmatpush3.bf16.msra.mxu0 %v13092_v40  ;;  %v13013_v40 = vld [vmem:[%s16051_s1 + $0x1358] sm:$0xff]  }
 0x40b   :  { %12126 = vmatprep.subr.bf16.mxu0 %v13095_v25  ;;  %v13143_v25 = vld [vmem:[%s16051_s1 + $0x17d8] sm:$0xff]  }
 0x40e   :  { %12127 = vmatpush3.bf16.msra.mxu0 %v13096_v46  ;;  %v13144_v46 = vld [vmem:[%s16051_s1 + $0x1798] sm:$0xff]  }
 0x40f   :  { %12128 = vmatprep.subr.bf16.mxu0 %v13099_v38  ;;  %v13022_v38 = vld [vmem:[%s16051_s1 + $0x13e8] sm:$0xff]  }
 0x412   :  { %v11902_v34 = vpop.f32.mrb[72].mxu0  ;;  %12129 = vmatpush3.bf16.msra.mxu0 %v13100_v58  ;;  %v13025_v58 = vld [vmem:[%s16051_s1 + $0x1430] sm:$0xff]  }
 0x413   :  { %v11903_v28 = vpop.f32.mrb[73].mxu0  ;;  %12130 = vmatprep.subr.bf16.mxu0 %v13103_v51  ;;  %v13030_v51 = vld [vmem:[%s16051_s1 + $0x13f8] sm:$0xff]  }
 0x414   :  { %v11904_v16 = vadd.f32 %v11903_v28, %v11902_v34  ;;  %v11905_v35 = vpop.f32.mrb[74].mxu0  ;;  %v13136_v34 = vld [vmem:[%s16051_s1 + $0x1788] sm:$0xff]   ;;  %v13139_v28 = vld [vmem:[%s16051_s1 + $0x17d0] sm:$0xff]  }
 0x415   :  { %v11906_v42 = vpop.f32.mrb[75].mxu0  ;;  %v13140_v35 = vld [vmem:[%s16051_s1 + $0x1790] sm:$0xff]  }
 0x416   :  { %v6636_v43 = vadd.f32 %v11904_v16, %v6596_v14  ;;  %12131 = vmatpush3.bf16.msra.mxu0 %v13104_v19  ;;  %v13120_v14 = vld [vmem:[%s16051_s1 + $0x1768] sm:$0xff]   ;;  %v13014_v16 = vld [vmem:[%s16051_s1 + $0x1318] sm:$0xff]   ;;  %v13017_v42 = vld [vmem:[%s16051_s1 + $0x1420] sm:$0xff]  }
 0x417   :  { %v13034_v19 = vld [vmem:[%s16051_s1 + $0x1400] sm:$0xff]  }
 0x418   :  { %v6676_v53 = vadd.f32 %v15368_v24, %v6636_v43  ;;  %v13107_v24 = vld [vmem:[%s16051_s1 + $0x16d0] sm:$0xff]   ;;  %v13018_v43 = vld [vmem:[%s16051_s1 + $0x13e0] sm:$0xff]  }
 0x419   :  { %12132 = vmatprep.subr.bf16.mxu0 %v13107_v24  ;;  %v13037_v24 = vld [vmem:[%s16051_s1 + $0x1448] sm:$0xff]  }
 0x41a   :  { %12133 = vmatpush3.bf16.msra.mxu0 %v13108_v45  ;;  %v13155_v45 = vld [vmem:[%s16051_s1 + $0x1860] sm:$0xff]  }
 0x41b   :  { %12134 = vmatprep.subr.bf16.mxu0 %v13111_v0  ;;  %v13161_v0 = vld [vmem:[%s16051_s1 + $0x1870] sm:$0xff]  }
 0x41e   :  { %12135 = vmatpush3.bf16.msra.mxu0 %v13112_v2  ;;  %v13050_v2 = vld [vmem:[%s16051_s1 + $0x14e0] sm:$0xff]  }
 0x41f   :  { %12164 = vmatprep.subr.bf16.mxu0 %v13115_v6  ;;  %v13054_v6 = vld [vmem:[%s16051_s1 + $0x14e8] sm:$0xff]  }
 0x421   :  { %8759 = vmatmul.mubr.bf16.vlgmr.msra.gmra.mrb[96].mxu0 %v13820_v33  ;;  %v12997_v33 = vld [vmem:[%s16051_s1 + $0x1338] sm:$0xff]  }
 0x422   :  { %v6715_v59 = vpop.f32.mrb[76].mxu0  ;;  %8838 = vmatprep.mubr.bf16.mxu0 %v13830_v36  ;;  %12165 = vmatpush3.bf16.msra.mxu0 %v13116_v10  ;;  %v13123_v36 = vld [vmem:[%s16051_s1 + $0x17b0] sm:$0xff]   ;;  %v13062_v10 = vld [vmem:[%s16051_s1 + $0x14f8] sm:$0xff]  }
 0x423   :  { %v6716_v60 = vadd.f32 %v6715_v59, %v6676_v53  ;;  %v12296_v49 = vpop.f32.mrb[77].mxu0  ;;  %12166 = vmatprep.subr.bf16.mxu0 %v13119_v13  ;;  %v13021_v53 = vld [vmem:[%s16051_s1 + $0x1428] sm:$0xff]  }
 0x424   :  { %v6718_v62 = vpop.f32.mrb[78].mxu0  ;;  %v13038_v59 = vld [vmem:[%s16051_s1 + $0x1408] sm:$0xff]   ;;  %v13042_v49 = vld [vmem:[%s16051_s1 + $0x1410] sm:$0xff]  }
 0x425   :  { %v6721_v56 = vmax.f32 %v6716_v60, 0.0  ;;  %v12297_v63 = vpop.f32.mrb[79].mxu0  ;;  %v13041_v60 = vld [vmem:[%s16051_s1 + $0x1450] sm:$0xff]   ;;  %v13158_v62 = vld [vmem:[%s16051_s1 + $0x1868] sm:$0xff]  }
 0x426   :  { %12167 = vmatpush3.bf16.msra.mxu0 %v13120_v14  ;;  %v13046_v63 = vld [vmem:[%s16051_s1 + $0x1418] sm:$0xff]   ;;  %v13069_v13 = vld [vmem:[%s16051_s1 + $0x1548] sm:$0xff]   ;;  %v13073_v14 = vld [vmem:[%s16051_s1 + $0x1550] sm:$0xff]  }
 0x427   :  { %v6722_v5 = vpack.c.bf16 %v6721_v56, %v6721_v56  ;;  %12168 = vmatprep.subr.bf16.mxu0 %v13123_v36  ;;  %v13045_v56 = vld [vmem:[%s16051_s1 + $0x1458] sm:$0xff]  }
 0x428   :  { %v13077_v36 = vld [vmem:[%s16051_s1 + $0x1558] sm:$0xff]  }
 0x429   :  { %12315 = vmatmul.mubr.bf16.vlgmr.msra.gmra.mrb[84].mxu1 %v6722_v5  ;;  %v13164_v5 = vld [vmem:[%s16051_s1 + $0x1878] sm:$0xff]  }
 0x42a   :  { %11967 = vmatpush3.bf16.msra.mxu1 %v12986_v3  ;;  %8478 = vmatprep.mubr.bf16.mxu1 %v13366_v52  ;;  %v12994_v52 = vld [vmem:[%s16051_s1 + $0x12f0] sm:$0xff]   ;;  %v13049_v3 = vld [vmem:[%s16051_s1 + $0x1520] sm:$0xff]  }
 0x42b   :  { %11968 = vmatprep.subr.bf16.mxu1 %v12989_v4  ;;  %12169 = vmatpush3.bf16.msra.mxu0 %v13124_v15  ;;  %v13053_v4 = vld [vmem:[%s16051_s1 + $0x1528] sm:$0xff]  }
 0x42c   :  { %12170 = vmatprep.subr.bf16.mxu0 %v13127_v23 }
 0x42e   :  { %11969 = vmatpush3.bf16.msra.mxu1 %v12990_v7  ;;  %v13057_v7 = vld [vmem:[%s16051_s1 + $0x1530] sm:$0xff]  }
 0x42f   :  { %11970 = vmatprep.subr.bf16.mxu1 %v12993_v12  ;;  %12171 = vmatpush3.bf16.msra.mxu0 %v13128_v26  ;;  %v13066_v12 = vld [vmem:[%s16051_s1 + $0x1500] sm:$0xff]  }
 0x430   :  { %12172 = vmatprep.subr.bf16.mxu0 %v13131_v47  ;;  %v13082_v47 = vld [vmem:[%s16051_s1 + $0x15e0] sm:$0xff]  }
 0x432   :  { %11971 = vmatpush3.bf16.msra.mxu1 %v12994_v52  ;;  %v13070_v52 = vld [vmem:[%s16051_s1 + $0x1508] sm:$0xff]  }
 0x433   :  { %11972 = vmatprep.subr.bf16.mxu1 %v12997_v33  ;;  %12173 = vmatpush3.bf16.msra.mxu0 %v13132_v31  ;;  %v13074_v33 = vld [vmem:[%s16051_s1 + $0x1510] sm:$0xff]   ;;  %v13086_v31 = vld [vmem:[%s16051_s1 + $0x15e8] sm:$0xff]  }
 0x434   :  { %12174 = vmatprep.subr.bf16.mxu0 %v13135_v17  ;;  %v13090_v17 = vld [vmem:[%s16051_s1 + $0x15f0] sm:$0xff]  }
 0x436   :  { %11973 = vmatpush3.bf16.msra.mxu1 %v12998_v41 }
 0x437   :  { %11974 = vmatprep.subr.bf16.mxu1 %v13001_v20  ;;  %12175 = vmatpush3.bf16.msra.mxu0 %v13136_v34  ;;  %v13098_v34 = vld [vmem:[%s16051_s1 + $0x1600] sm:$0xff]  }
 0x438   :  { %12176 = vmatprep.subr.bf16.mxu0 %v13139_v28  ;;  %v13102_v28 = vld [vmem:[%s16051_s1 + $0x1608] sm:$0xff]  }
 0x43a   :  { %11975 = vmatpush3.bf16.msra.mxu1 %v13002_v37  ;;  %v13078_v37 = vld [vmem:[%s16051_s1 + $0x1518] sm:$0xff]  }
 0x43b   :  { %11976 = vmatprep.subr.bf16.mxu1 %v13005_v29  ;;  %12177 = vmatpush3.bf16.msra.mxu0 %v13140_v35  ;;  %v13081_v29 = vld [vmem:[%s16051_s1 + $0x1620] sm:$0xff]   ;;  %v13106_v35 = vld [vmem:[%s16051_s1 + $0x1610] sm:$0xff]  }
 0x43c   :  { %12178 = vmatprep.subr.bf16.mxu0 %v13143_v25  ;;  %v13109_v25 = vld [vmem:[%s16051_s1 + $0x1658] sm:$0xff]  }
 0x43e   :  { %11977 = vmatpush3.bf16.msra.mxu1 %v13006_v18  ;;  %v13085_v18 = vld [vmem:[%s16051_s1 + $0x1628] sm:$0xff]  }
 0x43f   :  { %11978 = vmatprep.subr.bf16.mxu1 %v13009_v54  ;;  %12179 = vmatpush3.bf16.msra.mxu0 %v13144_v46  ;;  %v13089_v54 = vld [vmem:[%s16051_s1 + $0x1630] sm:$0xff]  }
 0x440   :  { %12318 = vmatprep.subr.bf16.mxu0 %v13198_v30 }
 0x442   :  { %11979 = vmatpush3.bf16.msra.mxu1 %v13010_v61  ;;  %8839 = vmatmul.mubr.bf16.vlgmr.msra.gmra.mrb[100].mxu0 %v13936_v21  ;;  %v13033_v21 = vld [vmem:[%s16051_s1 + $0x1440] sm:$0xff]  }
 0x443   :  { %11980 = vmatprep.subr.bf16.mxu1 %v13013_v40  ;;  %12326 = vmatprep.mubr.msk.bf16.mxu0 %vm13199_vm0, %v13198_v30  ;;  %v13097_v61 = vld [vmem:[%s16051_s1 + $0x1640] sm:$0xff]   ;;  %v13101_v40 = vld [vmem:[%s16051_s1 + $0x1648] sm:$0xff]  }
 0x444   :  { %12319 = vmatpush3.bf16.msra.mxu0 %v13155_v45  ;;  %v13130_v45 = vld [vmem:[%s16051_s1 + $0x1700] sm:$0xff]  }
 0x445   :  { %12320 = vmatprep.subr.bf16.mxu0 %v13198_v30 }
 0x446   :  { %11981 = vmatpush3.bf16.msra.mxu1 %v13014_v16  ;;  %v13105_v16 = vld [vmem:[%s16051_s1 + $0x1650] sm:$0xff]  }
 0x447   :  { %12010 = vmatprep.subr.bf16.mxu1 %v13017_v42 }
 0x448   :  { %12321 = vmatpush3.bf16.msra.mxu0 %v13158_v62  ;;  %v13137_v62 = vld [vmem:[%s16051_s1 + $0x1750] sm:$0xff]  }
 0x449   :  { %8479 = vmatmul.mubr.bf16.vlgmr.msra.gmra.mrb[88].mxu1 %v13358_v50  ;;  %v13026_v50 = vld [vmem:[%s16051_s1 + $0x13f0] sm:$0xff]   ;;  %12322 = vmatprep.subr.bf16.mxu0 %v13198_v30 }
 0x44a   :  { %12011 = vmatpush3.bf16.msra.mxu1 %v13018_v43  ;;  %8558 = vmatprep.mubr.bf16.mxu1 %v13377_v55  ;;  %v13029_v55 = vld [vmem:[%s16051_s1 + $0x1438] sm:$0xff]  }
 0x44b   :  { %12012 = vmatprep.subr.bf16.mxu1 %v13021_v53 }
 0x44c   :  { %12323 = vmatpush3.bf16.msra.mxu0 %v13161_v0  ;;  %v13141_v0 = vld [vmem:[%s16051_s1 + $0x1758] sm:$0xff]  }
 0x44d   :  { %12324 = vmatprep.subr.bf16.mxu0 %v13198_v30 }
 0x44e   :  { %12013 = vmatpush3.bf16.msra.mxu1 %v13022_v38 }
 0x44f   :  { %12014 = vmatprep.subr.bf16.mxu1 %v13025_v58  ;;  %v13110_v58 = vld [vmem:[%s16051_s1 + $0x1618] sm:$0xff]  }
 0x450   :  { %12325 = vmatpush3.bf16.msra.mxu0 %v13164_v5 }
 0x451   :  { %12330 = vmatprep.subr.bf16.mxu0 %v13198_v30 }
 0x452   :  { %12015 = vmatpush3.bf16.msra.mxu1 %v13026_v50  ;;  %v13113_v50 = vld [vmem:[%s16051_s1 + $0x1720] sm:$0xff]  }
 0x453   :  { %12016 = vmatprep.subr.bf16.mxu1 %v13029_v55  ;;  %12327 = vmatmul.mubr.msk.bf16.vlgmr.msra.gmra.mrb[104].mxu0 %vm1790_vm1, %v14003_v57  ;;  %v13065_v57 = vld [vmem:[%s16051_s1 + $0x1540] sm:$0xff]  }
 0x454   :  { %12346 = vmatprep.mubr.msk.bf16.mxu0 %vm13199_vm0, %v13198_v30  ;;  %v13114_v55 = vld [vmem:[%s16051_s1 + $0x16e0] sm:$0xff]  }
 0x456   :  { %12017 = vmatpush3.bf16.msra.mxu1 %v13030_v51  ;;  %v13117_v51 = vld [vmem:[%s16051_s1 + $0x1728] sm:$0xff]  }
 0x457   :  { %12018 = vmatprep.subr.bf16.mxu1 %v13033_v21  ;;  %v13118_v21 = vld [vmem:[%s16051_s1 + $0x16e8] sm:$0xff]  }
 0x459   :  { %v11960_v41 = vpop.f32.mrb[80].mxu0 }
 0x45a   :  { %12019 = vmatpush3.bf16.msra.mxu1 %v13034_v19  ;;  %v11961_v15 = vpop.f32.mrb[81].mxu0  ;;  %v13121_v19 = vld [vmem:[%s16051_s1 + $0x1730] sm:$0xff]  }
 0x45b   :  { %12020 = vmatprep.subr.bf16.mxu1 %v13037_v24  ;;  %v15828_v20 = vadd.f32 %v11961_v15, %v11960_v41  ;;  %v11963_v23 = vpop.f32.mrb[82].mxu0  ;;  %v13122_v24 = vld [vmem:[%s16051_s1 + $0x16f0] sm:$0xff]  }
 0x45c   :  { %v11964_v26 = vpop.f32.mrb[83].mxu0  ;;  %v13160_v41 = vld [vmem:[%s16051_s1 + $0x1810] sm:$0xff]   ;;  %v13162_v23 = vld [vmem:[%s16051_s1 + $0x1858] sm:$0xff]  }
 0x45e   :  { %12021 = vmatpush3.bf16.msra.mxu1 %v13038_v59  ;;  %v13129_v59 = vld [vmem:[%s16051_s1 + $0x1740] sm:$0xff]  }
 0x45f   :  { %12022 = vmatprep.subr.bf16.mxu1 %v13041_v60  ;;  %v13133_v60 = vld [vmem:[%s16051_s1 + $0x1748] sm:$0xff]  }
 0x462   :  { %12023 = vmatpush3.bf16.msra.mxu1 %v13042_v49  ;;  %v13134_v49 = vld [vmem:[%s16051_s1 + $0x1708] sm:$0xff]  }
 0x463   :  { %12024 = vmatprep.subr.bf16.mxu1 %v13045_v56  ;;  %v13138_v56 = vld [vmem:[%s16051_s1 + $0x1710] sm:$0xff]  }
 0x466   :  { %12025 = vmatpush3.bf16.msra.mxu1 %v13046_v63 }
 0x467   :  { %12054 = vmatprep.subr.bf16.mxu1 %v13049_v3 }
 0x469   :  { %8559 = vmatmul.mubr.bf16.vlgmr.msra.gmra.mrb[92].mxu1 %v13476_v22  ;;  %v13058_v22 = vld [vmem:[%s16051_s1 + $0x14f0] sm:$0xff]  }
 0x46a   :  { %12055 = vmatpush3.bf16.msra.mxu1 %v13050_v2  ;;  %8638 = vmatprep.mubr.bf16.mxu1 %v13579_v1  ;;  %v13061_v1 = vld [vmem:[%s16051_s1 + $0x1538] sm:$0xff]  }
 0x46b   :  { %12056 = vmatprep.subr.bf16.mxu1 %v13053_v4 }
 0x46e   :  { %12057 = vmatpush3.bf16.msra.mxu1 %v13054_v6  ;;  %v13142_v6 = vld [vmem:[%s16051_s1 + $0x1718] sm:$0xff]  }
 0x46f   :  { %12058 = vmatprep.subr.bf16.mxu1 %v13057_v7  ;;  %v13145_v7 = vld [vmem:[%s16051_s1 + $0x1820] sm:$0xff]  }
 0x472   :  { %12059 = vmatpush3.bf16.msra.mxu1 %v13058_v22  ;;  %v13146_v22 = vld [vmem:[%s16051_s1 + $0x17e0] sm:$0xff]  }
 0x473   :  { %12060 = vmatprep.subr.bf16.mxu1 %v13061_v1  ;;  %v13147_v1 = vld [vmem:[%s16051_s1 + $0x1828] sm:$0xff]  }
 0x476   :  { %12061 = vmatpush3.bf16.msra.mxu1 %v13062_v10  ;;  %v13148_v10 = vld [vmem:[%s16051_s1 + $0x17e8] sm:$0xff]  }
 0x477   :  { %12062 = vmatprep.subr.bf16.mxu1 %v13065_v57  ;;  %v13149_v57 = vld [vmem:[%s16051_s1 + $0x1830] sm:$0xff]  }
 0x47a   :  { %12063 = vmatpush3.bf16.msra.mxu1 %v13066_v12  ;;  %v13150_v12 = vld [vmem:[%s16051_s1 + $0x17f0] sm:$0xff]  }
 0x47b   :  { %12064 = vmatprep.subr.bf16.mxu1 %v13069_v13  ;;  %v13153_v13 = vld [vmem:[%s16051_s1 + $0x1840] sm:$0xff]  }
 0x47e   :  { %12065 = vmatpush3.bf16.msra.mxu1 %v13070_v52  ;;  %v13154_v52 = vld [vmem:[%s16051_s1 + $0x1800] sm:$0xff]  }
 0x47f   :  { %12066 = vmatprep.subr.bf16.mxu1 %v13073_v14  ;;  %v13156_v14 = vld [vmem:[%s16051_s1 + $0x1848] sm:$0xff]  }
 0x482   :  { %12067 = vmatpush3.bf16.msra.mxu1 %v13074_v33  ;;  %v13157_v33 = vld [vmem:[%s16051_s1 + $0x1808] sm:$0xff]  }
 0x483   :  { %12068 = vmatprep.subr.bf16.mxu1 %v13077_v36  ;;  %v13159_v36 = vld [vmem:[%s16051_s1 + $0x1850] sm:$0xff]  }
 0x486   :  { %12069 = vmatpush3.bf16.msra.mxu1 %v13078_v37 }
 0x487   :  { %12098 = vmatprep.subr.bf16.mxu1 %v13081_v29 }
 0x489   :  { %8639 = vmatmul.mubr.bf16.vlgmr.msra.gmra.mrb[96].mxu1 %v13602_v8  ;;  %v13093_v8 = vld [vmem:[%s16051_s1 + $0x1638] sm:$0xff]  }
 0x48a   :  { %12099 = vmatpush3.bf16.msra.mxu1 %v13082_v47  ;;  %8718 = vmatprep.mubr.bf16.mxu1 %v13612_v11  ;;  %v13094_v11 = vld [vmem:[%s16051_s1 + $0x15f8] sm:$0xff]  }
 0x48b   :  { %12100 = vmatprep.subr.bf16.mxu1 %v13085_v18  ;;  %v13163_v18 = vld [vmem:[%s16051_s1 + $0x1818] sm:$0xff]  }
 0x48e   :  { %12101 = vmatpush3.bf16.msra.mxu1 %v13086_v31 }
 0x48f   :  { %12102 = vmatprep.subr.bf16.mxu1 %v13089_v54 }
 0x492   :  { %12103 = vmatpush3.bf16.msra.mxu1 %v13090_v17 }
 0x493   :  { %12104 = vmatprep.subr.bf16.mxu1 %v13093_v8 }
 0x494   :  { %v12004_v42 = vpop.f32.mrb[84].mxu0 }
 0x495   :  { %v12005_v43 = vpop.f32.mrb[85].mxu0 }
 0x496   :  { %12105 = vmatpush3.bf16.msra.mxu1 %v13094_v11  ;;  %v15880_v46 = vadd.f32 %v12005_v43, %v12004_v42  ;;  %v12007_v53 = vpop.f32.mrb[86].mxu0 }
 0x497   :  { %12106 = vmatprep.subr.bf16.mxu1 %v13097_v61  ;;  %v12008_v38 = vpop.f32.mrb[87].mxu0 }
 0x49a   :  { %12107 = vmatpush3.bf16.msra.mxu1 %v13098_v34 }
 0x49b   :  { %12108 = vmatprep.subr.bf16.mxu1 %v13101_v40 }
 0x49e   :  { %12109 = vmatpush3.bf16.msra.mxu1 %v13102_v28 }
 0x49f   :  { %12110 = vmatprep.subr.bf16.mxu1 %v13105_v16 }
 0x4a2   :  { %12111 = vmatpush3.bf16.msra.mxu1 %v13106_v35  ;;  %v10887_v35 = vld [vmem:[%s16052_s2 + $0x3] ss:$0 sm:$0xff] }
 0x4a3   :  { %12112 = vmatprep.subr.bf16.mxu1 %v13109_v25 }
 0x4a6   :  { %12113 = vmatpush3.bf16.msra.mxu1 %v13110_v58 }
 0x4a7   :  { %12142 = vmatprep.subr.bf16.mxu1 %v13113_v50 }
 0x4a9   :  { %8719 = vmatmul.mubr.bf16.vlgmr.msra.gmra.mrb[100].mxu1 %v13714_v48  ;;  %v13125_v48 = vld [vmem:[%s16051_s1 + $0x1738] sm:$0xff]  }
 0x4aa   :  { %12143 = vmatpush3.bf16.msra.mxu1 %v13114_v55  ;;  %8798 = vmatprep.mubr.bf16.mxu1 %v13817_v32  ;;  %v13126_v32 = vld [vmem:[%s16051_s1 + $0x16f8] sm:$0xff]  }
 0x4ab   :  { %12144 = vmatprep.subr.bf16.mxu1 %v13117_v51 }
 0x4ae   :  { %12145 = vmatpush3.bf16.msra.mxu1 %v13118_v21 }
 0x4af   :  { %12146 = vmatprep.subr.bf16.mxu1 %v13121_v19  ;;  %v13165_v19 = vld [vmem:[%s16053_s3 + $0xc0] sm:$0xff]  }
 0x4b0   :  { %12331 = vmatpush3.bf16.msra.mxu0 %v13165_v19 }
 0x4b1   :  { %12332 = vmatprep.subr.bf16.mxu0 %v13198_v30 }
 0x4b2   :  { %12147 = vmatpush3.bf16.msra.mxu1 %v13122_v24 }
 0x4b3   :  { %12148 = vmatprep.subr.bf16.mxu1 %v13125_v48  ;;  %v13167_v48 = vld [vmem:[%s16053_s3 + $0xd0] sm:$0xff]  }
 0x4b4   :  { %v12048_v63 = vpop.f32.mrb[88].mxu0 }
 0x4b5   :  { %v12049_v3 = vpop.f32.mrb[89].mxu0 }
 0x4b6   :  { %12149 = vmatpush3.bf16.msra.mxu1 %v13126_v32  ;;  %v15932_v2 = vadd.f32 %v12049_v3, %v12048_v63  ;;  %v12051_v5 = vpop.f32.mrb[90].mxu0  ;;  %v13169_v32 = vld [vmem:[%s16053_s3 + $0xe0] sm:$0xff]   ;;  %v13171_v3 = vld [vmem:[%s16053_s3 + $0xf0] sm:$0xff]  }
 0x4b7   :  { %12150 = vmatprep.subr.bf16.mxu1 %v13129_v59  ;;  %v12052_v4 = vpop.f32.mrb[91].mxu0  ;;  %v13170_v59 = vld [vmem:[%s16053_s3 + $0xe8] sm:$0xff]  }
 0x4ba   :  { %12151 = vmatpush3.bf16.msra.mxu1 %v13130_v45 }
 0x4bb   :  { %12152 = vmatprep.subr.bf16.mxu1 %v13133_v60 }
 0x4be   :  { %12153 = vmatpush3.bf16.msra.mxu1 %v13134_v49 }
 0x4bf   :  { %12154 = vmatprep.subr.bf16.mxu1 %v13137_v62 }
 0x4c2   :  { %12155 = vmatpush3.bf16.msra.mxu1 %v13138_v56 }
 0x4c3   :  { %12156 = vmatprep.subr.bf16.mxu1 %v13141_v0 }
 0x4c6   :  { %12157 = vmatpush3.bf16.msra.mxu1 %v13142_v6 }
 0x4c7   :  { %12186 = vmatprep.subr.bf16.mxu1 %v13145_v7 }
 0x4c9   :  { %8799 = vmatmul.mubr.bf16.vlgmr.msra.gmra.mrb[104].mxu1 %v13840_v39  ;;  %v13151_v39 = vld [vmem:[%s16051_s1 + $0x1838] sm:$0xff]  }
 0x4ca   :  { %12187 = vmatpush3.bf16.msra.mxu1 %v13146_v22  ;;  %8878 = vmatprep.mubr.bf16.mxu1 %v13850_v44  ;;  %v13152_v44 = vld [vmem:[%s16051_s1 + $0x17f8] sm:$0xff]  }
 0x4cb   :  { %12188 = vmatprep.subr.bf16.mxu1 %v13147_v1  ;;  %v13172_v22 = vld [vmem:[%s16053_s3 + $0xf8] sm:$0xff]  }
 0x4ce   :  { %12189 = vmatpush3.bf16.msra.mxu1 %v13148_v10 }
 0x4cf   :  { %12190 = vmatprep.subr.bf16.mxu1 %v13149_v57 }
 0x4d2   :  { %12191 = vmatpush3.bf16.msra.mxu1 %v13150_v12 }
 0x4d3   :  { %12192 = vmatprep.subr.bf16.mxu1 %v13151_v39 }
 0x4d4   :  { %v12092_v15 = vpop.f32.mrb[92].mxu0 }
 0x4d5   :  { %v12093_v37 = vpop.f32.mrb[93].mxu0 }
 0x4d6   :  { %12193 = vmatpush3.bf16.msra.mxu1 %v13152_v44  ;;  %v15984_v26 = vadd.f32 %v12093_v37, %v12092_v15  ;;  %v12095_v29 = vpop.f32.mrb[94].mxu0 }
 0x4d7   :  { %12194 = vmatprep.subr.bf16.mxu1 %v13153_v13  ;;  %v12096_v47 = vpop.f32.mrb[95].mxu0 }
 0x4da   :  { %12195 = vmatpush3.bf16.msra.mxu1 %v13154_v52 }
 0x4db   :  { %12196 = vmatprep.subr.bf16.mxu1 %v13156_v14 }
 0x4de   :  { %12197 = vmatpush3.bf16.msra.mxu1 %v13157_v33 }
 0x4df   :  { %12198 = vmatprep.subr.bf16.mxu1 %v13159_v36 }
 0x4e2   :  { %12199 = vmatpush3.bf16.msra.mxu1 %v13160_v41 }
 0x4e3   :  { %12200 = vmatprep.subr.bf16.mxu1 %v13162_v23 }
 0x4e6   :  { %12201 = vmatpush3.bf16.msra.mxu1 %v13163_v18 }
 0x4e9   :  { %8879 = vmatmul.mubr.bf16.vlgmr.msra.gmra.mrb[108].mxu1 %v13949_v27  ;;  %v8441_v27 = vadd.f32 %v15828_v20, %v10887_v35  ;;  %v13166_v20 = vld [vmem:[%s16053_s3 + $0xc8] sm:$0xff]  }
 0x4ea   :  { %12333 = vmatpush3.bf16.msra.mxu0 %v13166_v20 }
 0x4eb   :  { %12334 = vmatprep.subr.bf16.mxu0 %v13198_v30 }
 0x4ee   :  { %12335 = vmatpush3.bf16.msra.mxu0 %v13167_v48 }
 0x4ef   :  { %12336 = vmatprep.subr.bf16.mxu0 %v13198_v30 }
 0x4f4   :  { %v12136_v11 = vpop.f32.mrb[96].mxu0 }
 0x4f5   :  { %v12137_v34 = vpop.f32.mrb[97].mxu0 }
 0x4f6   :  { %v15993_v40 = vadd.f32 %v12137_v34, %v12136_v11  ;;  %v12139_v28 = vpop.f32.mrb[98].mxu0 }
 0x4f7   :  { %v12140_v16 = vpop.f32.mrb[99].mxu0 }
 0x4fc   :  { %v6822_v31 = vpop.f32.mrb[84].mxu1 }
 0x4fd   :  { %v15991_v54 = vadd.f32 %v6822_v31, %v15312_v9  ;;  %v12316_v17 = vpop.f32.mrb[85].mxu1 }
 0x4fe   :  { %v6825_v8 = vpop.f32.mrb[86].mxu1 }
 0x4ff   :  { %v12317_v61 = vpop.f32.mrb[87].mxu1 }
 0x515   :  { %v12180_v38 = vpop.f32.mrb[100].mxu0 }
 0x516   :  { %v12181_v50 = vpop.f32.mrb[101].mxu0 }
 0x517   :  { %v12182_v55 = vadd.f32 %v12181_v50, %v12180_v38  ;;  %v12183_v51 = vpop.f32.mrb[102].mxu0 }
 0x518   :  { %v12184_v24 = vpop.f32.mrb[103].mxu0 }
 0x51c   :  { %v11982_v42 = vpop.f32.mrb[88].mxu1 }
 0x51d   :  { %v11983_v25 = vpop.f32.mrb[89].mxu1 }
 0x51e   :  { %v11984_v43 = vadd.f32 %v11983_v25, %v11982_v42  ;;  %v11985_v9 = vpop.f32.mrb[90].mxu1 }
 0x51f   :  { %v11986_v53 = vpop.f32.mrb[91].mxu1 }
 0x520   :  { %v8481_v58 = vadd.f32 %v11984_v43, %v8441_v27 }
 0x522   :  { %v8521_v21 = vadd.f32 %v15880_v46, %v8481_v58  ;;  %v13168_v46 = vld [vmem:[%s16053_s3 + $0xd8] sm:$0xff]  }
 0x523   :  { %12337 = vmatpush3.bf16.msra.mxu0 %v13168_v46 }
 0x524   :  { %12338 = vmatprep.subr.bf16.mxu0 %v13198_v30 }
 0x526   :  { %v8920_v56 = vpop.f32.mrb[104].mxu0 }
 0x527   :  { %12339 = vmatpush3.bf16.msra.mxu0 %v13169_v32  ;;  %v12328_v0 = vpop.f32.mrb[105].mxu0 }
 0x528   :  { %12340 = vmatprep.subr.bf16.mxu0 %v13198_v30  ;;  %v8923_v4 = vpop.f32.mrb[106].mxu0 }
 0x529   :  { %v12329_v6 = vpop.f32.mrb[107].mxu0 }
 0x52b   :  { %12341 = vmatpush3.bf16.msra.mxu0 %v13170_v59 }
 0x52c   :  { %12342 = vmatprep.subr.bf16.mxu0 %v13198_v30 }
 0x52f   :  { %12343 = vmatpush3.bf16.msra.mxu0 %v13171_v3 }
 0x530   :  { %12344 = vmatprep.subr.bf16.mxu0 %v13198_v30 }
 0x533   :  { %12345 = vmatpush3.bf16.msra.mxu0 %v13172_v22 }
 0x53c   :  { %v12026_v45 = vpop.f32.mrb[92].mxu1 }
 0x53d   :  { %v12027_v60 = vpop.f32.mrb[93].mxu1 }
 0x53e   :  { %v12028_v49 = vadd.f32 %v12027_v60, %v12026_v45  ;;  %v12029_v62 = vpop.f32.mrb[94].mxu1 }
 0x53f   :  { %v12030_v63 = vpop.f32.mrb[95].mxu1 }
 0x540   :  { %v8561_v5 = vadd.f32 %v12028_v49, %v8521_v21 }
 0x542   :  { %v8601_v7 = vadd.f32 %v15932_v2, %v8561_v5 }
 0x55c   :  { %v12070_v1 = vpop.f32.mrb[96].mxu1 }
 0x55d   :  { %v12071_v10 = vpop.f32.mrb[97].mxu1 }
 0x55e   :  { %v12072_v57 = vadd.f32 %v12071_v10, %v12070_v1  ;;  %v12073_v12 = vpop.f32.mrb[98].mxu1 }
 0x55f   :  { %v12074_v39 = vpop.f32.mrb[99].mxu1 }
 0x560   :  { %v8641_v44 = vadd.f32 %v12072_v57, %v8601_v7 }
 0x562   :  { %v8681_v13 = vadd.f32 %v15984_v26, %v8641_v44 }
 0x57c   :  { %v12114_v52 = vpop.f32.mrb[100].mxu1 }
 0x57d   :  { %v12115_v14 = vpop.f32.mrb[101].mxu1 }
 0x57e   :  { %v12116_v33 = vadd.f32 %v12115_v14, %v12114_v52  ;;  %v12117_v36 = vpop.f32.mrb[102].mxu1 }
 0x57f   :  { %v12118_v2 = vpop.f32.mrb[103].mxu1 }
 0x580   :  { %v8721_v41 = vadd.f32 %v12116_v33, %v8681_v13 }
 0x582   :  { %v8761_v30 = vadd.f32 %v15993_v40, %v8721_v41  ;;  %v11109_v40 = vld [vmem:[%s16054_s4] ss:$0 sm:$0xff] }
 0x59c   :  { %v12158_v15 = vpop.f32.mrb[104].mxu1 }
 0x59d   :  { %v12159_v23 = vpop.f32.mrb[105].mxu1 }
 0x59e   :  { %v12160_v37 = vadd.f32 %v12159_v23, %v12158_v15  ;;  %v12161_v29 = vpop.f32.mrb[106].mxu1 }
 0x59f   :  { %v12162_v47 = vpop.f32.mrb[107].mxu1 }
 0x5a0   :  { %v8801_v18 = vadd.f32 %v12160_v37, %v8761_v30 }
 0x5a2   :  { %v8841_v31 = vadd.f32 %v12182_v55, %v8801_v18 }
 0x5bc   :  { %v12202_v17 = vpop.f32.mrb[108].mxu1 }
 0x5bd   :  { %v12203_v8 = vpop.f32.mrb[109].mxu1 }
 0x5be   :  { %v12204_v11 = vadd.f32 %v12203_v8, %v12202_v17  ;;  %v12205_v61 = vpop.f32.mrb[110].mxu1 }
 0x5bf   :  { %v12206_v26 = vpop.f32.mrb[111].mxu1 }
 0x5c0   :  { %v8881_v34 = vadd.f32 %v12204_v11, %v8841_v31 }
 0x5c2   :  { %v8921_v28 = vadd.f32 %v8920_v56, %v8881_v34 }
 0x5c4   :  { %v8926_v16 = vmax.f32 %v8921_v28, 0.0 }
 0x5c6   :  { %v8927_v35 = vpack.c.bf16 %v8926_v16, %v8926_v16 }
 0x5c8   :  { %12347 = vmatmul.mubr.bf16.vlgmr.msra.gmra.mrb[108].mxu0 %v8927_v35 }
 0x69b   :  { %v9027_v42 = vpop.f32.mrb[108].mxu0 }
 0x69c   :  { %v9033_v25 = vadd.f32 %v9027_v42, %v15991_v54  ;;  %v12348_v27 = vpop.f32.mrb[109].mxu0 }
 0x69d   :  { %v9030_v43 = vpop.f32.mrb[110].mxu0 }
 0x69e   :  { %v12349_v9 = vpop.f32.mrb[111].mxu0  ;;  %v9041_v53 = vadd.f32 %v11109_v40, %v9033_v25 }
 0x6a0   :  { %9042 = vst [vmem:[#allocation2] sm:$0x3] %v9041_v53 }
 0x6a1   :  { %13184 = shalt.err (!%p13181_p4)
}
 0x6a2   :  { %s13185_s4 = scalar_lea.hbm %s16055_s5, 32 }
 0x6a3   :  { %p13186_p5 = scmp.ne.s32.totalorder %s16055_s5, %s13185_s4  ;;  %p13189_p6 = scmp.lt.u32.totalorder %s13185_s4, %s16055_s5 }
 0x6a5   :  { %p13191_p7 = pnand %p13189_p6, %p13186_p5 }
 0x6a7   :  { %13194 = shalt.err (!%p13191_p7)
}
 0x6a8   :  { %9052 = dma.vmem_to_hbm [thread:$0]  %s9050_s18, 32, %s16055_s5, [#allocation3]  }
 0x6a9   :  { %13195 = dma.done.wait [#allocation3], 32  }
 0x6aa   :  { %13196 = vsyncadd [#allocation3], 4294967264 }
 0x6ab   :  { %9056 = vsyncpa [#allocation3], 1 }

</bundles_post_ra>
